<compile_context>
chip_gen: v7x
topology: tpu7x:2x2x1
jax: 0.10.0
libtpu: 0.0.40
codegen_flags: <defaults>
</compile_context>

<pallas_src>
import functools
import math

import jax
import jax.numpy as jnp
from jax.experimental import pallas as pl
from jax.experimental.pallas import tpu as pltpu

D_MODEL = 32
N_HEADS = 4
D_FF = 64
N_LAYERS = 2
C_OUT = 8
LN_EPS = 1e-5
VEC_ROWS_PER_LAYER = 12
VEC_PAD = 128


def _layernorm(x, gamma, beta):
    mu = jnp.mean(x, axis=-1, keepdims=True)
    xc = x - mu
    var = jnp.mean(xc * xc, axis=-1, keepdims=True)
    inv = jax.lax.rsqrt(var + LN_EPS)
    return xc * inv * gamma + beta


def decoder_kernel(x_ref, cross_ref,
                   w_qkv_ref, w_out_ref, w_ffn1_ref, w_ffn2_ref, w_proj_ref,
                   vec_ref, o_ref, *, n_layers, n_heads):
    """Processes a (bb, L, D) batch block; all layers + final norm + projection fused."""
    bb, L, D = x_ref.shape
    _, S, _ = cross_ref.shape
    dh = D // n_heads
    NQ = bb * L

    # Flatten the batch block so QKV / FFN / projection matmuls use all rows at once.
    x = x_ref[...].astype(jnp.float32).reshape(NQ, D)
    cross_bf = cross_ref[...].astype(jnp.bfloat16).reshape(bb * S, D)

    # Additive causal mask (TriangularCausalMask), built once.
    row = jax.lax.broadcasted_iota(jnp.int32, (L, L), 0)
    col = jax.lax.broadcasted_iota(jnp.int32, (L, L), 1)
    causal_add = jnp.where(col <= row, jnp.float32(0.0), jnp.float32(-1e30))

    def attn(xq_f32, idx, bias_row, out_bias_row, causal):
        """Fused-QKV multi-head attention; per-head work only on score/softmax/PV."""
        w = w_qkv_ref[idx]                                    # (D, 3D) bf16
        xq = xq_f32.astype(jnp.bfloat16)
        if causal:
            # self-attention: one fused QKV matmul (scale pre-folded into W_q / b_q)
            qkv = (jnp.dot(xq, w, preferred_element_type=jnp.float32)
                   + vec_ref[bias_row:bias_row + 1, :3 * D])
            q_all = qkv[:, 0 * D:1 * D]
            k_all = qkv[:, 1 * D:2 * D]
            v_all = qkv[:, 2 * D:3 * D]
            n_kv = L
        else:
            # cross-attention: Q from x, fused KV from cross
            q_all = (jnp.dot(xq, w[:, :D], preferred_element_type=jnp.float32)
                     + vec_ref[bias_row:bias_row + 1, :D])
            kv = (jnp.dot(cross_bf, w[:, D:3 * D], preferred_element_type=jnp.float32)
                  + vec_ref[bias_row:bias_row + 1, D:3 * D])
            k_all = kv[:, :D]
            v_all = kv[:, D:2 * D]
            n_kv = S

        head_slabs = []
        for b in range(bb):                                   # static unroll (bb small)
            per_head = []
            for h in range(n_heads):                          # static unroll over heads
                qh = q_all[b * L:(b + 1) * L, h * dh:(h + 1) * dh].astype(jnp.bfloat16)
                kh = k_all[b * n_kv:(b + 1) * n_kv, h * dh:(h + 1) * dh].astype(jnp.bfloat16)
                vh = v_all[b * n_kv:(b + 1) * n_kv, h * dh:(h + 1) * dh].astype(jnp.bfloat16)
                s = jnp.dot(qh, kh.T, preferred_element_type=jnp.float32)
                if causal:
                    s = s + causal_add
                s = s - jnp.max(s, axis=-1, keepdims=True)
                p = jnp.exp(s)
                p = p * pl.reciprocal(jnp.sum(p, axis=-1, keepdims=True), approx=True)
                per_head.append(jnp.dot(p.astype(jnp.bfloat16), vh,
                                        preferred_element_type=jnp.float32))
            head_slabs.append(jnp.concatenate(per_head, axis=-1))     # (L, D)
        heads = head_slabs[0] if bb == 1 else jnp.concatenate(head_slabs, axis=0)

        # single fused output projection
        return (jnp.dot(heads.astype(jnp.bfloat16), w_out_ref[idx],
                        preferred_element_type=jnp.float32)
                + vec_ref[out_bias_row:out_bias_row + 1, :D])

    d_ff = w_ffn1_ref.shape[-1]
    for l in range(n_layers):                                 # static unroll over layers
        base = l * VEC_ROWS_PER_LAYER

        # x = norm1(x + SelfAttention(x))        (dropout == identity)
        a = attn(x, l * 2 + 0, base + 0, base + 3, causal=True)
        x = _layernorm(x + a, vec_ref[base + 6:base + 7, :D], vec_ref[base + 7:base + 8, :D])

        # x = norm2(x + CrossAttention(x, cross))
        a = attn(x, l * 2 + 1, base + 1, base + 4, causal=False)
        x = _layernorm(x + a, vec_ref[base + 8:base + 9, :D], vec_ref[base + 9:base + 10, :D])

        # FFN: conv1d(kernel=1) == dense, ReLU, dense
        y = (jnp.dot(x.astype(jnp.bfloat16), w_ffn1_ref[l],
                     preferred_element_type=jnp.float32)
             + vec_ref[base + 2:base + 3, :d_ff])
        y = jnp.maximum(y, 0.0)
        y = (jnp.dot(y.astype(jnp.bfloat16), w_ffn2_ref[l],
                     preferred_element_type=jnp.float32)
             + vec_ref[base + 5:base + 6, :D])
        x = _layernorm(x + y, vec_ref[base + 10:base + 11, :D], vec_ref[base + 11:base + 12, :D])

    # final norm + projection (fused epilogue)
    fbase = n_layers * VEC_ROWS_PER_LAYER
    x = _layernorm(x, vec_ref[fbase + 0:fbase + 1, :D], vec_ref[fbase + 1:fbase + 2, :D])
    c_out = o_ref.shape[-1]
    out = (jnp.dot(x.astype(jnp.bfloat16), w_proj_ref[...],
                   preferred_element_type=jnp.float32)
           + vec_ref[fbase + 2:fbase + 3, :c_out])
    o_ref[...] = out.reshape(bb, L, c_out).astype(o_ref.dtype)


def _const_spec(shape):
    zeros = (0,) * len(shape)
    return pl.BlockSpec(shape, lambda i, _z=zeros: _z)


def decoder_forward(x, cross, packed, *, n_layers=N_LAYERS, n_heads=N_HEADS,
                    fold_batch=None):
    """x: (B, L, D), cross: (B, S, D) -> (B, L, c_out). One fused pallas_call."""
    B, L, D = x.shape
    _, S, _ = cross.shape
    c_out = packed['w_proj'].shape[1]

    if fold_batch is None:
        # Single-TC chips (v5e/v6e): fold the batch into one grid step (no per-step tax).
        # Dual-TC v7x: keep grid=(B,) parallel so both TensorCores get work.
        kind = jax.devices()[0].device_kind.lower()
        fold_batch = ("v7" not in kind) or (B == 1)
    bb = B if fold_batch else 1

    kernel = functools.partial(decoder_kernel, n_layers=n_layers, n_heads=n_heads)
    param_order = ['w_qkv', 'w_out', 'w_ffn1', 'w_ffn2', 'w_proj', 'vec']
    params = [packed[k] for k in param_order]

    in_specs = [pl.BlockSpec((bb, L, D), lambda i: (i, 0, 0)),
                pl.BlockSpec((bb, S, D), lambda i: (i, 0, 0))]
    in_specs += [_const_spec(p.shape) for p in params]

    return pl.pallas_call(
        kernel,
        out_shape=jax.ShapeDtypeStruct((B, L, c_out), x.dtype),
        grid=(B // bb,),
        in_specs=in_specs,
        out_specs=pl.BlockSpec((bb, L, c_out), lambda i: (i, 0, 0)),
        compiler_params=pltpu.CompilerParams(dimension_semantics=("parallel",)),
    )(x, cross, *params)


def init_decoder_layer_params(key, d_model, n_heads, d_ff):
    ks = jax.random.split(key, 10)
    s = 0.02
    w = lambda k, shp: jax.random.normal(k, shp, jnp.float32) * s
    z = lambda n: jnp.zeros((n,), jnp.float32)
    one = lambda n: jnp.ones((n,), jnp.float32)
    # NOTE: weights here are stored (in, out) for `x @ W`; real PyTorch nn.Linear /
    # Conv1d weights must be transposed before packing.
    return dict(
        sa_wq=w(ks[0], (d_model, d_model)), sa_bq=z(d_model),
        sa_wk=w(ks[1], (d_model, d_model)), sa_bk=z(d_model),
        sa_wv=w(ks[2], (d_model, d_model)), sa_bv=z(d_model),
        sa_wo=w(ks[3], (d_model, d_model)), sa_bo=z(d_model),
        ca_wq=w(ks[4], (d_model, d_model)), ca_bq=z(d_model),
        ca_wk=w(ks[5], (d_model, d_model)), ca_bk=z(d_model),
        ca_wv=w(ks[6], (d_model, d_model)), ca_bv=z(d_model),
        ca_wo=w(ks[7], (d_model, d_model)), ca_bo=z(d_model),
        ffn_w1=w(ks[8], (d_model, d_ff)), ffn_b1=z(d_ff),
        ffn_w2=w(ks[9], (d_ff, d_model)), ffn_b2=z(d_model),
        g1=one(d_model), be1=z(d_model),
        g2=one(d_model), be2=z(d_model),
        g3=one(d_model), be3=z(d_model),
    )


def pack_decoder_params(layer_params, norm_g, norm_b, w_proj, b_proj, n_heads):
    """Pack params into a handful of MXU-friendly slabs + ONE vector slab."""
    d_model = w_proj.shape[0]
    dh = d_model // n_heads
    scale = jnp.float32(1.0 / math.sqrt(dh))      # folded into W_q / b_q

    def padrow(v):
        v = jnp.asarray(v, jnp.float32).reshape(-1)
        return jnp.pad(v, (0, VEC_PAD - v.shape[0]))

    w_qkv, w_out, w_f1, w_f2, vec_rows = [], [], [], [], []
    for lp in layer_params:
        for pref in ("sa", "ca"):
            w_qkv.append(jnp.concatenate(
                [lp[f"{pref}_wq"] * scale, lp[f"{pref}_wk"], lp[f"{pref}_wv"]], axis=1))
            w_out.append(lp[f"{pref}_wo"])
        vec_rows += [
            padrow(jnp.concatenate([lp["sa_bq"] * scale, lp["sa_bk"], lp["sa_bv"]])),  # 0
            padrow(jnp.concatenate([lp["ca_bq"] * scale, lp["ca_bk"], lp["ca_bv"]])),  # 1
            padrow(lp["ffn_b1"]),                                                      # 2
            padrow(lp["sa_bo"]),                                                       # 3
            padrow(lp["ca_bo"]),                                                       # 4
            padrow(lp["ffn_b2"]),                                                      # 5
            padrow(lp["g1"]), padrow(lp["be1"]),                                       # 6,7
            padrow(lp["g2"]), padrow(lp["be2"]),                                       # 8,9
            padrow(lp["g3"]), padrow(lp["be3"]),                                       # 10,11
        ]
        w_f1.append(lp["ffn_w1"])
        w_f2.append(lp["ffn_w2"])
    vec_rows += [padrow(norm_g), padrow(norm_b), padrow(b_proj)]

    return dict(
        w_qkv=jnp.stack(w_qkv, axis=0).astype(jnp.bfloat16),   # (NL*2, D, 3D)
        w_out=jnp.stack(w_out, axis=0).astype(jnp.bfloat16),   # (NL*2, D, D)
        w_ffn1=jnp.stack(w_f1, axis=0).astype(jnp.bfloat16),   # (NL, D, d_ff)
        w_ffn2=jnp.stack(w_f2, axis=0).astype(jnp.bfloat16),   # (NL, d_ff, D)
        w_proj=jnp.asarray(w_proj).astype(jnp.bfloat16),       # (D, c_out)
        vec=jnp.stack(vec_rows, axis=0),                       # (NL*12+3, 128) f32
    )


if __name__ == "__main__":
    key = jax.random.PRNGKey(0)
    B, L_DEC, L_ENC = 2, 8, 16

    key, kx, kc = jax.random.split(key, 3)
    x = jax.random.normal(kx, (B, L_DEC, D_MODEL), dtype=jnp.float32)
    cross = jax.random.normal(kc, (B, L_ENC, D_MODEL), dtype=jnp.float32)

    layer_params = []
    for _ in range(N_LAYERS):
        key, kl = jax.random.split(key)
        layer_params.append(init_decoder_layer_params(kl, D_MODEL, N_HEADS, D_FF))

    key, kp = jax.random.split(key)
    norm_g = jnp.ones((D_MODEL,), jnp.float32)
    norm_b = jnp.zeros((D_MODEL,), jnp.float32)
    w_proj = jax.random.normal(kp, (D_MODEL, C_OUT), jnp.float32) * 0.02
    b_proj = jnp.zeros((1, C_OUT), jnp.float32)

    packed = pack_decoder_params(layer_params, norm_g, norm_b, w_proj, b_proj, N_HEADS)

    out = decoder_forward(x, cross, packed, n_layers=N_LAYERS, n_heads=N_HEADS)
    out = jax.block_until_ready(out)

    assert out.shape == (B, L_DEC, C_OUT) and out.dtype == jnp.float32
    assert bool(jnp.all(jnp.isfinite(out)))
    print("KERNEL_OK")
</pallas_src>

<mosaic_0001>
module attributes {stable_mosaic.version = 11 : i64} {
  func.func @decoder_kernel(%arg0: i32, %arg1: memref<2x8x32xf32, #tpu.memory_space<vmem>>, %arg2: memref<2x16x32xf32, #tpu.memory_space<vmem>>, %arg3: memref<4x32x96xbf16, #tpu.memory_space<vmem>>, %arg4: memref<4x32x32xbf16, #tpu.memory_space<vmem>>, %arg5: memref<2x32x64xbf16, #tpu.memory_space<vmem>>, %arg6: memref<2x64x32xbf16, #tpu.memory_space<vmem>>, %arg7: memref<32x8xbf16, #tpu.memory_space<vmem>>, %arg8: memref<27x128xf32, #tpu.memory_space<vmem>>, %arg9: memref<2x8x8xf32, #tpu.memory_space<vmem>>) attributes {dimension_semantics = [#tpu.dimension_semantics<parallel>], iteration_bounds = array<i64: 1>, scalar_prefetch = 0 : i64, scratch_operands = 0 : i64, tpu.core_type = #tpu.core_type<tc>, window_params = [{transform_indices = @transform_0, window_bounds = array<i64: 2, 8, 32>}, {transform_indices = @transform_1, window_bounds = array<i64: 2, 16, 32>}, {pipeline_mode = #tpu.pipeline_mode<synchronous>, transform_indices = @transform_2, window_bounds = array<i64: 4, 32, 96>}, {pipeline_mode = #tpu.pipeline_mode<synchronous>, transform_indices = @transform_3, window_bounds = array<i64: 4, 32, 32>}, {pipeline_mode = #tpu.pipeline_mode<synchronous>, transform_indices = @transform_4, window_bounds = array<i64: 2, 32, 64>}, {pipeline_mode = #tpu.pipeline_mode<synchronous>, transform_indices = @transform_5, window_bounds = array<i64: 2, 64, 32>}, {pipeline_mode = #tpu.pipeline_mode<synchronous>, transform_indices = @transform_6, window_bounds = array<i64: 32, 8>}, {pipeline_mode = #tpu.pipeline_mode<synchronous>, transform_indices = @transform_7, window_bounds = array<i64: 27, 128>}, {transform_indices = @transform_8, window_bounds = array<i64: 2, 8, 8>}]} {
    %c0 = arith.constant 0 : index
    %c0_0 = arith.constant 0 : index
    %c0_1 = arith.constant 0 : index
    %0 = vector.load %arg1[%c0, %c0_0, %c0_1] : memref<2x8x32xf32, #tpu.memory_space<vmem>>, vector<2x8x32xf32>
    %1 = vector.shape_cast %0 : vector<2x8x32xf32> to vector<16x32xf32>
    %c0_2 = arith.constant 0 : index
    %c0_3 = arith.constant 0 : index
    %c0_4 = arith.constant 0 : index
    %2 = vector.load %arg2[%c0_2, %c0_3, %c0_4] : memref<2x16x32xf32, #tpu.memory_space<vmem>>, vector<2x16x32xf32>
    %3 = arith.truncf %2 : vector<2x16x32xf32> to vector<2x16x32xbf16>
    %4 = vector.shape_cast %3 : vector<2x16x32xbf16> to vector<32x32xbf16>
    %5 = tpu.iota {dimensions = array<i32: 0>} : vector<8x8xi32>
    %6 = tpu.iota {dimensions = array<i32: 1>} : vector<8x8xi32>
    %7 = arith.cmpi sle, %6, %5 : vector<8x8xi32>
    %cst = arith.constant 0.000000e+00 : f32
    %cst_5 = arith.constant -1.000000e+30 : f32
    %8 = vector.broadcast %cst : f32 to vector<8x8xf32>
    %9 = vector.broadcast %cst_5 : f32 to vector<8x8xf32>
    %10 = arith.select %7, %8, %9 : vector<8x8xi1>, vector<8x8xf32>
    %c0_6 = arith.constant 0 : index
    %c0_7 = arith.constant 0 : index
    %c0_8 = arith.constant 0 : index
    %11 = vector.load %arg3[%c0_6, %c0_7, %c0_8] : memref<4x32x96xbf16, #tpu.memory_space<vmem>>, vector<1x32x96xbf16>
    %12 = vector.shape_cast %11 : vector<1x32x96xbf16> to vector<32x96xbf16>
    %13 = arith.truncf %1 : vector<16x32xf32> to vector<16x32xbf16>
    %cst_9 = arith.constant dense<0.000000e+00> : vector<16x96xf32>
    %14 = tpu.matmul %13, %12, %cst_9 {dimension_numbers = #tpu.dot_dimension_numbers<[1], [0], [0], [1], [0, 0, 1, 1], [], []>} : vector<16x32xbf16>, vector<32x96xbf16>, vector<16x96xf32> -> vector<16x96xf32>
    %c0_10 = arith.constant 0 : index
    %c0_11 = arith.constant 0 : index
    %15 = vector.load %arg8[%c0_10, %c0_11] : memref<27x128xf32, #tpu.memory_space<vmem>>, vector<1x96xf32>
    %16 = vector.broadcast %15 : vector<1x96xf32> to vector<16x96xf32>
    %17 = arith.addf %14, %16 : vector<16x96xf32>
    %18 = vector.extract_strided_slice %17 {offsets = [0, 0], sizes = [16, 32], strides = [1, 1]} : vector<16x96xf32> to vector<16x32xf32>
    %19 = vector.extract_strided_slice %17 {offsets = [0, 32], sizes = [16, 32], strides = [1, 1]} : vector<16x96xf32> to vector<16x32xf32>
    %20 = vector.extract_strided_slice %17 {offsets = [0, 64], sizes = [16, 32], strides = [1, 1]} : vector<16x96xf32> to vector<16x32xf32>
    %21 = vector.extract_strided_slice %18 {offsets = [0, 0], sizes = [8, 8], strides = [1, 1]} : vector<16x32xf32> to vector<8x8xf32>
    %22 = arith.truncf %21 : vector<8x8xf32> to vector<8x8xbf16>
    %23 = vector.extract_strided_slice %19 {offsets = [0, 0], sizes = [8, 8], strides = [1, 1]} : vector<16x32xf32> to vector<8x8xf32>
    %24 = arith.truncf %23 : vector<8x8xf32> to vector<8x8xbf16>
    %25 = vector.extract_strided_slice %20 {offsets = [0, 0], sizes = [8, 8], strides = [1, 1]} : vector<16x32xf32> to vector<8x8xf32>
    %26 = arith.truncf %25 : vector<8x8xf32> to vector<8x8xbf16>
    %27 = tpu.transpose %24, [1, 0] : vector<8x8xbf16> -> vector<8x8xbf16>
    %cst_12 = arith.constant dense<0.000000e+00> : vector<8x8xf32>
    %28 = tpu.matmul %22, %27, %cst_12 {dimension_numbers = #tpu.dot_dimension_numbers<[1], [0], [0], [1], [0, 0, 1, 1], [], []>} : vector<8x8xbf16>, vector<8x8xbf16>, vector<8x8xf32> -> vector<8x8xf32>
    %29 = arith.addf %28, %10 : vector<8x8xf32>
    %cst_13 = arith.constant dense<0xFF800000> : vector<8xf32>
    %30 = vector.multi_reduction <maximumf>, %29, %cst_13 [1] : vector<8x8xf32> to vector<8xf32>
    %31 = vector.shape_cast %30 : vector<8xf32> to vector<8x1xf32>
    %32 = vector.broadcast %31 : vector<8x1xf32> to vector<8x8xf32>
    %33 = arith.subf %29, %32 : vector<8x8xf32>
    %34 = math.exp %33 : vector<8x8xf32>
    %cst_14 = arith.constant dense<0.000000e+00> : vector<8xf32>
    %35 = vector.multi_reduction <add>, %34, %cst_14 [1] : vector<8x8xf32> to vector<8xf32>
    %36 = vector.shape_cast %35 : vector<8xf32> to vector<8x1xf32>
    %37 = tpu.reciprocal %36 {approx = true} : vector<8x1xf32> -> vector<8x1xf32>
    %38 = vector.broadcast %37 : vector<8x1xf32> to vector<8x8xf32>
    %39 = arith.mulf %34, %38 : vector<8x8xf32>
    %40 = arith.truncf %39 : vector<8x8xf32> to vector<8x8xbf16>
    %cst_15 = arith.constant dense<0.000000e+00> : vector<8x8xf32>
    %41 = tpu.matmul %40, %26, %cst_15 {dimension_numbers = #tpu.dot_dimension_numbers<[1], [0], [0], [1], [0, 0, 1, 1], [], []>} : vector<8x8xbf16>, vector<8x8xbf16>, vector<8x8xf32> -> vector<8x8xf32>
    %42 = vector.extract_strided_slice %18 {offsets = [0, 8], sizes = [8, 8], strides = [1, 1]} : vector<16x32xf32> to vector<8x8xf32>
    %43 = arith.truncf %42 : vector<8x8xf32> to vector<8x8xbf16>
    %44 = vector.extract_strided_slice %19 {offsets = [0, 8], sizes = [8, 8], strides = [1, 1]} : vector<16x32xf32> to vector<8x8xf32>
    %45 = arith.truncf %44 : vector<8x8xf32> to vector<8x8xbf16>
    %46 = vector.extract_strided_slice %20 {offsets = [0, 8], sizes = [8, 8], strides = [1, 1]} : vector<16x32xf32> to vector<8x8xf32>
    %47 = arith.truncf %46 : vector<8x8xf32> to vector<8x8xbf16>
    %48 = tpu.transpose %45, [1, 0] : vector<8x8xbf16> -> vector<8x8xbf16>
    %cst_16 = arith.constant dense<0.000000e+00> : vector<8x8xf32>
    %49 = tpu.matmul %43, %48, %cst_16 {dimension_numbers = #tpu.dot_dimension_numbers<[1], [0], [0], [1], [0, 0, 1, 1], [], []>} : vector<8x8xbf16>, vector<8x8xbf16>, vector<8x8xf32> -> vector<8x8xf32>
    %50 = arith.addf %49, %10 : vector<8x8xf32>
    %cst_17 = arith.constant dense<0xFF800000> : vector<8xf32>
    %51 = vector.multi_reduction <maximumf>, %50, %cst_17 [1] : vector<8x8xf32> to vector<8xf32>
    %52 = vector.shape_cast %51 : vector<8xf32> to vector<8x1xf32>
    %53 = vector.broadcast %52 : vector<8x1xf32> to vector<8x8xf32>
    %54 = arith.subf %50, %53 : vector<8x8xf32>
    %55 = math.exp %54 : vector<8x8xf32>
    %cst_18 = arith.constant dense<0.000000e+00> : vector<8xf32>
    %56 = vector.multi_reduction <add>, %55, %cst_18 [1] : vector<8x8xf32> to vector<8xf32>
    %57 = vector.shape_cast %56 : vector<8xf32> to vector<8x1xf32>
    %58 = tpu.reciprocal %57 {approx = true} : vector<8x1xf32> -> vector<8x1xf32>
    %59 = vector.broadcast %58 : vector<8x1xf32> to vector<8x8xf32>
    %60 = arith.mulf %55, %59 : vector<8x8xf32>
    %61 = arith.truncf %60 : vector<8x8xf32> to vector<8x8xbf16>
    %cst_19 = arith.constant dense<0.000000e+00> : vector<8x8xf32>
    %62 = tpu.matmul %61, %47, %cst_19 {dimension_numbers = #tpu.dot_dimension_numbers<[1], [0], [0], [1], [0, 0, 1, 1], [], []>} : vector<8x8xbf16>, vector<8x8xbf16>, vector<8x8xf32> -> vector<8x8xf32>
    %63 = vector.extract_strided_slice %18 {offsets = [0, 16], sizes = [8, 8], strides = [1, 1]} : vector<16x32xf32> to vector<8x8xf32>
    %64 = arith.truncf %63 : vector<8x8xf32> to vector<8x8xbf16>
    %65 = vector.extract_strided_slice %19 {offsets = [0, 16], sizes = [8, 8], strides = [1, 1]} : vector<16x32xf32> to vector<8x8xf32>
    %66 = arith.truncf %65 : vector<8x8xf32> to vector<8x8xbf16>
    %67 = vector.extract_strided_slice %20 {offsets = [0, 16], sizes = [8, 8], strides = [1, 1]} : vector<16x32xf32> to vector<8x8xf32>
    %68 = arith.truncf %67 : vector<8x8xf32> to vector<8x8xbf16>
    %69 = tpu.transpose %66, [1, 0] : vector<8x8xbf16> -> vector<8x8xbf16>
    %cst_20 = arith.constant dense<0.000000e+00> : vector<8x8xf32>
    %70 = tpu.matmul %64, %69, %cst_20 {dimension_numbers = #tpu.dot_dimension_numbers<[1], [0], [0], [1], [0, 0, 1, 1], [], []>} : vector<8x8xbf16>, vector<8x8xbf16>, vector<8x8xf32> -> vector<8x8xf32>
    %71 = arith.addf %70, %10 : vector<8x8xf32>
    %cst_21 = arith.constant dense<0xFF800000> : vector<8xf32>
    %72 = vector.multi_reduction <maximumf>, %71, %cst_21 [1] : vector<8x8xf32> to vector<8xf32>
    %73 = vector.shape_cast %72 : vector<8xf32> to vector<8x1xf32>
    %74 = vector.broadcast %73 : vector<8x1xf32> to vector<8x8xf32>
    %75 = arith.subf %71, %74 : vector<8x8xf32>
    %76 = math.exp %75 : vector<8x8xf32>
    %cst_22 = arith.constant dense<0.000000e+00> : vector<8xf32>
    %77 = vector.multi_reduction <add>, %76, %cst_22 [1] : vector<8x8xf32> to vector<8xf32>
    %78 = vector.shape_cast %77 : vector<8xf32> to vector<8x1xf32>
    %79 = tpu.reciprocal %78 {approx = true} : vector<8x1xf32> -> vector<8x1xf32>
    %80 = vector.broadcast %79 : vector<8x1xf32> to vector<8x8xf32>
    %81 = arith.mulf %76, %80 : vector<8x8xf32>
    %82 = arith.truncf %81 : vector<8x8xf32> to vector<8x8xbf16>
    %cst_23 = arith.constant dense<0.000000e+00> : vector<8x8xf32>
    %83 = tpu.matmul %82, %68, %cst_23 {dimension_numbers = #tpu.dot_dimension_numbers<[1], [0], [0], [1], [0, 0, 1, 1], [], []>} : vector<8x8xbf16>, vector<8x8xbf16>, vector<8x8xf32> -> vector<8x8xf32>
    %84 = vector.extract_strided_slice %18 {offsets = [0, 24], sizes = [8, 8], strides = [1, 1]} : vector<16x32xf32> to vector<8x8xf32>
    %85 = arith.truncf %84 : vector<8x8xf32> to vector<8x8xbf16>
    %86 = vector.extract_strided_slice %19 {offsets = [0, 24], sizes = [8, 8], strides = [1, 1]} : vector<16x32xf32> to vector<8x8xf32>
    %87 = arith.truncf %86 : vector<8x8xf32> to vector<8x8xbf16>
    %88 = vector.extract_strided_slice %20 {offsets = [0, 24], sizes = [8, 8], strides = [1, 1]} : vector<16x32xf32> to vector<8x8xf32>
    %89 = arith.truncf %88 : vector<8x8xf32> to vector<8x8xbf16>
    %90 = tpu.transpose %87, [1, 0] : vector<8x8xbf16> -> vector<8x8xbf16>
    %cst_24 = arith.constant dense<0.000000e+00> : vector<8x8xf32>
    %91 = tpu.matmul %85, %90, %cst_24 {dimension_numbers = #tpu.dot_dimension_numbers<[1], [0], [0], [1], [0, 0, 1, 1], [], []>} : vector<8x8xbf16>, vector<8x8xbf16>, vector<8x8xf32> -> vector<8x8xf32>
    %92 = arith.addf %91, %10 : vector<8x8xf32>
    %cst_25 = arith.constant dense<0xFF800000> : vector<8xf32>
    %93 = vector.multi_reduction <maximumf>, %92, %cst_25 [1] : vector<8x8xf32> to vector<8xf32>
    %94 = vector.shape_cast %93 : vector<8xf32> to vector<8x1xf32>
    %95 = vector.broadcast %94 : vector<8x1xf32> to vector<8x8xf32>
    %96 = arith.subf %92, %95 : vector<8x8xf32>
    %97 = math.exp %96 : vector<8x8xf32>
    %cst_26 = arith.constant dense<0.000000e+00> : vector<8xf32>
    %98 = vector.multi_reduction <add>, %97, %cst_26 [1] : vector<8x8xf32> to vector<8xf32>
    %99 = vector.shape_cast %98 : vector<8xf32> to vector<8x1xf32>
    %100 = tpu.reciprocal %99 {approx = true} : vector<8x1xf32> -> vector<8x1xf32>
    %101 = vector.broadcast %100 : vector<8x1xf32> to vector<8x8xf32>
    %102 = arith.mulf %97, %101 : vector<8x8xf32>
    %103 = arith.truncf %102 : vector<8x8xf32> to vector<8x8xbf16>
    %cst_27 = arith.constant dense<0.000000e+00> : vector<8x8xf32>
    %104 = tpu.matmul %103, %89, %cst_27 {dimension_numbers = #tpu.dot_dimension_numbers<[1], [0], [0], [1], [0, 0, 1, 1], [], []>} : vector<8x8xbf16>, vector<8x8xbf16>, vector<8x8xf32> -> vector<8x8xf32>
    %105 = tpu.concatenate %41, %62, %83, %104 in 1 : vector<8x8xf32>, vector<8x8xf32>, vector<8x8xf32>, vector<8x8xf32> -> vector<8x32xf32>
    %106 = vector.extract_strided_slice %18 {offsets = [8, 0], sizes = [8, 8], strides = [1, 1]} : vector<16x32xf32> to vector<8x8xf32>
    %107 = arith.truncf %106 : vector<8x8xf32> to vector<8x8xbf16>
    %108 = vector.extract_strided_slice %19 {offsets = [8, 0], sizes = [8, 8], strides = [1, 1]} : vector<16x32xf32> to vector<8x8xf32>
    %109 = arith.truncf %108 : vector<8x8xf32> to vector<8x8xbf16>
    %110 = vector.extract_strided_slice %20 {offsets = [8, 0], sizes = [8, 8], strides = [1, 1]} : vector<16x32xf32> to vector<8x8xf32>
    %111 = arith.truncf %110 : vector<8x8xf32> to vector<8x8xbf16>
    %112 = tpu.transpose %109, [1, 0] : vector<8x8xbf16> -> vector<8x8xbf16>
    %cst_28 = arith.constant dense<0.000000e+00> : vector<8x8xf32>
    %113 = tpu.matmul %107, %112, %cst_28 {dimension_numbers = #tpu.dot_dimension_numbers<[1], [0], [0], [1], [0, 0, 1, 1], [], []>} : vector<8x8xbf16>, vector<8x8xbf16>, vector<8x8xf32> -> vector<8x8xf32>
    %114 = arith.addf %113, %10 : vector<8x8xf32>
    %cst_29 = arith.constant dense<0xFF800000> : vector<8xf32>
    %115 = vector.multi_reduction <maximumf>, %114, %cst_29 [1] : vector<8x8xf32> to vector<8xf32>
    %116 = vector.shape_cast %115 : vector<8xf32> to vector<8x1xf32>
    %117 = vector.broadcast %116 : vector<8x1xf32> to vector<8x8xf32>
    %118 = arith.subf %114, %117 : vector<8x8xf32>
    %119 = math.exp %118 : vector<8x8xf32>
    %cst_30 = arith.constant dense<0.000000e+00> : vector<8xf32>
    %120 = vector.multi_reduction <add>, %119, %cst_30 [1] : vector<8x8xf32> to vector<8xf32>
    %121 = vector.shape_cast %120 : vector<8xf32> to vector<8x1xf32>
    %122 = tpu.reciprocal %121 {approx = true} : vector<8x1xf32> -> vector<8x1xf32>
    %123 = vector.broadcast %122 : vector<8x1xf32> to vector<8x8xf32>
    %124 = arith.mulf %119, %123 : vector<8x8xf32>
    %125 = arith.truncf %124 : vector<8x8xf32> to vector<8x8xbf16>
    %cst_31 = arith.constant dense<0.000000e+00> : vector<8x8xf32>
    %126 = tpu.matmul %125, %111, %cst_31 {dimension_numbers = #tpu.dot_dimension_numbers<[1], [0], [0], [1], [0, 0, 1, 1], [], []>} : vector<8x8xbf16>, vector<8x8xbf16>, vector<8x8xf32> -> vector<8x8xf32>
    %127 = vector.extract_strided_slice %18 {offsets = [8, 8], sizes = [8, 8], strides = [1, 1]} : vector<16x32xf32> to vector<8x8xf32>
    %128 = arith.truncf %127 : vector<8x8xf32> to vector<8x8xbf16>
    %129 = vector.extract_strided_slice %19 {offsets = [8, 8], sizes = [8, 8], strides = [1, 1]} : vector<16x32xf32> to vector<8x8xf32>
    %130 = arith.truncf %129 : vector<8x8xf32> to vector<8x8xbf16>
    %131 = vector.extract_strided_slice %20 {offsets = [8, 8], sizes = [8, 8], strides = [1, 1]} : vector<16x32xf32> to vector<8x8xf32>
    %132 = arith.truncf %131 : vector<8x8xf32> to vector<8x8xbf16>
    %133 = tpu.transpose %130, [1, 0] : vector<8x8xbf16> -> vector<8x8xbf16>
    %cst_32 = arith.constant dense<0.000000e+00> : vector<8x8xf32>
    %134 = tpu.matmul %128, %133, %cst_32 {dimension_numbers = #tpu.dot_dimension_numbers<[1], [0], [0], [1], [0, 0, 1, 1], [], []>} : vector<8x8xbf16>, vector<8x8xbf16>, vector<8x8xf32> -> vector<8x8xf32>
    %135 = arith.addf %134, %10 : vector<8x8xf32>
    %cst_33 = arith.constant dense<0xFF800000> : vector<8xf32>
    %136 = vector.multi_reduction <maximumf>, %135, %cst_33 [1] : vector<8x8xf32> to vector<8xf32>
    %137 = vector.shape_cast %136 : vector<8xf32> to vector<8x1xf32>
    %138 = vector.broadcast %137 : vector<8x1xf32> to vector<8x8xf32>
    %139 = arith.subf %135, %138 : vector<8x8xf32>
    %140 = math.exp %139 : vector<8x8xf32>
    %cst_34 = arith.constant dense<0.000000e+00> : vector<8xf32>
    %141 = vector.multi_reduction <add>, %140, %cst_34 [1] : vector<8x8xf32> to vector<8xf32>
    %142 = vector.shape_cast %141 : vector<8xf32> to vector<8x1xf32>
    %143 = tpu.reciprocal %142 {approx = true} : vector<8x1xf32> -> vector<8x1xf32>
    %144 = vector.broadcast %143 : vector<8x1xf32> to vector<8x8xf32>
    %145 = arith.mulf %140, %144 : vector<8x8xf32>
    %146 = arith.truncf %145 : vector<8x8xf32> to vector<8x8xbf16>
    %cst_35 = arith.constant dense<0.000000e+00> : vector<8x8xf32>
    %147 = tpu.matmul %146, %132, %cst_35 {dimension_numbers = #tpu.dot_dimension_numbers<[1], [0], [0], [1], [0, 0, 1, 1], [], []>} : vector<8x8xbf16>, vector<8x8xbf16>, vector<8x8xf32> -> vector<8x8xf32>
    %148 = vector.extract_strided_slice %18 {offsets = [8, 16], sizes = [8, 8], strides = [1, 1]} : vector<16x32xf32> to vector<8x8xf32>
    %149 = arith.truncf %148 : vector<8x8xf32> to vector<8x8xbf16>
    %150 = vector.extract_strided_slice %19 {offsets = [8, 16], sizes = [8, 8], strides = [1, 1]} : vector<16x32xf32> to vector<8x8xf32>
    %151 = arith.truncf %150 : vector<8x8xf32> to vector<8x8xbf16>
    %152 = vector.extract_strided_slice %20 {offsets = [8, 16], sizes = [8, 8], strides = [1, 1]} : vector<16x32xf32> to vector<8x8xf32>
    %153 = arith.truncf %152 : vector<8x8xf32> to vector<8x8xbf16>
    %154 = tpu.transpose %151, [1, 0] : vector<8x8xbf16> -> vector<8x8xbf16>
    %cst_36 = arith.constant dense<0.000000e+00> : vector<8x8xf32>
    %155 = tpu.matmul %149, %154, %cst_36 {dimension_numbers = #tpu.dot_dimension_numbers<[1], [0], [0], [1], [0, 0, 1, 1], [], []>} : vector<8x8xbf16>, vector<8x8xbf16>, vector<8x8xf32> -> vector<8x8xf32>
    %156 = arith.addf %155, %10 : vector<8x8xf32>
    %cst_37 = arith.constant dense<0xFF800000> : vector<8xf32>
    %157 = vector.multi_reduction <maximumf>, %156, %cst_37 [1] : vector<8x8xf32> to vector<8xf32>
    %158 = vector.shape_cast %157 : vector<8xf32> to vector<8x1xf32>
    %159 = vector.broadcast %158 : vector<8x1xf32> to vector<8x8xf32>
    %160 = arith.subf %156, %159 : vector<8x8xf32>
    %161 = math.exp %160 : vector<8x8xf32>
    %cst_38 = arith.constant dense<0.000000e+00> : vector<8xf32>
    %162 = vector.multi_reduction <add>, %161, %cst_38 [1] : vector<8x8xf32> to vector<8xf32>
    %163 = vector.shape_cast %162 : vector<8xf32> to vector<8x1xf32>
    %164 = tpu.reciprocal %163 {approx = true} : vector<8x1xf32> -> vector<8x1xf32>
    %165 = vector.broadcast %164 : vector<8x1xf32> to vector<8x8xf32>
    %166 = arith.mulf %161, %165 : vector<8x8xf32>
    %167 = arith.truncf %166 : vector<8x8xf32> to vector<8x8xbf16>
    %cst_39 = arith.constant dense<0.000000e+00> : vector<8x8xf32>
    %168 = tpu.matmul %167, %153, %cst_39 {dimension_numbers = #tpu.dot_dimension_numbers<[1], [0], [0], [1], [0, 0, 1, 1], [], []>} : vector<8x8xbf16>, vector<8x8xbf16>, vector<8x8xf32> -> vector<8x8xf32>
    %169 = vector.extract_strided_slice %18 {offsets = [8, 24], sizes = [8, 8], strides = [1, 1]} : vector<16x32xf32> to vector<8x8xf32>
    %170 = arith.truncf %169 : vector<8x8xf32> to vector<8x8xbf16>
    %171 = vector.extract_strided_slice %19 {offsets = [8, 24], sizes = [8, 8], strides = [1, 1]} : vector<16x32xf32> to vector<8x8xf32>
    %172 = arith.truncf %171 : vector<8x8xf32> to vector<8x8xbf16>
    %173 = vector.extract_strided_slice %20 {offsets = [8, 24], sizes = [8, 8], strides = [1, 1]} : vector<16x32xf32> to vector<8x8xf32>
    %174 = arith.truncf %173 : vector<8x8xf32> to vector<8x8xbf16>
    %175 = tpu.transpose %172, [1, 0] : vector<8x8xbf16> -> vector<8x8xbf16>
    %cst_40 = arith.constant dense<0.000000e+00> : vector<8x8xf32>
    %176 = tpu.matmul %170, %175, %cst_40 {dimension_numbers = #tpu.dot_dimension_numbers<[1], [0], [0], [1], [0, 0, 1, 1], [], []>} : vector<8x8xbf16>, vector<8x8xbf16>, vector<8x8xf32> -> vector<8x8xf32>
    %177 = arith.addf %176, %10 : vector<8x8xf32>
    %cst_41 = arith.constant dense<0xFF800000> : vector<8xf32>
    %178 = vector.multi_reduction <maximumf>, %177, %cst_41 [1] : vector<8x8xf32> to vector<8xf32>
    %179 = vector.shape_cast %178 : vector<8xf32> to vector<8x1xf32>
    %180 = vector.broadcast %179 : vector<8x1xf32> to vector<8x8xf32>
    %181 = arith.subf %177, %180 : vector<8x8xf32>
    %182 = math.exp %181 : vector<8x8xf32>
    %cst_42 = arith.constant dense<0.000000e+00> : vector<8xf32>
    %183 = vector.multi_reduction <add>, %182, %cst_42 [1] : vector<8x8xf32> to vector<8xf32>
    %184 = vector.shape_cast %183 : vector<8xf32> to vector<8x1xf32>
    %185 = tpu.reciprocal %184 {approx = true} : vector<8x1xf32> -> vector<8x1xf32>
    %186 = vector.broadcast %185 : vector<8x1xf32> to vector<8x8xf32>
    %187 = arith.mulf %182, %186 : vector<8x8xf32>
    %188 = arith.truncf %187 : vector<8x8xf32> to vector<8x8xbf16>
    %cst_43 = arith.constant dense<0.000000e+00> : vector<8x8xf32>
    %189 = tpu.matmul %188, %174, %cst_43 {dimension_numbers = #tpu.dot_dimension_numbers<[1], [0], [0], [1], [0, 0, 1, 1], [], []>} : vector<8x8xbf16>, vector<8x8xbf16>, vector<8x8xf32> -> vector<8x8xf32>
    %190 = tpu.concatenate %126, %147, %168, %189 in 1 : vector<8x8xf32>, vector<8x8xf32>, vector<8x8xf32>, vector<8x8xf32> -> vector<8x32xf32>
    %191 = tpu.concatenate %105, %190 in 0 : vector<8x32xf32>, vector<8x32xf32> -> vector<16x32xf32>
    %192 = arith.truncf %191 : vector<16x32xf32> to vector<16x32xbf16>
    %c0_44 = arith.constant 0 : index
    %c0_45 = arith.constant 0 : index
    %c0_46 = arith.constant 0 : index
    %193 = vector.load %arg4[%c0_44, %c0_45, %c0_46] : memref<4x32x32xbf16, #tpu.memory_space<vmem>>, vector<1x32x32xbf16>
    %194 = vector.shape_cast %193 : vector<1x32x32xbf16> to vector<32x32xbf16>
    %cst_47 = arith.constant dense<0.000000e+00> : vector<16x32xf32>
    %195 = tpu.matmul %192, %194, %cst_47 {dimension_numbers = #tpu.dot_dimension_numbers<[1], [0], [0], [1], [0, 0, 1, 1], [], []>} : vector<16x32xbf16>, vector<32x32xbf16>, vector<16x32xf32> -> vector<16x32xf32>
    %c3 = arith.constant 3 : index
    %c0_48 = arith.constant 0 : index
    %196 = vector.load %arg8[%c3, %c0_48] : memref<27x128xf32, #tpu.memory_space<vmem>>, vector<1x32xf32>
    %197 = vector.broadcast %196 : vector<1x32xf32> to vector<16x32xf32>
    %198 = arith.addf %195, %197 : vector<16x32xf32>
    %199 = arith.addf %1, %198 : vector<16x32xf32>
    %c6 = arith.constant 6 : index
    %c0_49 = arith.constant 0 : index
    %200 = vector.load %arg8[%c6, %c0_49] : memref<27x128xf32, #tpu.memory_space<vmem>>, vector<1x32xf32>
    %c7 = arith.constant 7 : index
    %c0_50 = arith.constant 0 : index
    %201 = vector.load %arg8[%c7, %c0_50] : memref<27x128xf32, #tpu.memory_space<vmem>>, vector<1x32xf32>
    %cst_51 = arith.constant dense<0.000000e+00> : vector<16xf32>
    %202 = vector.multi_reduction <add>, %199, %cst_51 [1] : vector<16x32xf32> to vector<16xf32>
    %203 = vector.shape_cast %202 : vector<16xf32> to vector<16x1xf32>
    %cst_52 = arith.constant 3.200000e+01 : f32
    %204 = vector.broadcast %cst_52 : f32 to vector<16x1xf32>
    %205 = arith.divf %203, %204 : vector<16x1xf32>
    %206 = vector.broadcast %205 : vector<16x1xf32> to vector<16x32xf32>
    %207 = arith.subf %199, %206 : vector<16x32xf32>
    %208 = arith.mulf %207, %207 : vector<16x32xf32>
    %cst_53 = arith.constant dense<0.000000e+00> : vector<16xf32>
    %209 = vector.multi_reduction <add>, %208, %cst_53 [1] : vector<16x32xf32> to vector<16xf32>
    %210 = vector.shape_cast %209 : vector<16xf32> to vector<16x1xf32>
    %cst_54 = arith.constant 3.200000e+01 : f32
    %211 = vector.broadcast %cst_54 : f32 to vector<16x1xf32>
    %212 = arith.divf %210, %211 : vector<16x1xf32>
    %cst_55 = arith.constant 9.99999974E-6 : f32
    %213 = vector.broadcast %cst_55 : f32 to vector<16x1xf32>
    %214 = arith.addf %212, %213 : vector<16x1xf32>
    %215 = math.rsqrt %214 : vector<16x1xf32>
    %216 = vector.broadcast %215 : vector<16x1xf32> to vector<16x32xf32>
    %217 = arith.mulf %207, %216 : vector<16x32xf32>
    %218 = vector.broadcast %200 : vector<1x32xf32> to vector<16x32xf32>
    %219 = arith.mulf %217, %218 : vector<16x32xf32>
    %220 = vector.broadcast %201 : vector<1x32xf32> to vector<16x32xf32>
    %221 = arith.addf %219, %220 : vector<16x32xf32>
    %c1 = arith.constant 1 : index
    %c0_56 = arith.constant 0 : index
    %c0_57 = arith.constant 0 : index
    %222 = vector.load %arg3[%c1, %c0_56, %c0_57] : memref<4x32x96xbf16, #tpu.memory_space<vmem>>, vector<1x32x96xbf16>
    %223 = vector.shape_cast %222 : vector<1x32x96xbf16> to vector<32x96xbf16>
    %224 = arith.truncf %221 : vector<16x32xf32> to vector<16x32xbf16>
    %225 = vector.extract_strided_slice %223 {offsets = [0, 0], sizes = [32, 32], strides = [1, 1]} : vector<32x96xbf16> to vector<32x32xbf16>
    %cst_58 = arith.constant dense<0.000000e+00> : vector<16x32xf32>
    %226 = tpu.matmul %224, %225, %cst_58 {dimension_numbers = #tpu.dot_dimension_numbers<[1], [0], [0], [1], [0, 0, 1, 1], [], []>} : vector<16x32xbf16>, vector<32x32xbf16>, vector<16x32xf32> -> vector<16x32xf32>
    %c1_59 = arith.constant 1 : index
    %c0_60 = arith.constant 0 : index
    %227 = vector.load %arg8[%c1_59, %c0_60] : memref<27x128xf32, #tpu.memory_space<vmem>>, vector<1x32xf32>
    %228 = vector.broadcast %227 : vector<1x32xf32> to vector<16x32xf32>
    %229 = arith.addf %226, %228 : vector<16x32xf32>
    %230 = vector.extract_strided_slice %223 {offsets = [0, 32], sizes = [32, 64], strides = [1, 1]} : vector<32x96xbf16> to vector<32x64xbf16>
    %cst_61 = arith.constant dense<0.000000e+00> : vector<32x64xf32>
    %231 = tpu.matmul %4, %230, %cst_61 {dimension_numbers = #tpu.dot_dimension_numbers<[1], [0], [0], [1], [0, 0, 1, 1], [], []>} : vector<32x32xbf16>, vector<32x64xbf16>, vector<32x64xf32> -> vector<32x64xf32>
    %c1_62 = arith.constant 1 : index
    %c32 = arith.constant 32 : index
    %232 = vector.load %arg8[%c1_62, %c32] : memref<27x128xf32, #tpu.memory_space<vmem>>, vector<1x64xf32>
    %233 = vector.broadcast %232 : vector<1x64xf32> to vector<32x64xf32>
    %234 = arith.addf %231, %233 : vector<32x64xf32>
    %235 = vector.extract_strided_slice %234 {offsets = [0, 0], sizes = [32, 32], strides = [1, 1]} : vector<32x64xf32> to vector<32x32xf32>
    %236 = vector.extract_strided_slice %234 {offsets = [0, 32], sizes = [32, 32], strides = [1, 1]} : vector<32x64xf32> to vector<32x32xf32>
    %237 = vector.extract_strided_slice %229 {offsets = [0, 0], sizes = [8, 8], strides = [1, 1]} : vector<16x32xf32> to vector<8x8xf32>
    %238 = arith.truncf %237 : vector<8x8xf32> to vector<8x8xbf16>
    %239 = vector.extract_strided_slice %235 {offsets = [0, 0], sizes = [16, 8], strides = [1, 1]} : vector<32x32xf32> to vector<16x8xf32>
    %240 = arith.truncf %239 : vector<16x8xf32> to vector<16x8xbf16>
    %241 = vector.extract_strided_slice %236 {offsets = [0, 0], sizes = [16, 8], strides = [1, 1]} : vector<32x32xf32> to vector<16x8xf32>
    %242 = arith.truncf %241 : vector<16x8xf32> to vector<16x8xbf16>
    %243 = tpu.transpose %240, [1, 0] : vector<16x8xbf16> -> vector<8x16xbf16>
    %cst_63 = arith.constant dense<0.000000e+00> : vector<8x16xf32>
    %244 = tpu.matmul %238, %243, %cst_63 {dimension_numbers = #tpu.dot_dimension_numbers<[1], [0], [0], [1], [0, 0, 1, 1], [], []>} : vector<8x8xbf16>, vector<8x16xbf16>, vector<8x16xf32> -> vector<8x16xf32>
    %cst_64 = arith.constant dense<0xFF800000> : vector<8xf32>
    %245 = vector.multi_reduction <maximumf>, %244, %cst_64 [1] : vector<8x16xf32> to vector<8xf32>
    %246 = vector.shape_cast %245 : vector<8xf32> to vector<8x1xf32>
    %247 = vector.broadcast %246 : vector<8x1xf32> to vector<8x16xf32>
    %248 = arith.subf %244, %247 : vector<8x16xf32>
    %249 = math.exp %248 : vector<8x16xf32>
    %cst_65 = arith.constant dense<0.000000e+00> : vector<8xf32>
    %250 = vector.multi_reduction <add>, %249, %cst_65 [1] : vector<8x16xf32> to vector<8xf32>
    %251 = vector.shape_cast %250 : vector<8xf32> to vector<8x1xf32>
    %252 = tpu.reciprocal %251 {approx = true} : vector<8x1xf32> -> vector<8x1xf32>
    %253 = vector.broadcast %252 : vector<8x1xf32> to vector<8x16xf32>
    %254 = arith.mulf %249, %253 : vector<8x16xf32>
    %255 = arith.truncf %254 : vector<8x16xf32> to vector<8x16xbf16>
    %cst_66 = arith.constant dense<0.000000e+00> : vector<8x8xf32>
    %256 = tpu.matmul %255, %242, %cst_66 {dimension_numbers = #tpu.dot_dimension_numbers<[1], [0], [0], [1], [0, 0, 1, 1], [], []>} : vector<8x16xbf16>, vector<16x8xbf16>, vector<8x8xf32> -> vector<8x8xf32>
    %257 = vector.extract_strided_slice %229 {offsets = [0, 8], sizes = [8, 8], strides = [1, 1]} : vector<16x32xf32> to vector<8x8xf32>
    %258 = arith.truncf %257 : vector<8x8xf32> to vector<8x8xbf16>
    %259 = vector.extract_strided_slice %235 {offsets = [0, 8], sizes = [16, 8], strides = [1, 1]} : vector<32x32xf32> to vector<16x8xf32>
    %260 = arith.truncf %259 : vector<16x8xf32> to vector<16x8xbf16>
    %261 = vector.extract_strided_slice %236 {offsets = [0, 8], sizes = [16, 8], strides = [1, 1]} : vector<32x32xf32> to vector<16x8xf32>
    %262 = arith.truncf %261 : vector<16x8xf32> to vector<16x8xbf16>
    %263 = tpu.transpose %260, [1, 0] : vector<16x8xbf16> -> vector<8x16xbf16>
    %cst_67 = arith.constant dense<0.000000e+00> : vector<8x16xf32>
    %264 = tpu.matmul %258, %263, %cst_67 {dimension_numbers = #tpu.dot_dimension_numbers<[1], [0], [0], [1], [0, 0, 1, 1], [], []>} : vector<8x8xbf16>, vector<8x16xbf16>, vector<8x16xf32> -> vector<8x16xf32>
    %cst_68 = arith.constant dense<0xFF800000> : vector<8xf32>
    %265 = vector.multi_reduction <maximumf>, %264, %cst_68 [1] : vector<8x16xf32> to vector<8xf32>
    %266 = vector.shape_cast %265 : vector<8xf32> to vector<8x1xf32>
    %267 = vector.broadcast %266 : vector<8x1xf32> to vector<8x16xf32>
    %268 = arith.subf %264, %267 : vector<8x16xf32>
    %269 = math.exp %268 : vector<8x16xf32>
    %cst_69 = arith.constant dense<0.000000e+00> : vector<8xf32>
    %270 = vector.multi_reduction <add>, %269, %cst_69 [1] : vector<8x16xf32> to vector<8xf32>
    %271 = vector.shape_cast %270 : vector<8xf32> to vector<8x1xf32>
    %272 = tpu.reciprocal %271 {approx = true} : vector<8x1xf32> -> vector<8x1xf32>
    %273 = vector.broadcast %272 : vector<8x1xf32> to vector<8x16xf32>
    %274 = arith.mulf %269, %273 : vector<8x16xf32>
    %275 = arith.truncf %274 : vector<8x16xf32> to vector<8x16xbf16>
    %cst_70 = arith.constant dense<0.000000e+00> : vector<8x8xf32>
    %276 = tpu.matmul %275, %262, %cst_70 {dimension_numbers = #tpu.dot_dimension_numbers<[1], [0], [0], [1], [0, 0, 1, 1], [], []>} : vector<8x16xbf16>, vector<16x8xbf16>, vector<8x8xf32> -> vector<8x8xf32>
    %277 = vector.extract_strided_slice %229 {offsets = [0, 16], sizes = [8, 8], strides = [1, 1]} : vector<16x32xf32> to vector<8x8xf32>
    %278 = arith.truncf %277 : vector<8x8xf32> to vector<8x8xbf16>
    %279 = vector.extract_strided_slice %235 {offsets = [0, 16], sizes = [16, 8], strides = [1, 1]} : vector<32x32xf32> to vector<16x8xf32>
    %280 = arith.truncf %279 : vector<16x8xf32> to vector<16x8xbf16>
    %281 = vector.extract_strided_slice %236 {offsets = [0, 16], sizes = [16, 8], strides = [1, 1]} : vector<32x32xf32> to vector<16x8xf32>
    %282 = arith.truncf %281 : vector<16x8xf32> to vector<16x8xbf16>
    %283 = tpu.transpose %280, [1, 0] : vector<16x8xbf16> -> vector<8x16xbf16>
    %cst_71 = arith.constant dense<0.000000e+00> : vector<8x16xf32>
    %284 = tpu.matmul %278, %283, %cst_71 {dimension_numbers = #tpu.dot_dimension_numbers<[1], [0], [0], [1], [0, 0, 1, 1], [], []>} : vector<8x8xbf16>, vector<8x16xbf16>, vector<8x16xf32> -> vector<8x16xf32>
    %cst_72 = arith.constant dense<0xFF800000> : vector<8xf32>
    %285 = vector.multi_reduction <maximumf>, %284, %cst_72 [1] : vector<8x16xf32> to vector<8xf32>
    %286 = vector.shape_cast %285 : vector<8xf32> to vector<8x1xf32>
    %287 = vector.broadcast %286 : vector<8x1xf32> to vector<8x16xf32>
    %288 = arith.subf %284, %287 : vector<8x16xf32>
    %289 = math.exp %288 : vector<8x16xf32>
    %cst_73 = arith.constant dense<0.000000e+00> : vector<8xf32>
    %290 = vector.multi_reduction <add>, %289, %cst_73 [1] : vector<8x16xf32> to vector<8xf32>
    %291 = vector.shape_cast %290 : vector<8xf32> to vector<8x1xf32>
    %292 = tpu.reciprocal %291 {approx = true} : vector<8x1xf32> -> vector<8x1xf32>
    %293 = vector.broadcast %292 : vector<8x1xf32> to vector<8x16xf32>
    %294 = arith.mulf %289, %293 : vector<8x16xf32>
    %295 = arith.truncf %294 : vector<8x16xf32> to vector<8x16xbf16>
    %cst_74 = arith.constant dense<0.000000e+00> : vector<8x8xf32>
    %296 = tpu.matmul %295, %282, %cst_74 {dimension_numbers = #tpu.dot_dimension_numbers<[1], [0], [0], [1], [0, 0, 1, 1], [], []>} : vector<8x16xbf16>, vector<16x8xbf16>, vector<8x8xf32> -> vector<8x8xf32>
    %297 = vector.extract_strided_slice %229 {offsets = [0, 24], sizes = [8, 8], strides = [1, 1]} : vector<16x32xf32> to vector<8x8xf32>
    %298 = arith.truncf %297 : vector<8x8xf32> to vector<8x8xbf16>
    %299 = vector.extract_strided_slice %235 {offsets = [0, 24], sizes = [16, 8], strides = [1, 1]} : vector<32x32xf32> to vector<16x8xf32>
    %300 = arith.truncf %299 : vector<16x8xf32> to vector<16x8xbf16>
    %301 = vector.extract_strided_slice %236 {offsets = [0, 24], sizes = [16, 8], strides = [1, 1]} : vector<32x32xf32> to vector<16x8xf32>
    %302 = arith.truncf %301 : vector<16x8xf32> to vector<16x8xbf16>
    %303 = tpu.transpose %300, [1, 0] : vector<16x8xbf16> -> vector<8x16xbf16>
    %cst_75 = arith.constant dense<0.000000e+00> : vector<8x16xf32>
    %304 = tpu.matmul %298, %303, %cst_75 {dimension_numbers = #tpu.dot_dimension_numbers<[1], [0], [0], [1], [0, 0, 1, 1], [], []>} : vector<8x8xbf16>, vector<8x16xbf16>, vector<8x16xf32> -> vector<8x16xf32>
    %cst_76 = arith.constant dense<0xFF800000> : vector<8xf32>
    %305 = vector.multi_reduction <maximumf>, %304, %cst_76 [1] : vector<8x16xf32> to vector<8xf32>
    %306 = vector.shape_cast %305 : vector<8xf32> to vector<8x1xf32>
    %307 = vector.broadcast %306 : vector<8x1xf32> to vector<8x16xf32>
    %308 = arith.subf %304, %307 : vector<8x16xf32>
    %309 = math.exp %308 : vector<8x16xf32>
    %cst_77 = arith.constant dense<0.000000e+00> : vector<8xf32>
    %310 = vector.multi_reduction <add>, %309, %cst_77 [1] : vector<8x16xf32> to vector<8xf32>
    %311 = vector.shape_cast %310 : vector<8xf32> to vector<8x1xf32>
    %312 = tpu.reciprocal %311 {approx = true} : vector<8x1xf32> -> vector<8x1xf32>
    %313 = vector.broadcast %312 : vector<8x1xf32> to vector<8x16xf32>
    %314 = arith.mulf %309, %313 : vector<8x16xf32>
    %315 = arith.truncf %314 : vector<8x16xf32> to vector<8x16xbf16>
    %cst_78 = arith.constant dense<0.000000e+00> : vector<8x8xf32>
    %316 = tpu.matmul %315, %302, %cst_78 {dimension_numbers = #tpu.dot_dimension_numbers<[1], [0], [0], [1], [0, 0, 1, 1], [], []>} : vector<8x16xbf16>, vector<16x8xbf16>, vector<8x8xf32> -> vector<8x8xf32>
    %317 = tpu.concatenate %256, %276, %296, %316 in 1 : vector<8x8xf32>, vector<8x8xf32>, vector<8x8xf32>, vector<8x8xf32> -> vector<8x32xf32>
    %318 = vector.extract_strided_slice %229 {offsets = [8, 0], sizes = [8, 8], strides = [1, 1]} : vector<16x32xf32> to vector<8x8xf32>
    %319 = arith.truncf %318 : vector<8x8xf32> to vector<8x8xbf16>
    %320 = vector.extract_strided_slice %235 {offsets = [16, 0], sizes = [16, 8], strides = [1, 1]} : vector<32x32xf32> to vector<16x8xf32>
    %321 = arith.truncf %320 : vector<16x8xf32> to vector<16x8xbf16>
    %322 = vector.extract_strided_slice %236 {offsets = [16, 0], sizes = [16, 8], strides = [1, 1]} : vector<32x32xf32> to vector<16x8xf32>
    %323 = arith.truncf %322 : vector<16x8xf32> to vector<16x8xbf16>
    %324 = tpu.transpose %321, [1, 0] : vector<16x8xbf16> -> vector<8x16xbf16>
    %cst_79 = arith.constant dense<0.000000e+00> : vector<8x16xf32>
    %325 = tpu.matmul %319, %324, %cst_79 {dimension_numbers = #tpu.dot_dimension_numbers<[1], [0], [0], [1], [0, 0, 1, 1], [], []>} : vector<8x8xbf16>, vector<8x16xbf16>, vector<8x16xf32> -> vector<8x16xf32>
    %cst_80 = arith.constant dense<0xFF800000> : vector<8xf32>
    %326 = vector.multi_reduction <maximumf>, %325, %cst_80 [1] : vector<8x16xf32> to vector<8xf32>
    %327 = vector.shape_cast %326 : vector<8xf32> to vector<8x1xf32>
    %328 = vector.broadcast %327 : vector<8x1xf32> to vector<8x16xf32>
    %329 = arith.subf %325, %328 : vector<8x16xf32>
    %330 = math.exp %329 : vector<8x16xf32>
    %cst_81 = arith.constant dense<0.000000e+00> : vector<8xf32>
    %331 = vector.multi_reduction <add>, %330, %cst_81 [1] : vector<8x16xf32> to vector<8xf32>
    %332 = vector.shape_cast %331 : vector<8xf32> to vector<8x1xf32>
    %333 = tpu.reciprocal %332 {approx = true} : vector<8x1xf32> -> vector<8x1xf32>
    %334 = vector.broadcast %333 : vector<8x1xf32> to vector<8x16xf32>
    %335 = arith.mulf %330, %334 : vector<8x16xf32>
    %336 = arith.truncf %335 : vector<8x16xf32> to vector<8x16xbf16>
    %cst_82 = arith.constant dense<0.000000e+00> : vector<8x8xf32>
    %337 = tpu.matmul %336, %323, %cst_82 {dimension_numbers = #tpu.dot_dimension_numbers<[1], [0], [0], [1], [0, 0, 1, 1], [], []>} : vector<8x16xbf16>, vector<16x8xbf16>, vector<8x8xf32> -> vector<8x8xf32>
    %338 = vector.extract_strided_slice %229 {offsets = [8, 8], sizes = [8, 8], strides = [1, 1]} : vector<16x32xf32> to vector<8x8xf32>
    %339 = arith.truncf %338 : vector<8x8xf32> to vector<8x8xbf16>
    %340 = vector.extract_strided_slice %235 {offsets = [16, 8], sizes = [16, 8], strides = [1, 1]} : vector<32x32xf32> to vector<16x8xf32>
    %341 = arith.truncf %340 : vector<16x8xf32> to vector<16x8xbf16>
    %342 = vector.extract_strided_slice %236 {offsets = [16, 8], sizes = [16, 8], strides = [1, 1]} : vector<32x32xf32> to vector<16x8xf32>
    %343 = arith.truncf %342 : vector<16x8xf32> to vector<16x8xbf16>
    %344 = tpu.transpose %341, [1, 0] : vector<16x8xbf16> -> vector<8x16xbf16>
    %cst_83 = arith.constant dense<0.000000e+00> : vector<8x16xf32>
    %345 = tpu.matmul %339, %344, %cst_83 {dimension_numbers = #tpu.dot_dimension_numbers<[1], [0], [0], [1], [0, 0, 1, 1], [], []>} : vector<8x8xbf16>, vector<8x16xbf16>, vector<8x16xf32> -> vector<8x16xf32>
    %cst_84 = arith.constant dense<0xFF800000> : vector<8xf32>
    %346 = vector.multi_reduction <maximumf>, %345, %cst_84 [1] : vector<8x16xf32> to vector<8xf32>
    %347 = vector.shape_cast %346 : vector<8xf32> to vector<8x1xf32>
    %348 = vector.broadcast %347 : vector<8x1xf32> to vector<8x16xf32>
    %349 = arith.subf %345, %348 : vector<8x16xf32>
    %350 = math.exp %349 : vector<8x16xf32>
    %cst_85 = arith.constant dense<0.000000e+00> : vector<8xf32>
    %351 = vector.multi_reduction <add>, %350, %cst_85 [1] : vector<8x16xf32> to vector<8xf32>
    %352 = vector.shape_cast %351 : vector<8xf32> to vector<8x1xf32>
    %353 = tpu.reciprocal %352 {approx = true} : vector<8x1xf32> -> vector<8x1xf32>
    %354 = vector.broadcast %353 : vector<8x1xf32> to vector<8x16xf32>
    %355 = arith.mulf %350, %354 : vector<8x16xf32>
    %356 = arith.truncf %355 : vector<8x16xf32> to vector<8x16xbf16>
    %cst_86 = arith.constant dense<0.000000e+00> : vector<8x8xf32>
    %357 = tpu.matmul %356, %343, %cst_86 {dimension_numbers = #tpu.dot_dimension_numbers<[1], [0], [0], [1], [0, 0, 1, 1], [], []>} : vector<8x16xbf16>, vector<16x8xbf16>, vector<8x8xf32> -> vector<8x8xf32>
    %358 = vector.extract_strided_slice %229 {offsets = [8, 16], sizes = [8, 8], strides = [1, 1]} : vector<16x32xf32> to vector<8x8xf32>
    %359 = arith.truncf %358 : vector<8x8xf32> to vector<8x8xbf16>
    %360 = vector.extract_strided_slice %235 {offsets = [16, 16], sizes = [16, 8], strides = [1, 1]} : vector<32x32xf32> to vector<16x8xf32>
    %361 = arith.truncf %360 : vector<16x8xf32> to vector<16x8xbf16>
    %362 = vector.extract_strided_slice %236 {offsets = [16, 16], sizes = [16, 8], strides = [1, 1]} : vector<32x32xf32> to vector<16x8xf32>
    %363 = arith.truncf %362 : vector<16x8xf32> to vector<16x8xbf16>
    %364 = tpu.transpose %361, [1, 0] : vector<16x8xbf16> -> vector<8x16xbf16>
    %cst_87 = arith.constant dense<0.000000e+00> : vector<8x16xf32>
    %365 = tpu.matmul %359, %364, %cst_87 {dimension_numbers = #tpu.dot_dimension_numbers<[1], [0], [0], [1], [0, 0, 1, 1], [], []>} : vector<8x8xbf16>, vector<8x16xbf16>, vector<8x16xf32> -> vector<8x16xf32>
    %cst_88 = arith.constant dense<0xFF800000> : vector<8xf32>
    %366 = vector.multi_reduction <maximumf>, %365, %cst_88 [1] : vector<8x16xf32> to vector<8xf32>
    %367 = vector.shape_cast %366 : vector<8xf32> to vector<8x1xf32>
    %368 = vector.broadcast %367 : vector<8x1xf32> to vector<8x16xf32>
    %369 = arith.subf %365, %368 : vector<8x16xf32>
    %370 = math.exp %369 : vector<8x16xf32>
    %cst_89 = arith.constant dense<0.000000e+00> : vector<8xf32>
    %371 = vector.multi_reduction <add>, %370, %cst_89 [1] : vector<8x16xf32> to vector<8xf32>
    %372 = vector.shape_cast %371 : vector<8xf32> to vector<8x1xf32>
    %373 = tpu.reciprocal %372 {approx = true} : vector<8x1xf32> -> vector<8x1xf32>
    %374 = vector.broadcast %373 : vector<8x1xf32> to vector<8x16xf32>
    %375 = arith.mulf %370, %374 : vector<8x16xf32>
    %376 = arith.truncf %375 : vector<8x16xf32> to vector<8x16xbf16>
    %cst_90 = arith.constant dense<0.000000e+00> : vector<8x8xf32>
    %377 = tpu.matmul %376, %363, %cst_90 {dimension_numbers = #tpu.dot_dimension_numbers<[1], [0], [0], [1], [0, 0, 1, 1], [], []>} : vector<8x16xbf16>, vector<16x8xbf16>, vector<8x8xf32> -> vector<8x8xf32>
    %378 = vector.extract_strided_slice %229 {offsets = [8, 24], sizes = [8, 8], strides = [1, 1]} : vector<16x32xf32> to vector<8x8xf32>
    %379 = arith.truncf %378 : vector<8x8xf32> to vector<8x8xbf16>
    %380 = vector.extract_strided_slice %235 {offsets = [16, 24], sizes = [16, 8], strides = [1, 1]} : vector<32x32xf32> to vector<16x8xf32>
    %381 = arith.truncf %380 : vector<16x8xf32> to vector<16x8xbf16>
    %382 = vector.extract_strided_slice %236 {offsets = [16, 24], sizes = [16, 8], strides = [1, 1]} : vector<32x32xf32> to vector<16x8xf32>
    %383 = arith.truncf %382 : vector<16x8xf32> to vector<16x8xbf16>
    %384 = tpu.transpose %381, [1, 0] : vector<16x8xbf16> -> vector<8x16xbf16>
    %cst_91 = arith.constant dense<0.000000e+00> : vector<8x16xf32>
    %385 = tpu.matmul %379, %384, %cst_91 {dimension_numbers = #tpu.dot_dimension_numbers<[1], [0], [0], [1], [0, 0, 1, 1], [], []>} : vector<8x8xbf16>, vector<8x16xbf16>, vector<8x16xf32> -> vector<8x16xf32>
    %cst_92 = arith.constant dense<0xFF800000> : vector<8xf32>
    %386 = vector.multi_reduction <maximumf>, %385, %cst_92 [1] : vector<8x16xf32> to vector<8xf32>
    %387 = vector.shape_cast %386 : vector<8xf32> to vector<8x1xf32>
    %388 = vector.broadcast %387 : vector<8x1xf32> to vector<8x16xf32>
    %389 = arith.subf %385, %388 : vector<8x16xf32>
    %390 = math.exp %389 : vector<8x16xf32>
    %cst_93 = arith.constant dense<0.000000e+00> : vector<8xf32>
    %391 = vector.multi_reduction <add>, %390, %cst_93 [1] : vector<8x16xf32> to vector<8xf32>
    %392 = vector.shape_cast %391 : vector<8xf32> to vector<8x1xf32>
    %393 = tpu.reciprocal %392 {approx = true} : vector<8x1xf32> -> vector<8x1xf32>
    %394 = vector.broadcast %393 : vector<8x1xf32> to vector<8x16xf32>
    %395 = arith.mulf %390, %394 : vector<8x16xf32>
    %396 = arith.truncf %395 : vector<8x16xf32> to vector<8x16xbf16>
    %cst_94 = arith.constant dense<0.000000e+00> : vector<8x8xf32>
    %397 = tpu.matmul %396, %383, %cst_94 {dimension_numbers = #tpu.dot_dimension_numbers<[1], [0], [0], [1], [0, 0, 1, 1], [], []>} : vector<8x16xbf16>, vector<16x8xbf16>, vector<8x8xf32> -> vector<8x8xf32>
    %398 = tpu.concatenate %337, %357, %377, %397 in 1 : vector<8x8xf32>, vector<8x8xf32>, vector<8x8xf32>, vector<8x8xf32> -> vector<8x32xf32>
    %399 = tpu.concatenate %317, %398 in 0 : vector<8x32xf32>, vector<8x32xf32> -> vector<16x32xf32>
    %400 = arith.truncf %399 : vector<16x32xf32> to vector<16x32xbf16>
    %c1_95 = arith.constant 1 : index
    %c0_96 = arith.constant 0 : index
    %c0_97 = arith.constant 0 : index
    %401 = vector.load %arg4[%c1_95, %c0_96, %c0_97] : memref<4x32x32xbf16, #tpu.memory_space<vmem>>, vector<1x32x32xbf16>
    %402 = vector.shape_cast %401 : vector<1x32x32xbf16> to vector<32x32xbf16>
    %cst_98 = arith.constant dense<0.000000e+00> : vector<16x32xf32>
    %403 = tpu.matmul %400, %402, %cst_98 {dimension_numbers = #tpu.dot_dimension_numbers<[1], [0], [0], [1], [0, 0, 1, 1], [], []>} : vector<16x32xbf16>, vector<32x32xbf16>, vector<16x32xf32> -> vector<16x32xf32>
    %c4 = arith.constant 4 : index
    %c0_99 = arith.constant 0 : index
    %404 = vector.load %arg8[%c4, %c0_99] : memref<27x128xf32, #tpu.memory_space<vmem>>, vector<1x32xf32>
    %405 = vector.broadcast %404 : vector<1x32xf32> to vector<16x32xf32>
    %406 = arith.addf %403, %405 : vector<16x32xf32>
    %407 = arith.addf %221, %406 : vector<16x32xf32>
    %c8 = arith.constant 8 : index
    %c0_100 = arith.constant 0 : index
    %408 = vector.load %arg8[%c8, %c0_100] : memref<27x128xf32, #tpu.memory_space<vmem>>, vector<1x32xf32>
    %c9 = arith.constant 9 : index
    %c0_101 = arith.constant 0 : index
    %409 = vector.load %arg8[%c9, %c0_101] : memref<27x128xf32, #tpu.memory_space<vmem>>, vector<1x32xf32>
    %cst_102 = arith.constant dense<0.000000e+00> : vector<16xf32>
    %410 = vector.multi_reduction <add>, %407, %cst_102 [1] : vector<16x32xf32> to vector<16xf32>
    %411 = vector.shape_cast %410 : vector<16xf32> to vector<16x1xf32>
    %cst_103 = arith.constant 3.200000e+01 : f32
    %412 = vector.broadcast %cst_103 : f32 to vector<16x1xf32>
    %413 = arith.divf %411, %412 : vector<16x1xf32>
    %414 = vector.broadcast %413 : vector<16x1xf32> to vector<16x32xf32>
    %415 = arith.subf %407, %414 : vector<16x32xf32>
    %416 = arith.mulf %415, %415 : vector<16x32xf32>
    %cst_104 = arith.constant dense<0.000000e+00> : vector<16xf32>
    %417 = vector.multi_reduction <add>, %416, %cst_104 [1] : vector<16x32xf32> to vector<16xf32>
    %418 = vector.shape_cast %417 : vector<16xf32> to vector<16x1xf32>
    %cst_105 = arith.constant 3.200000e+01 : f32
    %419 = vector.broadcast %cst_105 : f32 to vector<16x1xf32>
    %420 = arith.divf %418, %419 : vector<16x1xf32>
    %cst_106 = arith.constant 9.99999974E-6 : f32
    %421 = vector.broadcast %cst_106 : f32 to vector<16x1xf32>
    %422 = arith.addf %420, %421 : vector<16x1xf32>
    %423 = math.rsqrt %422 : vector<16x1xf32>
    %424 = vector.broadcast %423 : vector<16x1xf32> to vector<16x32xf32>
    %425 = arith.mulf %415, %424 : vector<16x32xf32>
    %426 = vector.broadcast %408 : vector<1x32xf32> to vector<16x32xf32>
    %427 = arith.mulf %425, %426 : vector<16x32xf32>
    %428 = vector.broadcast %409 : vector<1x32xf32> to vector<16x32xf32>
    %429 = arith.addf %427, %428 : vector<16x32xf32>
    %430 = arith.truncf %429 : vector<16x32xf32> to vector<16x32xbf16>
    %c0_107 = arith.constant 0 : index
    %c0_108 = arith.constant 0 : index
    %c0_109 = arith.constant 0 : index
    %431 = vector.load %arg5[%c0_107, %c0_108, %c0_109] : memref<2x32x64xbf16, #tpu.memory_space<vmem>>, vector<1x32x64xbf16>
    %432 = vector.shape_cast %431 : vector<1x32x64xbf16> to vector<32x64xbf16>
    %cst_110 = arith.constant dense<0.000000e+00> : vector<16x64xf32>
    %433 = tpu.matmul %430, %432, %cst_110 {dimension_numbers = #tpu.dot_dimension_numbers<[1], [0], [0], [1], [0, 0, 1, 1], [], []>} : vector<16x32xbf16>, vector<32x64xbf16>, vector<16x64xf32> -> vector<16x64xf32>
    %c2 = arith.constant 2 : index
    %c0_111 = arith.constant 0 : index
    %434 = vector.load %arg8[%c2, %c0_111] : memref<27x128xf32, #tpu.memory_space<vmem>>, vector<1x64xf32>
    %435 = vector.broadcast %434 : vector<1x64xf32> to vector<16x64xf32>
    %436 = arith.addf %433, %435 : vector<16x64xf32>
    %cst_112 = arith.constant 0.000000e+00 : f32
    %437 = vector.broadcast %cst_112 : f32 to vector<16x64xf32>
    %438 = arith.maximumf %436, %437 : vector<16x64xf32>
    %439 = arith.truncf %438 : vector<16x64xf32> to vector<16x64xbf16>
    %c0_113 = arith.constant 0 : index
    %c0_114 = arith.constant 0 : index
    %c0_115 = arith.constant 0 : index
    %440 = vector.load %arg6[%c0_113, %c0_114, %c0_115] : memref<2x64x32xbf16, #tpu.memory_space<vmem>>, vector<1x64x32xbf16>
    %441 = vector.shape_cast %440 : vector<1x64x32xbf16> to vector<64x32xbf16>
    %cst_116 = arith.constant dense<0.000000e+00> : vector<16x32xf32>
    %442 = tpu.matmul %439, %441, %cst_116 {dimension_numbers = #tpu.dot_dimension_numbers<[1], [0], [0], [1], [0, 0, 1, 1], [], []>} : vector<16x64xbf16>, vector<64x32xbf16>, vector<16x32xf32> -> vector<16x32xf32>
    %c5 = arith.constant 5 : index
    %c0_117 = arith.constant 0 : index
    %443 = vector.load %arg8[%c5, %c0_117] : memref<27x128xf32, #tpu.memory_space<vmem>>, vector<1x32xf32>
    %444 = vector.broadcast %443 : vector<1x32xf32> to vector<16x32xf32>
    %445 = arith.addf %442, %444 : vector<16x32xf32>
    %446 = arith.addf %429, %445 : vector<16x32xf32>
    %c10 = arith.constant 10 : index
    %c0_118 = arith.constant 0 : index
    %447 = vector.load %arg8[%c10, %c0_118] : memref<27x128xf32, #tpu.memory_space<vmem>>, vector<1x32xf32>
    %c11 = arith.constant 11 : index
    %c0_119 = arith.constant 0 : index
    %448 = vector.load %arg8[%c11, %c0_119] : memref<27x128xf32, #tpu.memory_space<vmem>>, vector<1x32xf32>
    %cst_120 = arith.constant dense<0.000000e+00> : vector<16xf32>
    %449 = vector.multi_reduction <add>, %446, %cst_120 [1] : vector<16x32xf32> to vector<16xf32>
    %450 = vector.shape_cast %449 : vector<16xf32> to vector<16x1xf32>
    %cst_121 = arith.constant 3.200000e+01 : f32
    %451 = vector.broadcast %cst_121 : f32 to vector<16x1xf32>
    %452 = arith.divf %450, %451 : vector<16x1xf32>
    %453 = vector.broadcast %452 : vector<16x1xf32> to vector<16x32xf32>
    %454 = arith.subf %446, %453 : vector<16x32xf32>
    %455 = arith.mulf %454, %454 : vector<16x32xf32>
    %cst_122 = arith.constant dense<0.000000e+00> : vector<16xf32>
    %456 = vector.multi_reduction <add>, %455, %cst_122 [1] : vector<16x32xf32> to vector<16xf32>
    %457 = vector.shape_cast %456 : vector<16xf32> to vector<16x1xf32>
    %cst_123 = arith.constant 3.200000e+01 : f32
    %458 = vector.broadcast %cst_123 : f32 to vector<16x1xf32>
    %459 = arith.divf %457, %458 : vector<16x1xf32>
    %cst_124 = arith.constant 9.99999974E-6 : f32
    %460 = vector.broadcast %cst_124 : f32 to vector<16x1xf32>
    %461 = arith.addf %459, %460 : vector<16x1xf32>
    %462 = math.rsqrt %461 : vector<16x1xf32>
    %463 = vector.broadcast %462 : vector<16x1xf32> to vector<16x32xf32>
    %464 = arith.mulf %454, %463 : vector<16x32xf32>
    %465 = vector.broadcast %447 : vector<1x32xf32> to vector<16x32xf32>
    %466 = arith.mulf %464, %465 : vector<16x32xf32>
    %467 = vector.broadcast %448 : vector<1x32xf32> to vector<16x32xf32>
    %468 = arith.addf %466, %467 : vector<16x32xf32>
    %c2_125 = arith.constant 2 : index
    %c0_126 = arith.constant 0 : index
    %c0_127 = arith.constant 0 : index
    %469 = vector.load %arg3[%c2_125, %c0_126, %c0_127] : memref<4x32x96xbf16, #tpu.memory_space<vmem>>, vector<1x32x96xbf16>
    %470 = vector.shape_cast %469 : vector<1x32x96xbf16> to vector<32x96xbf16>
    %471 = arith.truncf %468 : vector<16x32xf32> to vector<16x32xbf16>
    %cst_128 = arith.constant dense<0.000000e+00> : vector<16x96xf32>
    %472 = tpu.matmul %471, %470, %cst_128 {dimension_numbers = #tpu.dot_dimension_numbers<[1], [0], [0], [1], [0, 0, 1, 1], [], []>} : vector<16x32xbf16>, vector<32x96xbf16>, vector<16x96xf32> -> vector<16x96xf32>
    %c12 = arith.constant 12 : index
    %c0_129 = arith.constant 0 : index
    %473 = vector.load %arg8[%c12, %c0_129] : memref<27x128xf32, #tpu.memory_space<vmem>>, vector<1x96xf32>
    %474 = vector.broadcast %473 : vector<1x96xf32> to vector<16x96xf32>
    %475 = arith.addf %472, %474 : vector<16x96xf32>
    %476 = vector.extract_strided_slice %475 {offsets = [0, 0], sizes = [16, 32], strides = [1, 1]} : vector<16x96xf32> to vector<16x32xf32>
    %477 = vector.extract_strided_slice %475 {offsets = [0, 32], sizes = [16, 32], strides = [1, 1]} : vector<16x96xf32> to vector<16x32xf32>
    %478 = vector.extract_strided_slice %475 {offsets = [0, 64], sizes = [16, 32], strides = [1, 1]} : vector<16x96xf32> to vector<16x32xf32>
    %479 = vector.extract_strided_slice %476 {offsets = [0, 0], sizes = [8, 8], strides = [1, 1]} : vector<16x32xf32> to vector<8x8xf32>
    %480 = arith.truncf %479 : vector<8x8xf32> to vector<8x8xbf16>
    %481 = vector.extract_strided_slice %477 {offsets = [0, 0], sizes = [8, 8], strides = [1, 1]} : vector<16x32xf32> to vector<8x8xf32>
    %482 = arith.truncf %481 : vector<8x8xf32> to vector<8x8xbf16>
    %483 = vector.extract_strided_slice %478 {offsets = [0, 0], sizes = [8, 8], strides = [1, 1]} : vector<16x32xf32> to vector<8x8xf32>
    %484 = arith.truncf %483 : vector<8x8xf32> to vector<8x8xbf16>
    %485 = tpu.transpose %482, [1, 0] : vector<8x8xbf16> -> vector<8x8xbf16>
    %cst_130 = arith.constant dense<0.000000e+00> : vector<8x8xf32>
    %486 = tpu.matmul %480, %485, %cst_130 {dimension_numbers = #tpu.dot_dimension_numbers<[1], [0], [0], [1], [0, 0, 1, 1], [], []>} : vector<8x8xbf16>, vector<8x8xbf16>, vector<8x8xf32> -> vector<8x8xf32>
    %487 = arith.addf %486, %10 : vector<8x8xf32>
    %cst_131 = arith.constant dense<0xFF800000> : vector<8xf32>
    %488 = vector.multi_reduction <maximumf>, %487, %cst_131 [1] : vector<8x8xf32> to vector<8xf32>
    %489 = vector.shape_cast %488 : vector<8xf32> to vector<8x1xf32>
    %490 = vector.broadcast %489 : vector<8x1xf32> to vector<8x8xf32>
    %491 = arith.subf %487, %490 : vector<8x8xf32>
    %492 = math.exp %491 : vector<8x8xf32>
    %cst_132 = arith.constant dense<0.000000e+00> : vector<8xf32>
    %493 = vector.multi_reduction <add>, %492, %cst_132 [1] : vector<8x8xf32> to vector<8xf32>
    %494 = vector.shape_cast %493 : vector<8xf32> to vector<8x1xf32>
    %495 = tpu.reciprocal %494 {approx = true} : vector<8x1xf32> -> vector<8x1xf32>
    %496 = vector.broadcast %495 : vector<8x1xf32> to vector<8x8xf32>
    %497 = arith.mulf %492, %496 : vector<8x8xf32>
    %498 = arith.truncf %497 : vector<8x8xf32> to vector<8x8xbf16>
    %cst_133 = arith.constant dense<0.000000e+00> : vector<8x8xf32>
    %499 = tpu.matmul %498, %484, %cst_133 {dimension_numbers = #tpu.dot_dimension_numbers<[1], [0], [0], [1], [0, 0, 1, 1], [], []>} : vector<8x8xbf16>, vector<8x8xbf16>, vector<8x8xf32> -> vector<8x8xf32>
    %500 = vector.extract_strided_slice %476 {offsets = [0, 8], sizes = [8, 8], strides = [1, 1]} : vector<16x32xf32> to vector<8x8xf32>
    %501 = arith.truncf %500 : vector<8x8xf32> to vector<8x8xbf16>
    %502 = vector.extract_strided_slice %477 {offsets = [0, 8], sizes = [8, 8], strides = [1, 1]} : vector<16x32xf32> to vector<8x8xf32>
    %503 = arith.truncf %502 : vector<8x8xf32> to vector<8x8xbf16>
    %504 = vector.extract_strided_slice %478 {offsets = [0, 8], sizes = [8, 8], strides = [1, 1]} : vector<16x32xf32> to vector<8x8xf32>
    %505 = arith.truncf %504 : vector<8x8xf32> to vector<8x8xbf16>
    %506 = tpu.transpose %503, [1, 0] : vector<8x8xbf16> -> vector<8x8xbf16>
    %cst_134 = arith.constant dense<0.000000e+00> : vector<8x8xf32>
    %507 = tpu.matmul %501, %506, %cst_134 {dimension_numbers = #tpu.dot_dimension_numbers<[1], [0], [0], [1], [0, 0, 1, 1], [], []>} : vector<8x8xbf16>, vector<8x8xbf16>, vector<8x8xf32> -> vector<8x8xf32>
    %508 = arith.addf %507, %10 : vector<8x8xf32>
    %cst_135 = arith.constant dense<0xFF800000> : vector<8xf32>
    %509 = vector.multi_reduction <maximumf>, %508, %cst_135 [1] : vector<8x8xf32> to vector<8xf32>
    %510 = vector.shape_cast %509 : vector<8xf32> to vector<8x1xf32>
    %511 = vector.broadcast %510 : vector<8x1xf32> to vector<8x8xf32>
    %512 = arith.subf %508, %511 : vector<8x8xf32>
    %513 = math.exp %512 : vector<8x8xf32>
    %cst_136 = arith.constant dense<0.000000e+00> : vector<8xf32>
    %514 = vector.multi_reduction <add>, %513, %cst_136 [1] : vector<8x8xf32> to vector<8xf32>
    %515 = vector.shape_cast %514 : vector<8xf32> to vector<8x1xf32>
    %516 = tpu.reciprocal %515 {approx = true} : vector<8x1xf32> -> vector<8x1xf32>
    %517 = vector.broadcast %516 : vector<8x1xf32> to vector<8x8xf32>
    %518 = arith.mulf %513, %517 : vector<8x8xf32>
    %519 = arith.truncf %518 : vector<8x8xf32> to vector<8x8xbf16>
    %cst_137 = arith.constant dense<0.000000e+00> : vector<8x8xf32>
    %520 = tpu.matmul %519, %505, %cst_137 {dimension_numbers = #tpu.dot_dimension_numbers<[1], [0], [0], [1], [0, 0, 1, 1], [], []>} : vector<8x8xbf16>, vector<8x8xbf16>, vector<8x8xf32> -> vector<8x8xf32>
    %521 = vector.extract_strided_slice %476 {offsets = [0, 16], sizes = [8, 8], strides = [1, 1]} : vector<16x32xf32> to vector<8x8xf32>
    %522 = arith.truncf %521 : vector<8x8xf32> to vector<8x8xbf16>
    %523 = vector.extract_strided_slice %477 {offsets = [0, 16], sizes = [8, 8], strides = [1, 1]} : vector<16x32xf32> to vector<8x8xf32>
    %524 = arith.truncf %523 : vector<8x8xf32> to vector<8x8xbf16>
    %525 = vector.extract_strided_slice %478 {offsets = [0, 16], sizes = [8, 8], strides = [1, 1]} : vector<16x32xf32> to vector<8x8xf32>
    %526 = arith.truncf %525 : vector<8x8xf32> to vector<8x8xbf16>
    %527 = tpu.transpose %524, [1, 0] : vector<8x8xbf16> -> vector<8x8xbf16>
    %cst_138 = arith.constant dense<0.000000e+00> : vector<8x8xf32>
    %528 = tpu.matmul %522, %527, %cst_138 {dimension_numbers = #tpu.dot_dimension_numbers<[1], [0], [0], [1], [0, 0, 1, 1], [], []>} : vector<8x8xbf16>, vector<8x8xbf16>, vector<8x8xf32> -> vector<8x8xf32>
    %529 = arith.addf %528, %10 : vector<8x8xf32>
    %cst_139 = arith.constant dense<0xFF800000> : vector<8xf32>
    %530 = vector.multi_reduction <maximumf>, %529, %cst_139 [1] : vector<8x8xf32> to vector<8xf32>
    %531 = vector.shape_cast %530 : vector<8xf32> to vector<8x1xf32>
    %532 = vector.broadcast %531 : vector<8x1xf32> to vector<8x8xf32>
    %533 = arith.subf %529, %532 : vector<8x8xf32>
    %534 = math.exp %533 : vector<8x8xf32>
    %cst_140 = arith.constant dense<0.000000e+00> : vector<8xf32>
    %535 = vector.multi_reduction <add>, %534, %cst_140 [1] : vector<8x8xf32> to vector<8xf32>
    %536 = vector.shape_cast %535 : vector<8xf32> to vector<8x1xf32>
    %537 = tpu.reciprocal %536 {approx = true} : vector<8x1xf32> -> vector<8x1xf32>
    %538 = vector.broadcast %537 : vector<8x1xf32> to vector<8x8xf32>
    %539 = arith.mulf %534, %538 : vector<8x8xf32>
    %540 = arith.truncf %539 : vector<8x8xf32> to vector<8x8xbf16>
    %cst_141 = arith.constant dense<0.000000e+00> : vector<8x8xf32>
    %541 = tpu.matmul %540, %526, %cst_141 {dimension_numbers = #tpu.dot_dimension_numbers<[1], [0], [0], [1], [0, 0, 1, 1], [], []>} : vector<8x8xbf16>, vector<8x8xbf16>, vector<8x8xf32> -> vector<8x8xf32>
    %542 = vector.extract_strided_slice %476 {offsets = [0, 24], sizes = [8, 8], strides = [1, 1]} : vector<16x32xf32> to vector<8x8xf32>
    %543 = arith.truncf %542 : vector<8x8xf32> to vector<8x8xbf16>
    %544 = vector.extract_strided_slice %477 {offsets = [0, 24], sizes = [8, 8], strides = [1, 1]} : vector<16x32xf32> to vector<8x8xf32>
    %545 = arith.truncf %544 : vector<8x8xf32> to vector<8x8xbf16>
    %546 = vector.extract_strided_slice %478 {offsets = [0, 24], sizes = [8, 8], strides = [1, 1]} : vector<16x32xf32> to vector<8x8xf32>
    %547 = arith.truncf %546 : vector<8x8xf32> to vector<8x8xbf16>
    %548 = tpu.transpose %545, [1, 0] : vector<8x8xbf16> -> vector<8x8xbf16>
    %cst_142 = arith.constant dense<0.000000e+00> : vector<8x8xf32>
    %549 = tpu.matmul %543, %548, %cst_142 {dimension_numbers = #tpu.dot_dimension_numbers<[1], [0], [0], [1], [0, 0, 1, 1], [], []>} : vector<8x8xbf16>, vector<8x8xbf16>, vector<8x8xf32> -> vector<8x8xf32>
    %550 = arith.addf %549, %10 : vector<8x8xf32>
    %cst_143 = arith.constant dense<0xFF800000> : vector<8xf32>
    %551 = vector.multi_reduction <maximumf>, %550, %cst_143 [1] : vector<8x8xf32> to vector<8xf32>
    %552 = vector.shape_cast %551 : vector<8xf32> to vector<8x1xf32>
    %553 = vector.broadcast %552 : vector<8x1xf32> to vector<8x8xf32>
    %554 = arith.subf %550, %553 : vector<8x8xf32>
    %555 = math.exp %554 : vector<8x8xf32>
    %cst_144 = arith.constant dense<0.000000e+00> : vector<8xf32>
    %556 = vector.multi_reduction <add>, %555, %cst_144 [1] : vector<8x8xf32> to vector<8xf32>
    %557 = vector.shape_cast %556 : vector<8xf32> to vector<8x1xf32>
    %558 = tpu.reciprocal %557 {approx = true} : vector<8x1xf32> -> vector<8x1xf32>
    %559 = vector.broadcast %558 : vector<8x1xf32> to vector<8x8xf32>
    %560 = arith.mulf %555, %559 : vector<8x8xf32>
    %561 = arith.truncf %560 : vector<8x8xf32> to vector<8x8xbf16>
    %cst_145 = arith.constant dense<0.000000e+00> : vector<8x8xf32>
    %562 = tpu.matmul %561, %547, %cst_145 {dimension_numbers = #tpu.dot_dimension_numbers<[1], [0], [0], [1], [0, 0, 1, 1], [], []>} : vector<8x8xbf16>, vector<8x8xbf16>, vector<8x8xf32> -> vector<8x8xf32>
    %563 = tpu.concatenate %499, %520, %541, %562 in 1 : vector<8x8xf32>, vector<8x8xf32>, vector<8x8xf32>, vector<8x8xf32> -> vector<8x32xf32>
    %564 = vector.extract_strided_slice %476 {offsets = [8, 0], sizes = [8, 8], strides = [1, 1]} : vector<16x32xf32> to vector<8x8xf32>
    %565 = arith.truncf %564 : vector<8x8xf32> to vector<8x8xbf16>
    %566 = vector.extract_strided_slice %477 {offsets = [8, 0], sizes = [8, 8], strides = [1, 1]} : vector<16x32xf32> to vector<8x8xf32>
    %567 = arith.truncf %566 : vector<8x8xf32> to vector<8x8xbf16>
    %568 = vector.extract_strided_slice %478 {offsets = [8, 0], sizes = [8, 8], strides = [1, 1]} : vector<16x32xf32> to vector<8x8xf32>
    %569 = arith.truncf %568 : vector<8x8xf32> to vector<8x8xbf16>
    %570 = tpu.transpose %567, [1, 0] : vector<8x8xbf16> -> vector<8x8xbf16>
    %cst_146 = arith.constant dense<0.000000e+00> : vector<8x8xf32>
    %571 = tpu.matmul %565, %570, %cst_146 {dimension_numbers = #tpu.dot_dimension_numbers<[1], [0], [0], [1], [0, 0, 1, 1], [], []>} : vector<8x8xbf16>, vector<8x8xbf16>, vector<8x8xf32> -> vector<8x8xf32>
    %572 = arith.addf %571, %10 : vector<8x8xf32>
    %cst_147 = arith.constant dense<0xFF800000> : vector<8xf32>
    %573 = vector.multi_reduction <maximumf>, %572, %cst_147 [1] : vector<8x8xf32> to vector<8xf32>
    %574 = vector.shape_cast %573 : vector<8xf32> to vector<8x1xf32>
    %575 = vector.broadcast %574 : vector<8x1xf32> to vector<8x8xf32>
    %576 = arith.subf %572, %575 : vector<8x8xf32>
    %577 = math.exp %576 : vector<8x8xf32>
    %cst_148 = arith.constant dense<0.000000e+00> : vector<8xf32>
    %578 = vector.multi_reduction <add>, %577, %cst_148 [1] : vector<8x8xf32> to vector<8xf32>
    %579 = vector.shape_cast %578 : vector<8xf32> to vector<8x1xf32>
    %580 = tpu.reciprocal %579 {approx = true} : vector<8x1xf32> -> vector<8x1xf32>
    %581 = vector.broadcast %580 : vector<8x1xf32> to vector<8x8xf32>
    %582 = arith.mulf %577, %581 : vector<8x8xf32>
    %583 = arith.truncf %582 : vector<8x8xf32> to vector<8x8xbf16>
    %cst_149 = arith.constant dense<0.000000e+00> : vector<8x8xf32>
    %584 = tpu.matmul %583, %569, %cst_149 {dimension_numbers = #tpu.dot_dimension_numbers<[1], [0], [0], [1], [0, 0, 1, 1], [], []>} : vector<8x8xbf16>, vector<8x8xbf16>, vector<8x8xf32> -> vector<8x8xf32>
    %585 = vector.extract_strided_slice %476 {offsets = [8, 8], sizes = [8, 8], strides = [1, 1]} : vector<16x32xf32> to vector<8x8xf32>
    %586 = arith.truncf %585 : vector<8x8xf32> to vector<8x8xbf16>
    %587 = vector.extract_strided_slice %477 {offsets = [8, 8], sizes = [8, 8], strides = [1, 1]} : vector<16x32xf32> to vector<8x8xf32>
    %588 = arith.truncf %587 : vector<8x8xf32> to vector<8x8xbf16>
    %589 = vector.extract_strided_slice %478 {offsets = [8, 8], sizes = [8, 8], strides = [1, 1]} : vector<16x32xf32> to vector<8x8xf32>
    %590 = arith.truncf %589 : vector<8x8xf32> to vector<8x8xbf16>
    %591 = tpu.transpose %588, [1, 0] : vector<8x8xbf16> -> vector<8x8xbf16>
    %cst_150 = arith.constant dense<0.000000e+00> : vector<8x8xf32>
    %592 = tpu.matmul %586, %591, %cst_150 {dimension_numbers = #tpu.dot_dimension_numbers<[1], [0], [0], [1], [0, 0, 1, 1], [], []>} : vector<8x8xbf16>, vector<8x8xbf16>, vector<8x8xf32> -> vector<8x8xf32>
    %593 = arith.addf %592, %10 : vector<8x8xf32>
    %cst_151 = arith.constant dense<0xFF800000> : vector<8xf32>
    %594 = vector.multi_reduction <maximumf>, %593, %cst_151 [1] : vector<8x8xf32> to vector<8xf32>
    %595 = vector.shape_cast %594 : vector<8xf32> to vector<8x1xf32>
    %596 = vector.broadcast %595 : vector<8x1xf32> to vector<8x8xf32>
    %597 = arith.subf %593, %596 : vector<8x8xf32>
    %598 = math.exp %597 : vector<8x8xf32>
    %cst_152 = arith.constant dense<0.000000e+00> : vector<8xf32>
    %599 = vector.multi_reduction <add>, %598, %cst_152 [1] : vector<8x8xf32> to vector<8xf32>
    %600 = vector.shape_cast %599 : vector<8xf32> to vector<8x1xf32>
    %601 = tpu.reciprocal %600 {approx = true} : vector<8x1xf32> -> vector<8x1xf32>
    %602 = vector.broadcast %601 : vector<8x1xf32> to vector<8x8xf32>
    %603 = arith.mulf %598, %602 : vector<8x8xf32>
    %604 = arith.truncf %603 : vector<8x8xf32> to vector<8x8xbf16>
    %cst_153 = arith.constant dense<0.000000e+00> : vector<8x8xf32>
    %605 = tpu.matmul %604, %590, %cst_153 {dimension_numbers = #tpu.dot_dimension_numbers<[1], [0], [0], [1], [0, 0, 1, 1], [], []>} : vector<8x8xbf16>, vector<8x8xbf16>, vector<8x8xf32> -> vector<8x8xf32>
    %606 = vector.extract_strided_slice %476 {offsets = [8, 16], sizes = [8, 8], strides = [1, 1]} : vector<16x32xf32> to vector<8x8xf32>
    %607 = arith.truncf %606 : vector<8x8xf32> to vector<8x8xbf16>
    %608 = vector.extract_strided_slice %477 {offsets = [8, 16], sizes = [8, 8], strides = [1, 1]} : vector<16x32xf32> to vector<8x8xf32>
    %609 = arith.truncf %608 : vector<8x8xf32> to vector<8x8xbf16>
    %610 = vector.extract_strided_slice %478 {offsets = [8, 16], sizes = [8, 8], strides = [1, 1]} : vector<16x32xf32> to vector<8x8xf32>
    %611 = arith.truncf %610 : vector<8x8xf32> to vector<8x8xbf16>
    %612 = tpu.transpose %609, [1, 0] : vector<8x8xbf16> -> vector<8x8xbf16>
    %cst_154 = arith.constant dense<0.000000e+00> : vector<8x8xf32>
    %613 = tpu.matmul %607, %612, %cst_154 {dimension_numbers = #tpu.dot_dimension_numbers<[1], [0], [0], [1], [0, 0, 1, 1], [], []>} : vector<8x8xbf16>, vector<8x8xbf16>, vector<8x8xf32> -> vector<8x8xf32>
    %614 = arith.addf %613, %10 : vector<8x8xf32>
    %cst_155 = arith.constant dense<0xFF800000> : vector<8xf32>
    %615 = vector.multi_reduction <maximumf>, %614, %cst_155 [1] : vector<8x8xf32> to vector<8xf32>
    %616 = vector.shape_cast %615 : vector<8xf32> to vector<8x1xf32>
    %617 = vector.broadcast %616 : vector<8x1xf32> to vector<8x8xf32>
    %618 = arith.subf %614, %617 : vector<8x8xf32>
    %619 = math.exp %618 : vector<8x8xf32>
    %cst_156 = arith.constant dense<0.000000e+00> : vector<8xf32>
    %620 = vector.multi_reduction <add>, %619, %cst_156 [1] : vector<8x8xf32> to vector<8xf32>
    %621 = vector.shape_cast %620 : vector<8xf32> to vector<8x1xf32>
    %622 = tpu.reciprocal %621 {approx = true} : vector<8x1xf32> -> vector<8x1xf32>
    %623 = vector.broadcast %622 : vector<8x1xf32> to vector<8x8xf32>
    %624 = arith.mulf %619, %623 : vector<8x8xf32>
    %625 = arith.truncf %624 : vector<8x8xf32> to vector<8x8xbf16>
    %cst_157 = arith.constant dense<0.000000e+00> : vector<8x8xf32>
    %626 = tpu.matmul %625, %611, %cst_157 {dimension_numbers = #tpu.dot_dimension_numbers<[1], [0], [0], [1], [0, 0, 1, 1], [], []>} : vector<8x8xbf16>, vector<8x8xbf16>, vector<8x8xf32> -> vector<8x8xf32>
    %627 = vector.extract_strided_slice %476 {offsets = [8, 24], sizes = [8, 8], strides = [1, 1]} : vector<16x32xf32> to vector<8x8xf32>
    %628 = arith.truncf %627 : vector<8x8xf32> to vector<8x8xbf16>
    %629 = vector.extract_strided_slice %477 {offsets = [8, 24], sizes = [8, 8], strides = [1, 1]} : vector<16x32xf32> to vector<8x8xf32>
    %630 = arith.truncf %629 : vector<8x8xf32> to vector<8x8xbf16>
    %631 = vector.extract_strided_slice %478 {offsets = [8, 24], sizes = [8, 8], strides = [1, 1]} : vector<16x32xf32> to vector<8x8xf32>
    %632 = arith.truncf %631 : vector<8x8xf32> to vector<8x8xbf16>
    %633 = tpu.transpose %630, [1, 0] : vector<8x8xbf16> -> vector<8x8xbf16>
    %cst_158 = arith.constant dense<0.000000e+00> : vector<8x8xf32>
    %634 = tpu.matmul %628, %633, %cst_158 {dimension_numbers = #tpu.dot_dimension_numbers<[1], [0], [0], [1], [0, 0, 1, 1], [], []>} : vector<8x8xbf16>, vector<8x8xbf16>, vector<8x8xf32> -> vector<8x8xf32>
    %635 = arith.addf %634, %10 : vector<8x8xf32>
    %cst_159 = arith.constant dense<0xFF800000> : vector<8xf32>
    %636 = vector.multi_reduction <maximumf>, %635, %cst_159 [1] : vector<8x8xf32> to vector<8xf32>
    %637 = vector.shape_cast %636 : vector<8xf32> to vector<8x1xf32>
    %638 = vector.broadcast %637 : vector<8x1xf32> to vector<8x8xf32>
    %639 = arith.subf %635, %638 : vector<8x8xf32>
    %640 = math.exp %639 : vector<8x8xf32>
    %cst_160 = arith.constant dense<0.000000e+00> : vector<8xf32>
    %641 = vector.multi_reduction <add>, %640, %cst_160 [1] : vector<8x8xf32> to vector<8xf32>
    %642 = vector.shape_cast %641 : vector<8xf32> to vector<8x1xf32>
    %643 = tpu.reciprocal %642 {approx = true} : vector<8x1xf32> -> vector<8x1xf32>
    %644 = vector.broadcast %643 : vector<8x1xf32> to vector<8x8xf32>
    %645 = arith.mulf %640, %644 : vector<8x8xf32>
    %646 = arith.truncf %645 : vector<8x8xf32> to vector<8x8xbf16>
    %cst_161 = arith.constant dense<0.000000e+00> : vector<8x8xf32>
    %647 = tpu.matmul %646, %632, %cst_161 {dimension_numbers = #tpu.dot_dimension_numbers<[1], [0], [0], [1], [0, 0, 1, 1], [], []>} : vector<8x8xbf16>, vector<8x8xbf16>, vector<8x8xf32> -> vector<8x8xf32>
    %648 = tpu.concatenate %584, %605, %626, %647 in 1 : vector<8x8xf32>, vector<8x8xf32>, vector<8x8xf32>, vector<8x8xf32> -> vector<8x32xf32>
    %649 = tpu.concatenate %563, %648 in 0 : vector<8x32xf32>, vector<8x32xf32> -> vector<16x32xf32>
    %650 = arith.truncf %649 : vector<16x32xf32> to vector<16x32xbf16>
    %c2_162 = arith.constant 2 : index
    %c0_163 = arith.constant 0 : index
    %c0_164 = arith.constant 0 : index
    %651 = vector.load %arg4[%c2_162, %c0_163, %c0_164] : memref<4x32x32xbf16, #tpu.memory_space<vmem>>, vector<1x32x32xbf16>
    %652 = vector.shape_cast %651 : vector<1x32x32xbf16> to vector<32x32xbf16>
    %cst_165 = arith.constant dense<0.000000e+00> : vector<16x32xf32>
    %653 = tpu.matmul %650, %652, %cst_165 {dimension_numbers = #tpu.dot_dimension_numbers<[1], [0], [0], [1], [0, 0, 1, 1], [], []>} : vector<16x32xbf16>, vector<32x32xbf16>, vector<16x32xf32> -> vector<16x32xf32>
    %c15 = arith.constant 15 : index
    %c0_166 = arith.constant 0 : index
    %654 = vector.load %arg8[%c15, %c0_166] : memref<27x128xf32, #tpu.memory_space<vmem>>, vector<1x32xf32>
    %655 = vector.broadcast %654 : vector<1x32xf32> to vector<16x32xf32>
    %656 = arith.addf %653, %655 : vector<16x32xf32>
    %657 = arith.addf %468, %656 : vector<16x32xf32>
    %c18 = arith.constant 18 : index
    %c0_167 = arith.constant 0 : index
    %658 = vector.load %arg8[%c18, %c0_167] : memref<27x128xf32, #tpu.memory_space<vmem>>, vector<1x32xf32>
    %c19 = arith.constant 19 : index
    %c0_168 = arith.constant 0 : index
    %659 = vector.load %arg8[%c19, %c0_168] : memref<27x128xf32, #tpu.memory_space<vmem>>, vector<1x32xf32>
    %cst_169 = arith.constant dense<0.000000e+00> : vector<16xf32>
    %660 = vector.multi_reduction <add>, %657, %cst_169 [1] : vector<16x32xf32> to vector<16xf32>
    %661 = vector.shape_cast %660 : vector<16xf32> to vector<16x1xf32>
    %cst_170 = arith.constant 3.200000e+01 : f32
    %662 = vector.broadcast %cst_170 : f32 to vector<16x1xf32>
    %663 = arith.divf %661, %662 : vector<16x1xf32>
    %664 = vector.broadcast %663 : vector<16x1xf32> to vector<16x32xf32>
    %665 = arith.subf %657, %664 : vector<16x32xf32>
    %666 = arith.mulf %665, %665 : vector<16x32xf32>
    %cst_171 = arith.constant dense<0.000000e+00> : vector<16xf32>
    %667 = vector.multi_reduction <add>, %666, %cst_171 [1] : vector<16x32xf32> to vector<16xf32>
    %668 = vector.shape_cast %667 : vector<16xf32> to vector<16x1xf32>
    %cst_172 = arith.constant 3.200000e+01 : f32
    %669 = vector.broadcast %cst_172 : f32 to vector<16x1xf32>
    %670 = arith.divf %668, %669 : vector<16x1xf32>
    %cst_173 = arith.constant 9.99999974E-6 : f32
    %671 = vector.broadcast %cst_173 : f32 to vector<16x1xf32>
    %672 = arith.addf %670, %671 : vector<16x1xf32>
    %673 = math.rsqrt %672 : vector<16x1xf32>
    %674 = vector.broadcast %673 : vector<16x1xf32> to vector<16x32xf32>
    %675 = arith.mulf %665, %674 : vector<16x32xf32>
    %676 = vector.broadcast %658 : vector<1x32xf32> to vector<16x32xf32>
    %677 = arith.mulf %675, %676 : vector<16x32xf32>
    %678 = vector.broadcast %659 : vector<1x32xf32> to vector<16x32xf32>
    %679 = arith.addf %677, %678 : vector<16x32xf32>
    %c3_174 = arith.constant 3 : index
    %c0_175 = arith.constant 0 : index
    %c0_176 = arith.constant 0 : index
    %680 = vector.load %arg3[%c3_174, %c0_175, %c0_176] : memref<4x32x96xbf16, #tpu.memory_space<vmem>>, vector<1x32x96xbf16>
    %681 = vector.shape_cast %680 : vector<1x32x96xbf16> to vector<32x96xbf16>
    %682 = arith.truncf %679 : vector<16x32xf32> to vector<16x32xbf16>
    %683 = vector.extract_strided_slice %681 {offsets = [0, 0], sizes = [32, 32], strides = [1, 1]} : vector<32x96xbf16> to vector<32x32xbf16>
    %cst_177 = arith.constant dense<0.000000e+00> : vector<16x32xf32>
    %684 = tpu.matmul %682, %683, %cst_177 {dimension_numbers = #tpu.dot_dimension_numbers<[1], [0], [0], [1], [0, 0, 1, 1], [], []>} : vector<16x32xbf16>, vector<32x32xbf16>, vector<16x32xf32> -> vector<16x32xf32>
    %c13 = arith.constant 13 : index
    %c0_178 = arith.constant 0 : index
    %685 = vector.load %arg8[%c13, %c0_178] : memref<27x128xf32, #tpu.memory_space<vmem>>, vector<1x32xf32>
    %686 = vector.broadcast %685 : vector<1x32xf32> to vector<16x32xf32>
    %687 = arith.addf %684, %686 : vector<16x32xf32>
    %688 = vector.extract_strided_slice %681 {offsets = [0, 32], sizes = [32, 64], strides = [1, 1]} : vector<32x96xbf16> to vector<32x64xbf16>
    %cst_179 = arith.constant dense<0.000000e+00> : vector<32x64xf32>
    %689 = tpu.matmul %4, %688, %cst_179 {dimension_numbers = #tpu.dot_dimension_numbers<[1], [0], [0], [1], [0, 0, 1, 1], [], []>} : vector<32x32xbf16>, vector<32x64xbf16>, vector<32x64xf32> -> vector<32x64xf32>
    %c13_180 = arith.constant 13 : index
    %c32_181 = arith.constant 32 : index
    %690 = vector.load %arg8[%c13_180, %c32_181] : memref<27x128xf32, #tpu.memory_space<vmem>>, vector<1x64xf32>
    %691 = vector.broadcast %690 : vector<1x64xf32> to vector<32x64xf32>
    %692 = arith.addf %689, %691 : vector<32x64xf32>
    %693 = vector.extract_strided_slice %692 {offsets = [0, 0], sizes = [32, 32], strides = [1, 1]} : vector<32x64xf32> to vector<32x32xf32>
    %694 = vector.extract_strided_slice %692 {offsets = [0, 32], sizes = [32, 32], strides = [1, 1]} : vector<32x64xf32> to vector<32x32xf32>
    %695 = vector.extract_strided_slice %687 {offsets = [0, 0], sizes = [8, 8], strides = [1, 1]} : vector<16x32xf32> to vector<8x8xf32>
    %696 = arith.truncf %695 : vector<8x8xf32> to vector<8x8xbf16>
    %697 = vector.extract_strided_slice %693 {offsets = [0, 0], sizes = [16, 8], strides = [1, 1]} : vector<32x32xf32> to vector<16x8xf32>
    %698 = arith.truncf %697 : vector<16x8xf32> to vector<16x8xbf16>
    %699 = vector.extract_strided_slice %694 {offsets = [0, 0], sizes = [16, 8], strides = [1, 1]} : vector<32x32xf32> to vector<16x8xf32>
    %700 = arith.truncf %699 : vector<16x8xf32> to vector<16x8xbf16>
    %701 = tpu.transpose %698, [1, 0] : vector<16x8xbf16> -> vector<8x16xbf16>
    %cst_182 = arith.constant dense<0.000000e+00> : vector<8x16xf32>
    %702 = tpu.matmul %696, %701, %cst_182 {dimension_numbers = #tpu.dot_dimension_numbers<[1], [0], [0], [1], [0, 0, 1, 1], [], []>} : vector<8x8xbf16>, vector<8x16xbf16>, vector<8x16xf32> -> vector<8x16xf32>
    %cst_183 = arith.constant dense<0xFF800000> : vector<8xf32>
    %703 = vector.multi_reduction <maximumf>, %702, %cst_183 [1] : vector<8x16xf32> to vector<8xf32>
    %704 = vector.shape_cast %703 : vector<8xf32> to vector<8x1xf32>
    %705 = vector.broadcast %704 : vector<8x1xf32> to vector<8x16xf32>
    %706 = arith.subf %702, %705 : vector<8x16xf32>
    %707 = math.exp %706 : vector<8x16xf32>
    %cst_184 = arith.constant dense<0.000000e+00> : vector<8xf32>
    %708 = vector.multi_reduction <add>, %707, %cst_184 [1] : vector<8x16xf32> to vector<8xf32>
    %709 = vector.shape_cast %708 : vector<8xf32> to vector<8x1xf32>
    %710 = tpu.reciprocal %709 {approx = true} : vector<8x1xf32> -> vector<8x1xf32>
    %711 = vector.broadcast %710 : vector<8x1xf32> to vector<8x16xf32>
    %712 = arith.mulf %707, %711 : vector<8x16xf32>
    %713 = arith.truncf %712 : vector<8x16xf32> to vector<8x16xbf16>
    %cst_185 = arith.constant dense<0.000000e+00> : vector<8x8xf32>
    %714 = tpu.matmul %713, %700, %cst_185 {dimension_numbers = #tpu.dot_dimension_numbers<[1], [0], [0], [1], [0, 0, 1, 1], [], []>} : vector<8x16xbf16>, vector<16x8xbf16>, vector<8x8xf32> -> vector<8x8xf32>
    %715 = vector.extract_strided_slice %687 {offsets = [0, 8], sizes = [8, 8], strides = [1, 1]} : vector<16x32xf32> to vector<8x8xf32>
    %716 = arith.truncf %715 : vector<8x8xf32> to vector<8x8xbf16>
    %717 = vector.extract_strided_slice %693 {offsets = [0, 8], sizes = [16, 8], strides = [1, 1]} : vector<32x32xf32> to vector<16x8xf32>
    %718 = arith.truncf %717 : vector<16x8xf32> to vector<16x8xbf16>
    %719 = vector.extract_strided_slice %694 {offsets = [0, 8], sizes = [16, 8], strides = [1, 1]} : vector<32x32xf32> to vector<16x8xf32>
    %720 = arith.truncf %719 : vector<16x8xf32> to vector<16x8xbf16>
    %721 = tpu.transpose %718, [1, 0] : vector<16x8xbf16> -> vector<8x16xbf16>
    %cst_186 = arith.constant dense<0.000000e+00> : vector<8x16xf32>
    %722 = tpu.matmul %716, %721, %cst_186 {dimension_numbers = #tpu.dot_dimension_numbers<[1], [0], [0], [1], [0, 0, 1, 1], [], []>} : vector<8x8xbf16>, vector<8x16xbf16>, vector<8x16xf32> -> vector<8x16xf32>
    %cst_187 = arith.constant dense<0xFF800000> : vector<8xf32>
    %723 = vector.multi_reduction <maximumf>, %722, %cst_187 [1] : vector<8x16xf32> to vector<8xf32>
    %724 = vector.shape_cast %723 : vector<8xf32> to vector<8x1xf32>
    %725 = vector.broadcast %724 : vector<8x1xf32> to vector<8x16xf32>
    %726 = arith.subf %722, %725 : vector<8x16xf32>
    %727 = math.exp %726 : vector<8x16xf32>
    %cst_188 = arith.constant dense<0.000000e+00> : vector<8xf32>
    %728 = vector.multi_reduction <add>, %727, %cst_188 [1] : vector<8x16xf32> to vector<8xf32>
    %729 = vector.shape_cast %728 : vector<8xf32> to vector<8x1xf32>
    %730 = tpu.reciprocal %729 {approx = true} : vector<8x1xf32> -> vector<8x1xf32>
    %731 = vector.broadcast %730 : vector<8x1xf32> to vector<8x16xf32>
    %732 = arith.mulf %727, %731 : vector<8x16xf32>
    %733 = arith.truncf %732 : vector<8x16xf32> to vector<8x16xbf16>
    %cst_189 = arith.constant dense<0.000000e+00> : vector<8x8xf32>
    %734 = tpu.matmul %733, %720, %cst_189 {dimension_numbers = #tpu.dot_dimension_numbers<[1], [0], [0], [1], [0, 0, 1, 1], [], []>} : vector<8x16xbf16>, vector<16x8xbf16>, vector<8x8xf32> -> vector<8x8xf32>
    %735 = vector.extract_strided_slice %687 {offsets = [0, 16], sizes = [8, 8], strides = [1, 1]} : vector<16x32xf32> to vector<8x8xf32>
    %736 = arith.truncf %735 : vector<8x8xf32> to vector<8x8xbf16>
    %737 = vector.extract_strided_slice %693 {offsets = [0, 16], sizes = [16, 8], strides = [1, 1]} : vector<32x32xf32> to vector<16x8xf32>
    %738 = arith.truncf %737 : vector<16x8xf32> to vector<16x8xbf16>
    %739 = vector.extract_strided_slice %694 {offsets = [0, 16], sizes = [16, 8], strides = [1, 1]} : vector<32x32xf32> to vector<16x8xf32>
    %740 = arith.truncf %739 : vector<16x8xf32> to vector<16x8xbf16>
    %741 = tpu.transpose %738, [1, 0] : vector<16x8xbf16> -> vector<8x16xbf16>
    %cst_190 = arith.constant dense<0.000000e+00> : vector<8x16xf32>
    %742 = tpu.matmul %736, %741, %cst_190 {dimension_numbers = #tpu.dot_dimension_numbers<[1], [0], [0], [1], [0, 0, 1, 1], [], []>} : vector<8x8xbf16>, vector<8x16xbf16>, vector<8x16xf32> -> vector<8x16xf32>
    %cst_191 = arith.constant dense<0xFF800000> : vector<8xf32>
    %743 = vector.multi_reduction <maximumf>, %742, %cst_191 [1] : vector<8x16xf32> to vector<8xf32>
    %744 = vector.shape_cast %743 : vector<8xf32> to vector<8x1xf32>
    %745 = vector.broadcast %744 : vector<8x1xf32> to vector<8x16xf32>
    %746 = arith.subf %742, %745 : vector<8x16xf32>
    %747 = math.exp %746 : vector<8x16xf32>
    %cst_192 = arith.constant dense<0.000000e+00> : vector<8xf32>
    %748 = vector.multi_reduction <add>, %747, %cst_192 [1] : vector<8x16xf32> to vector<8xf32>
    %749 = vector.shape_cast %748 : vector<8xf32> to vector<8x1xf32>
    %750 = tpu.reciprocal %749 {approx = true} : vector<8x1xf32> -> vector<8x1xf32>
    %751 = vector.broadcast %750 : vector<8x1xf32> to vector<8x16xf32>
    %752 = arith.mulf %747, %751 : vector<8x16xf32>
    %753 = arith.truncf %752 : vector<8x16xf32> to vector<8x16xbf16>
    %cst_193 = arith.constant dense<0.000000e+00> : vector<8x8xf32>
    %754 = tpu.matmul %753, %740, %cst_193 {dimension_numbers = #tpu.dot_dimension_numbers<[1], [0], [0], [1], [0, 0, 1, 1], [], []>} : vector<8x16xbf16>, vector<16x8xbf16>, vector<8x8xf32> -> vector<8x8xf32>
    %755 = vector.extract_strided_slice %687 {offsets = [0, 24], sizes = [8, 8], strides = [1, 1]} : vector<16x32xf32> to vector<8x8xf32>
    %756 = arith.truncf %755 : vector<8x8xf32> to vector<8x8xbf16>
    %757 = vector.extract_strided_slice %693 {offsets = [0, 24], sizes = [16, 8], strides = [1, 1]} : vector<32x32xf32> to vector<16x8xf32>
    %758 = arith.truncf %757 : vector<16x8xf32> to vector<16x8xbf16>
    %759 = vector.extract_strided_slice %694 {offsets = [0, 24], sizes = [16, 8], strides = [1, 1]} : vector<32x32xf32> to vector<16x8xf32>
    %760 = arith.truncf %759 : vector<16x8xf32> to vector<16x8xbf16>
    %761 = tpu.transpose %758, [1, 0] : vector<16x8xbf16> -> vector<8x16xbf16>
    %cst_194 = arith.constant dense<0.000000e+00> : vector<8x16xf32>
    %762 = tpu.matmul %756, %761, %cst_194 {dimension_numbers = #tpu.dot_dimension_numbers<[1], [0], [0], [1], [0, 0, 1, 1], [], []>} : vector<8x8xbf16>, vector<8x16xbf16>, vector<8x16xf32> -> vector<8x16xf32>
    %cst_195 = arith.constant dense<0xFF800000> : vector<8xf32>
    %763 = vector.multi_reduction <maximumf>, %762, %cst_195 [1] : vector<8x16xf32> to vector<8xf32>
    %764 = vector.shape_cast %763 : vector<8xf32> to vector<8x1xf32>
    %765 = vector.broadcast %764 : vector<8x1xf32> to vector<8x16xf32>
    %766 = arith.subf %762, %765 : vector<8x16xf32>
    %767 = math.exp %766 : vector<8x16xf32>
    %cst_196 = arith.constant dense<0.000000e+00> : vector<8xf32>
    %768 = vector.multi_reduction <add>, %767, %cst_196 [1] : vector<8x16xf32> to vector<8xf32>
    %769 = vector.shape_cast %768 : vector<8xf32> to vector<8x1xf32>
    %770 = tpu.reciprocal %769 {approx = true} : vector<8x1xf32> -> vector<8x1xf32>
    %771 = vector.broadcast %770 : vector<8x1xf32> to vector<8x16xf32>
    %772 = arith.mulf %767, %771 : vector<8x16xf32>
    %773 = arith.truncf %772 : vector<8x16xf32> to vector<8x16xbf16>
    %cst_197 = arith.constant dense<0.000000e+00> : vector<8x8xf32>
    %774 = tpu.matmul %773, %760, %cst_197 {dimension_numbers = #tpu.dot_dimension_numbers<[1], [0], [0], [1], [0, 0, 1, 1], [], []>} : vector<8x16xbf16>, vector<16x8xbf16>, vector<8x8xf32> -> vector<8x8xf32>
    %775 = tpu.concatenate %714, %734, %754, %774 in 1 : vector<8x8xf32>, vector<8x8xf32>, vector<8x8xf32>, vector<8x8xf32> -> vector<8x32xf32>
    %776 = vector.extract_strided_slice %687 {offsets = [8, 0], sizes = [8, 8], strides = [1, 1]} : vector<16x32xf32> to vector<8x8xf32>
    %777 = arith.truncf %776 : vector<8x8xf32> to vector<8x8xbf16>
    %778 = vector.extract_strided_slice %693 {offsets = [16, 0], sizes = [16, 8], strides = [1, 1]} : vector<32x32xf32> to vector<16x8xf32>
    %779 = arith.truncf %778 : vector<16x8xf32> to vector<16x8xbf16>
    %780 = vector.extract_strided_slice %694 {offsets = [16, 0], sizes = [16, 8], strides = [1, 1]} : vector<32x32xf32> to vector<16x8xf32>
    %781 = arith.truncf %780 : vector<16x8xf32> to vector<16x8xbf16>
    %782 = tpu.transpose %779, [1, 0] : vector<16x8xbf16> -> vector<8x16xbf16>
    %cst_198 = arith.constant dense<0.000000e+00> : vector<8x16xf32>
    %783 = tpu.matmul %777, %782, %cst_198 {dimension_numbers = #tpu.dot_dimension_numbers<[1], [0], [0], [1], [0, 0, 1, 1], [], []>} : vector<8x8xbf16>, vector<8x16xbf16>, vector<8x16xf32> -> vector<8x16xf32>
    %cst_199 = arith.constant dense<0xFF800000> : vector<8xf32>
    %784 = vector.multi_reduction <maximumf>, %783, %cst_199 [1] : vector<8x16xf32> to vector<8xf32>
    %785 = vector.shape_cast %784 : vector<8xf32> to vector<8x1xf32>
    %786 = vector.broadcast %785 : vector<8x1xf32> to vector<8x16xf32>
    %787 = arith.subf %783, %786 : vector<8x16xf32>
    %788 = math.exp %787 : vector<8x16xf32>
    %cst_200 = arith.constant dense<0.000000e+00> : vector<8xf32>
    %789 = vector.multi_reduction <add>, %788, %cst_200 [1] : vector<8x16xf32> to vector<8xf32>
    %790 = vector.shape_cast %789 : vector<8xf32> to vector<8x1xf32>
    %791 = tpu.reciprocal %790 {approx = true} : vector<8x1xf32> -> vector<8x1xf32>
    %792 = vector.broadcast %791 : vector<8x1xf32> to vector<8x16xf32>
    %793 = arith.mulf %788, %792 : vector<8x16xf32>
    %794 = arith.truncf %793 : vector<8x16xf32> to vector<8x16xbf16>
    %cst_201 = arith.constant dense<0.000000e+00> : vector<8x8xf32>
    %795 = tpu.matmul %794, %781, %cst_201 {dimension_numbers = #tpu.dot_dimension_numbers<[1], [0], [0], [1], [0, 0, 1, 1], [], []>} : vector<8x16xbf16>, vector<16x8xbf16>, vector<8x8xf32> -> vector<8x8xf32>
    %796 = vector.extract_strided_slice %687 {offsets = [8, 8], sizes = [8, 8], strides = [1, 1]} : vector<16x32xf32> to vector<8x8xf32>
    %797 = arith.truncf %796 : vector<8x8xf32> to vector<8x8xbf16>
    %798 = vector.extract_strided_slice %693 {offsets = [16, 8], sizes = [16, 8], strides = [1, 1]} : vector<32x32xf32> to vector<16x8xf32>
    %799 = arith.truncf %798 : vector<16x8xf32> to vector<16x8xbf16>
    %800 = vector.extract_strided_slice %694 {offsets = [16, 8], sizes = [16, 8], strides = [1, 1]} : vector<32x32xf32> to vector<16x8xf32>
    %801 = arith.truncf %800 : vector<16x8xf32> to vector<16x8xbf16>
    %802 = tpu.transpose %799, [1, 0] : vector<16x8xbf16> -> vector<8x16xbf16>
    %cst_202 = arith.constant dense<0.000000e+00> : vector<8x16xf32>
    %803 = tpu.matmul %797, %802, %cst_202 {dimension_numbers = #tpu.dot_dimension_numbers<[1], [0], [0], [1], [0, 0, 1, 1], [], []>} : vector<8x8xbf16>, vector<8x16xbf16>, vector<8x16xf32> -> vector<8x16xf32>
    %cst_203 = arith.constant dense<0xFF800000> : vector<8xf32>
    %804 = vector.multi_reduction <maximumf>, %803, %cst_203 [1] : vector<8x16xf32> to vector<8xf32>
    %805 = vector.shape_cast %804 : vector<8xf32> to vector<8x1xf32>
    %806 = vector.broadcast %805 : vector<8x1xf32> to vector<8x16xf32>
    %807 = arith.subf %803, %806 : vector<8x16xf32>
    %808 = math.exp %807 : vector<8x16xf32>
    %cst_204 = arith.constant dense<0.000000e+00> : vector<8xf32>
    %809 = vector.multi_reduction <add>, %808, %cst_204 [1] : vector<8x16xf32> to vector<8xf32>
    %810 = vector.shape_cast %809 : vector<8xf32> to vector<8x1xf32>
    %811 = tpu.reciprocal %810 {approx = true} : vector<8x1xf32> -> vector<8x1xf32>
    %812 = vector.broadcast %811 : vector<8x1xf32> to vector<8x16xf32>
    %813 = arith.mulf %808, %812 : vector<8x16xf32>
    %814 = arith.truncf %813 : vector<8x16xf32> to vector<8x16xbf16>
    %cst_205 = arith.constant dense<0.000000e+00> : vector<8x8xf32>
    %815 = tpu.matmul %814, %801, %cst_205 {dimension_numbers = #tpu.dot_dimension_numbers<[1], [0], [0], [1], [0, 0, 1, 1], [], []>} : vector<8x16xbf16>, vector<16x8xbf16>, vector<8x8xf32> -> vector<8x8xf32>
    %816 = vector.extract_strided_slice %687 {offsets = [8, 16], sizes = [8, 8], strides = [1, 1]} : vector<16x32xf32> to vector<8x8xf32>
    %817 = arith.truncf %816 : vector<8x8xf32> to vector<8x8xbf16>
    %818 = vector.extract_strided_slice %693 {offsets = [16, 16], sizes = [16, 8], strides = [1, 1]} : vector<32x32xf32> to vector<16x8xf32>
    %819 = arith.truncf %818 : vector<16x8xf32> to vector<16x8xbf16>
    %820 = vector.extract_strided_slice %694 {offsets = [16, 16], sizes = [16, 8], strides = [1, 1]} : vector<32x32xf32> to vector<16x8xf32>
    %821 = arith.truncf %820 : vector<16x8xf32> to vector<16x8xbf16>
    %822 = tpu.transpose %819, [1, 0] : vector<16x8xbf16> -> vector<8x16xbf16>
    %cst_206 = arith.constant dense<0.000000e+00> : vector<8x16xf32>
    %823 = tpu.matmul %817, %822, %cst_206 {dimension_numbers = #tpu.dot_dimension_numbers<[1], [0], [0], [1], [0, 0, 1, 1], [], []>} : vector<8x8xbf16>, vector<8x16xbf16>, vector<8x16xf32> -> vector<8x16xf32>
    %cst_207 = arith.constant dense<0xFF800000> : vector<8xf32>
    %824 = vector.multi_reduction <maximumf>, %823, %cst_207 [1] : vector<8x16xf32> to vector<8xf32>
    %825 = vector.shape_cast %824 : vector<8xf32> to vector<8x1xf32>
    %826 = vector.broadcast %825 : vector<8x1xf32> to vector<8x16xf32>
    %827 = arith.subf %823, %826 : vector<8x16xf32>
    %828 = math.exp %827 : vector<8x16xf32>
    %cst_208 = arith.constant dense<0.000000e+00> : vector<8xf32>
    %829 = vector.multi_reduction <add>, %828, %cst_208 [1] : vector<8x16xf32> to vector<8xf32>
    %830 = vector.shape_cast %829 : vector<8xf32> to vector<8x1xf32>
    %831 = tpu.reciprocal %830 {approx = true} : vector<8x1xf32> -> vector<8x1xf32>
    %832 = vector.broadcast %831 : vector<8x1xf32> to vector<8x16xf32>
    %833 = arith.mulf %828, %832 : vector<8x16xf32>
    %834 = arith.truncf %833 : vector<8x16xf32> to vector<8x16xbf16>
    %cst_209 = arith.constant dense<0.000000e+00> : vector<8x8xf32>
    %835 = tpu.matmul %834, %821, %cst_209 {dimension_numbers = #tpu.dot_dimension_numbers<[1], [0], [0], [1], [0, 0, 1, 1], [], []>} : vector<8x16xbf16>, vector<16x8xbf16>, vector<8x8xf32> -> vector<8x8xf32>
    %836 = vector.extract_strided_slice %687 {offsets = [8, 24], sizes = [8, 8], strides = [1, 1]} : vector<16x32xf32> to vector<8x8xf32>
    %837 = arith.truncf %836 : vector<8x8xf32> to vector<8x8xbf16>
    %838 = vector.extract_strided_slice %693 {offsets = [16, 24], sizes = [16, 8], strides = [1, 1]} : vector<32x32xf32> to vector<16x8xf32>
    %839 = arith.truncf %838 : vector<16x8xf32> to vector<16x8xbf16>
    %840 = vector.extract_strided_slice %694 {offsets = [16, 24], sizes = [16, 8], strides = [1, 1]} : vector<32x32xf32> to vector<16x8xf32>
    %841 = arith.truncf %840 : vector<16x8xf32> to vector<16x8xbf16>
    %842 = tpu.transpose %839, [1, 0] : vector<16x8xbf16> -> vector<8x16xbf16>
    %cst_210 = arith.constant dense<0.000000e+00> : vector<8x16xf32>
    %843 = tpu.matmul %837, %842, %cst_210 {dimension_numbers = #tpu.dot_dimension_numbers<[1], [0], [0], [1], [0, 0, 1, 1], [], []>} : vector<8x8xbf16>, vector<8x16xbf16>, vector<8x16xf32> -> vector<8x16xf32>
    %cst_211 = arith.constant dense<0xFF800000> : vector<8xf32>
    %844 = vector.multi_reduction <maximumf>, %843, %cst_211 [1] : vector<8x16xf32> to vector<8xf32>
    %845 = vector.shape_cast %844 : vector<8xf32> to vector<8x1xf32>
    %846 = vector.broadcast %845 : vector<8x1xf32> to vector<8x16xf32>
    %847 = arith.subf %843, %846 : vector<8x16xf32>
    %848 = math.exp %847 : vector<8x16xf32>
    %cst_212 = arith.constant dense<0.000000e+00> : vector<8xf32>
    %849 = vector.multi_reduction <add>, %848, %cst_212 [1] : vector<8x16xf32> to vector<8xf32>
    %850 = vector.shape_cast %849 : vector<8xf32> to vector<8x1xf32>
    %851 = tpu.reciprocal %850 {approx = true} : vector<8x1xf32> -> vector<8x1xf32>
    %852 = vector.broadcast %851 : vector<8x1xf32> to vector<8x16xf32>
    %853 = arith.mulf %848, %852 : vector<8x16xf32>
    %854 = arith.truncf %853 : vector<8x16xf32> to vector<8x16xbf16>
    %cst_213 = arith.constant dense<0.000000e+00> : vector<8x8xf32>
    %855 = tpu.matmul %854, %841, %cst_213 {dimension_numbers = #tpu.dot_dimension_numbers<[1], [0], [0], [1], [0, 0, 1, 1], [], []>} : vector<8x16xbf16>, vector<16x8xbf16>, vector<8x8xf32> -> vector<8x8xf32>
    %856 = tpu.concatenate %795, %815, %835, %855 in 1 : vector<8x8xf32>, vector<8x8xf32>, vector<8x8xf32>, vector<8x8xf32> -> vector<8x32xf32>
    %857 = tpu.concatenate %775, %856 in 0 : vector<8x32xf32>, vector<8x32xf32> -> vector<16x32xf32>
    %858 = arith.truncf %857 : vector<16x32xf32> to vector<16x32xbf16>
    %c3_214 = arith.constant 3 : index
    %c0_215 = arith.constant 0 : index
    %c0_216 = arith.constant 0 : index
    %859 = vector.load %arg4[%c3_214, %c0_215, %c0_216] : memref<4x32x32xbf16, #tpu.memory_space<vmem>>, vector<1x32x32xbf16>
    %860 = vector.shape_cast %859 : vector<1x32x32xbf16> to vector<32x32xbf16>
    %cst_217 = arith.constant dense<0.000000e+00> : vector<16x32xf32>
    %861 = tpu.matmul %858, %860, %cst_217 {dimension_numbers = #tpu.dot_dimension_numbers<[1], [0], [0], [1], [0, 0, 1, 1], [], []>} : vector<16x32xbf16>, vector<32x32xbf16>, vector<16x32xf32> -> vector<16x32xf32>
    %c16 = arith.constant 16 : index
    %c0_218 = arith.constant 0 : index
    %862 = vector.load %arg8[%c16, %c0_218] : memref<27x128xf32, #tpu.memory_space<vmem>>, vector<1x32xf32>
    %863 = vector.broadcast %862 : vector<1x32xf32> to vector<16x32xf32>
    %864 = arith.addf %861, %863 : vector<16x32xf32>
    %865 = arith.addf %679, %864 : vector<16x32xf32>
    %c20 = arith.constant 20 : index
    %c0_219 = arith.constant 0 : index
    %866 = vector.load %arg8[%c20, %c0_219] : memref<27x128xf32, #tpu.memory_space<vmem>>, vector<1x32xf32>
    %c21 = arith.constant 21 : index
    %c0_220 = arith.constant 0 : index
    %867 = vector.load %arg8[%c21, %c0_220] : memref<27x128xf32, #tpu.memory_space<vmem>>, vector<1x32xf32>
    %cst_221 = arith.constant dense<0.000000e+00> : vector<16xf32>
    %868 = vector.multi_reduction <add>, %865, %cst_221 [1] : vector<16x32xf32> to vector<16xf32>
    %869 = vector.shape_cast %868 : vector<16xf32> to vector<16x1xf32>
    %cst_222 = arith.constant 3.200000e+01 : f32
    %870 = vector.broadcast %cst_222 : f32 to vector<16x1xf32>
    %871 = arith.divf %869, %870 : vector<16x1xf32>
    %872 = vector.broadcast %871 : vector<16x1xf32> to vector<16x32xf32>
    %873 = arith.subf %865, %872 : vector<16x32xf32>
    %874 = arith.mulf %873, %873 : vector<16x32xf32>
    %cst_223 = arith.constant dense<0.000000e+00> : vector<16xf32>
    %875 = vector.multi_reduction <add>, %874, %cst_223 [1] : vector<16x32xf32> to vector<16xf32>
    %876 = vector.shape_cast %875 : vector<16xf32> to vector<16x1xf32>
    %cst_224 = arith.constant 3.200000e+01 : f32
    %877 = vector.broadcast %cst_224 : f32 to vector<16x1xf32>
    %878 = arith.divf %876, %877 : vector<16x1xf32>
    %cst_225 = arith.constant 9.99999974E-6 : f32
    %879 = vector.broadcast %cst_225 : f32 to vector<16x1xf32>
    %880 = arith.addf %878, %879 : vector<16x1xf32>
    %881 = math.rsqrt %880 : vector<16x1xf32>
    %882 = vector.broadcast %881 : vector<16x1xf32> to vector<16x32xf32>
    %883 = arith.mulf %873, %882 : vector<16x32xf32>
    %884 = vector.broadcast %866 : vector<1x32xf32> to vector<16x32xf32>
    %885 = arith.mulf %883, %884 : vector<16x32xf32>
    %886 = vector.broadcast %867 : vector<1x32xf32> to vector<16x32xf32>
    %887 = arith.addf %885, %886 : vector<16x32xf32>
    %888 = arith.truncf %887 : vector<16x32xf32> to vector<16x32xbf16>
    %c1_226 = arith.constant 1 : index
    %c0_227 = arith.constant 0 : index
    %c0_228 = arith.constant 0 : index
    %889 = vector.load %arg5[%c1_226, %c0_227, %c0_228] : memref<2x32x64xbf16, #tpu.memory_space<vmem>>, vector<1x32x64xbf16>
    %890 = vector.shape_cast %889 : vector<1x32x64xbf16> to vector<32x64xbf16>
    %cst_229 = arith.constant dense<0.000000e+00> : vector<16x64xf32>
    %891 = tpu.matmul %888, %890, %cst_229 {dimension_numbers = #tpu.dot_dimension_numbers<[1], [0], [0], [1], [0, 0, 1, 1], [], []>} : vector<16x32xbf16>, vector<32x64xbf16>, vector<16x64xf32> -> vector<16x64xf32>
    %c14 = arith.constant 14 : index
    %c0_230 = arith.constant 0 : index
    %892 = vector.load %arg8[%c14, %c0_230] : memref<27x128xf32, #tpu.memory_space<vmem>>, vector<1x64xf32>
    %893 = vector.broadcast %892 : vector<1x64xf32> to vector<16x64xf32>
    %894 = arith.addf %891, %893 : vector<16x64xf32>
    %cst_231 = arith.constant 0.000000e+00 : f32
    %895 = vector.broadcast %cst_231 : f32 to vector<16x64xf32>
    %896 = arith.maximumf %894, %895 : vector<16x64xf32>
    %897 = arith.truncf %896 : vector<16x64xf32> to vector<16x64xbf16>
    %c1_232 = arith.constant 1 : index
    %c0_233 = arith.constant 0 : index
    %c0_234 = arith.constant 0 : index
    %898 = vector.load %arg6[%c1_232, %c0_233, %c0_234] : memref<2x64x32xbf16, #tpu.memory_space<vmem>>, vector<1x64x32xbf16>
    %899 = vector.shape_cast %898 : vector<1x64x32xbf16> to vector<64x32xbf16>
    %cst_235 = arith.constant dense<0.000000e+00> : vector<16x32xf32>
    %900 = tpu.matmul %897, %899, %cst_235 {dimension_numbers = #tpu.dot_dimension_numbers<[1], [0], [0], [1], [0, 0, 1, 1], [], []>} : vector<16x64xbf16>, vector<64x32xbf16>, vector<16x32xf32> -> vector<16x32xf32>
    %c17 = arith.constant 17 : index
    %c0_236 = arith.constant 0 : index
    %901 = vector.load %arg8[%c17, %c0_236] : memref<27x128xf32, #tpu.memory_space<vmem>>, vector<1x32xf32>
    %902 = vector.broadcast %901 : vector<1x32xf32> to vector<16x32xf32>
    %903 = arith.addf %900, %902 : vector<16x32xf32>
    %904 = arith.addf %887, %903 : vector<16x32xf32>
    %c22 = arith.constant 22 : index
    %c0_237 = arith.constant 0 : index
    %905 = vector.load %arg8[%c22, %c0_237] : memref<27x128xf32, #tpu.memory_space<vmem>>, vector<1x32xf32>
    %c23 = arith.constant 23 : index
    %c0_238 = arith.constant 0 : index
    %906 = vector.load %arg8[%c23, %c0_238] : memref<27x128xf32, #tpu.memory_space<vmem>>, vector<1x32xf32>
    %cst_239 = arith.constant dense<0.000000e+00> : vector<16xf32>
    %907 = vector.multi_reduction <add>, %904, %cst_239 [1] : vector<16x32xf32> to vector<16xf32>
    %908 = vector.shape_cast %907 : vector<16xf32> to vector<16x1xf32>
    %cst_240 = arith.constant 3.200000e+01 : f32
    %909 = vector.broadcast %cst_240 : f32 to vector<16x1xf32>
    %910 = arith.divf %908, %909 : vector<16x1xf32>
    %911 = vector.broadcast %910 : vector<16x1xf32> to vector<16x32xf32>
    %912 = arith.subf %904, %911 : vector<16x32xf32>
    %913 = arith.mulf %912, %912 : vector<16x32xf32>
    %cst_241 = arith.constant dense<0.000000e+00> : vector<16xf32>
    %914 = vector.multi_reduction <add>, %913, %cst_241 [1] : vector<16x32xf32> to vector<16xf32>
    %915 = vector.shape_cast %914 : vector<16xf32> to vector<16x1xf32>
    %cst_242 = arith.constant 3.200000e+01 : f32
    %916 = vector.broadcast %cst_242 : f32 to vector<16x1xf32>
    %917 = arith.divf %915, %916 : vector<16x1xf32>
    %cst_243 = arith.constant 9.99999974E-6 : f32
    %918 = vector.broadcast %cst_243 : f32 to vector<16x1xf32>
    %919 = arith.addf %917, %918 : vector<16x1xf32>
    %920 = math.rsqrt %919 : vector<16x1xf32>
    %921 = vector.broadcast %920 : vector<16x1xf32> to vector<16x32xf32>
    %922 = arith.mulf %912, %921 : vector<16x32xf32>
    %923 = vector.broadcast %905 : vector<1x32xf32> to vector<16x32xf32>
    %924 = arith.mulf %922, %923 : vector<16x32xf32>
    %925 = vector.broadcast %906 : vector<1x32xf32> to vector<16x32xf32>
    %926 = arith.addf %924, %925 : vector<16x32xf32>
    %c24 = arith.constant 24 : index
    %c0_244 = arith.constant 0 : index
    %927 = vector.load %arg8[%c24, %c0_244] : memref<27x128xf32, #tpu.memory_space<vmem>>, vector<1x32xf32>
    %c25 = arith.constant 25 : index
    %c0_245 = arith.constant 0 : index
    %928 = vector.load %arg8[%c25, %c0_245] : memref<27x128xf32, #tpu.memory_space<vmem>>, vector<1x32xf32>
    %cst_246 = arith.constant dense<0.000000e+00> : vector<16xf32>
    %929 = vector.multi_reduction <add>, %926, %cst_246 [1] : vector<16x32xf32> to vector<16xf32>
    %930 = vector.shape_cast %929 : vector<16xf32> to vector<16x1xf32>
    %cst_247 = arith.constant 3.200000e+01 : f32
    %931 = vector.broadcast %cst_247 : f32 to vector<16x1xf32>
    %932 = arith.divf %930, %931 : vector<16x1xf32>
    %933 = vector.broadcast %932 : vector<16x1xf32> to vector<16x32xf32>
    %934 = arith.subf %926, %933 : vector<16x32xf32>
    %935 = arith.mulf %934, %934 : vector<16x32xf32>
    %cst_248 = arith.constant dense<0.000000e+00> : vector<16xf32>
    %936 = vector.multi_reduction <add>, %935, %cst_248 [1] : vector<16x32xf32> to vector<16xf32>
    %937 = vector.shape_cast %936 : vector<16xf32> to vector<16x1xf32>
    %cst_249 = arith.constant 3.200000e+01 : f32
    %938 = vector.broadcast %cst_249 : f32 to vector<16x1xf32>
    %939 = arith.divf %937, %938 : vector<16x1xf32>
    %cst_250 = arith.constant 9.99999974E-6 : f32
    %940 = vector.broadcast %cst_250 : f32 to vector<16x1xf32>
    %941 = arith.addf %939, %940 : vector<16x1xf32>
    %942 = math.rsqrt %941 : vector<16x1xf32>
    %943 = vector.broadcast %942 : vector<16x1xf32> to vector<16x32xf32>
    %944 = arith.mulf %934, %943 : vector<16x32xf32>
    %945 = vector.broadcast %927 : vector<1x32xf32> to vector<16x32xf32>
    %946 = arith.mulf %944, %945 : vector<16x32xf32>
    %947 = vector.broadcast %928 : vector<1x32xf32> to vector<16x32xf32>
    %948 = arith.addf %946, %947 : vector<16x32xf32>
    %949 = arith.truncf %948 : vector<16x32xf32> to vector<16x32xbf16>
    %c0_251 = arith.constant 0 : index
    %c0_252 = arith.constant 0 : index
    %950 = vector.load %arg7[%c0_251, %c0_252] : memref<32x8xbf16, #tpu.memory_space<vmem>>, vector<32x8xbf16>
    %cst_253 = arith.constant dense<0.000000e+00> : vector<16x8xf32>
    %951 = tpu.matmul %949, %950, %cst_253 {dimension_numbers = #tpu.dot_dimension_numbers<[1], [0], [0], [1], [0, 0, 1, 1], [], []>} : vector<16x32xbf16>, vector<32x8xbf16>, vector<16x8xf32> -> vector<16x8xf32>
    %c26 = arith.constant 26 : index
    %c0_254 = arith.constant 0 : index
    %952 = vector.load %arg8[%c26, %c0_254] : memref<27x128xf32, #tpu.memory_space<vmem>>, vector<1x8xf32>
    %953 = vector.broadcast %952 : vector<1x8xf32> to vector<16x8xf32>
    %954 = arith.addf %951, %953 : vector<16x8xf32>
    %955 = vector.shape_cast %954 : vector<16x8xf32> to vector<2x8x8xf32>
    %c0_255 = arith.constant 0 : index
    %c0_256 = arith.constant 0 : index
    %c0_257 = arith.constant 0 : index
    %956 = vector.load %arg9[%c0_255, %c0_256, %c0_257] : memref<2x8x8xf32, #tpu.memory_space<vmem>>, vector<2x8x8xf32>
    tpu.vector_store %arg9[%c0_255, %c0_256, %c0_257], %955 {strides = array<i32>} : memref<2x8x8xf32, #tpu.memory_space<vmem>>, vector<2x8x8xf32>,
    return
  }
  func.func @transform_0(%arg0: i32) -> (i32, i32, i32) {
    %c0_i32 = arith.constant 0 : i32
    %c0_i32_0 = arith.constant 0 : i32
    %c0_i32_1 = arith.constant 0 : i32
    return %arg0, %c0_i32, %c0_i32_0 : i32, i32, i32
  }
  func.func @transform_1(%arg0: i32) -> (i32, i32, i32) {
    %c0_i32 = arith.constant 0 : i32
    %c0_i32_0 = arith.constant 0 : i32
    %c0_i32_1 = arith.constant 0 : i32
    return %arg0, %c0_i32, %c0_i32_0 : i32, i32, i32
  }
  func.func @transform_2(%arg0: i32) -> (i32, i32, i32) {
    %c0_i32 = arith.constant 0 : i32
    %c0_i32_0 = arith.constant 0 : i32
    %c0_i32_1 = arith.constant 0 : i32
    %c0_i32_2 = arith.constant 0 : i32
    return %c0_i32, %c0_i32_0, %c0_i32_1 : i32, i32, i32
  }
  func.func @transform_3(%arg0: i32) -> (i32, i32, i32) {
    %c0_i32 = arith.constant 0 : i32
    %c0_i32_0 = arith.constant 0 : i32
    %c0_i32_1 = arith.constant 0 : i32
    %c0_i32_2 = arith.constant 0 : i32
    return %c0_i32, %c0_i32_0, %c0_i32_1 : i32, i32, i32
  }
  func.func @transform_4(%arg0: i32) -> (i32, i32, i32) {
    %c0_i32 = arith.constant 0 : i32
    %c0_i32_0 = arith.constant 0 : i32
    %c0_i32_1 = arith.constant 0 : i32
    %c0_i32_2 = arith.constant 0 : i32
    return %c0_i32, %c0_i32_0, %c0_i32_1 : i32, i32, i32
  }
  func.func @transform_5(%arg0: i32) -> (i32, i32, i32) {
    %c0_i32 = arith.constant 0 : i32
    %c0_i32_0 = arith.constant 0 : i32
    %c0_i32_1 = arith.constant 0 : i32
    %c0_i32_2 = arith.constant 0 : i32
    return %c0_i32, %c0_i32_0, %c0_i32_1 : i32, i32, i32
  }
  func.func @transform_6(%arg0: i32) -> (i32, i32) {
    %c0_i32 = arith.constant 0 : i32
    %c0_i32_0 = arith.constant 0 : i32
    %c0_i32_1 = arith.constant 0 : i32
    return %c0_i32, %c0_i32_0 : i32, i32
  }
  func.func @transform_7(%arg0: i32) -> (i32, i32) {
    %c0_i32 = arith.constant 0 : i32
    %c0_i32_0 = arith.constant 0 : i32
    %c0_i32_1 = arith.constant 0 : i32
    return %c0_i32, %c0_i32_0 : i32, i32
  }
  func.func @transform_8(%arg0: i32) -> (i32, i32, i32) {
    %c0_i32 = arith.constant 0 : i32
    %c0_i32_0 = arith.constant 0 : i32
    %c0_i32_1 = arith.constant 0 : i32
    return %arg0, %c0_i32, %c0_i32_0 : i32, i32, i32
  }
}

</mosaic_0001>

<bundles_post_ra>
// kernel: tpu_custom_call.1
= control target key start
LH: loop header
LB: loop body
LE: loop exit
PB: predicated region body
PF: predicated region fallthrough
CT: control target
= control target key end

     0   :  { %13 = vsyncpa [#allocation3], 0  ;;  %s7416_s0 = inlined_call_operand.hbm [shape: f32[2,8,32], index: 0, kind: input, shape index: {}]   ;;  %s7417_s1 = inlined_call_operand.vmem [shape: f32[2,16,32], index: 1, kind: input, shape index: {}]   ;;  %s7418_s2 = inlined_call_operand.vmem [shape: bf16[4,32,96], index: 2, kind: input, shape index: {}]   ;;  %s7419_s3 = inlined_call_operand.hbm [shape: bf16[4,32,32], index: 3, kind: input, shape index: {}]   ;;  %s7420_s4 = inlined_call_operand.hbm [shape: bf16[2,32,64], index: 4, kind: input, shape index: {}]   ;;  %s7421_s5 = inlined_call_operand.vmem [shape: bf16[2,64,32], index: 5, kind: input, shape index: {}]   ;;  %s7422_s6 = inlined_call_operand.vmem [shape: bf16[32,8], index: 6, kind: input, shape index: {}]   ;;  %s7423_s7 = inlined_call_operand.hbm [shape: f32[27,128], index: 7, kind: input, shape index: {}]   ;;  %s7424_s8 = inlined_call_operand.hbm [shape: f32[2,8,8], index: 8, kind: output, shape index: {}]  }
   0x1   :  { %14 = vsyncpa [#allocation6], 0 }
   0x2   :  { %15 = vsyncpa [#allocation9], 0 }
   0x3   :  { %16 = vsyncpa [#allocation4], 0  ;;  %s6291_s27 = smov [#allocation5]   ;;  %s6173_s9 = scalar_lea.hbm %s7419_s3, 1024 }
   0x4   :  { %s38_s28 = sshll.u32 %s6291_s27, 4  ;;  %p6174_p0 = scmp.ne.s32.totalorder %s7419_s3, %s6173_s9  ;;  %s39_s28 = int_to_ptr.vmem [resolvable:$true] %s38_s28 }
   0x5   :  { %p6177_p1 = scmp.lt.u32.totalorder %s6173_s9, %s7419_s3 }
   0x7   :  { %p6179_p2 = pnand %p6177_p1, %p6174_p0 }
   0x9   :  { %6182 = shalt.err (!%p6179_p2)
}
   0xa   :  { %s6183_s14 = scalar_lea.vmem %s39_s28, 1024  ;;  %p6188_p4 = scmp.lt.s32.totalorder %s39_s28, %s39_s28 }
   0xb   :  { %p6184_p3 = scmp.ne.s32.totalorder %s39_s28, %s6183_s14  ;;  %p6189_p5 = scmp.lt.s32.totalorder %s6183_s14, %s6183_s14 }
   0xd   :  { %p6190_p6 = por %p6189_p5, %p6188_p4 }
   0xf   :  { %p6191_p7 = pnand %p6190_p6, %p6184_p3 }
  0x11   :  { %6194 = shalt.err (!%p6191_p7)
}
  0x12   :  { %s6292_s15 = smov 64   ;;  %s6293_s16 = smov 4  }
  0x13   :  { %44 = dma.hbm_to_vmem [thread:$0]  %s7419_s3, 1024, %s39_s28, [#allocation6], %s6292_s15, %s6292_s15, %s6293_s16  }
  0x14   :  { %s6294_s19 = smov [#allocation2]   ;;  %s6195_s23 = scalar_lea.hbm %s7416_s0, 256 }
  0x15   :  { %s22_s20 = sshll.u32 %s6294_s19, 4  ;;  %p6196_p8 = scmp.ne.s32.totalorder %s7416_s0, %s6195_s23  ;;  %s23_s20 = int_to_ptr.vmem [resolvable:$true] %s22_s20 }
  0x16   :  { %p6199_p9 = scmp.lt.u32.totalorder %s6195_s23, %s7416_s0 }
  0x18   :  { %p6201_p10 = pnand %p6199_p9, %p6196_p8 }
  0x1a   :  { %6204 = shalt.err (!%p6201_p10)
}
  0x1b   :  { %s6205_s29 = scalar_lea.vmem %s23_s20, 256  ;;  %p6210_p12 = scmp.lt.s32.totalorder %s23_s20, %s23_s20 }
  0x1c   :  { %p6206_p11 = scmp.ne.s32.totalorder %s23_s20, %s6205_s29  ;;  %p6211_p13 = scmp.lt.s32.totalorder %s6205_s29, %s6205_s29 }
  0x1e   :  { %p6212_p0 = por %p6211_p13, %p6210_p12 }
  0x20   :  { %p6213_p1 = pnand %p6212_p0, %p6206_p11 }
  0x22   :  { %6216 = shalt.err (!%p6213_p1)
}
  0x23   :  { %s6295_s3 = smov 128   ;;  %s6296_s28 = smov 8  }
  0x24   :  { %28 = dma.hbm_to_vmem [thread:$0]  %s7416_s0, 256, %s23_s20, [#allocation3], %s6295_s3, %s6295_s3, %s6296_s28  }
  0x25   :  { %s6297_s10 = smov [#allocation7]   ;;  %s6298_s12 = smov [#allocation8]  }
  0x26   :  { %s50_s11 = sshll.u32 %s6297_s10, 4  ;;  %s66_s13 = sshll.u32 %s6298_s12, 4  ;;  %s51_s11 = int_to_ptr.vmem [resolvable:$true] %s50_s11  ;;  %s6390_s13 = int_to_ptr.vmem [resolvable:$true] %s66_s13 }
  0x27   :  { %s6217_s18 = scalar_lea.hbm %s7420_s4, 512 }
  0x28   :  { %p6218_p2 = scmp.ne.s32.totalorder %s7420_s4, %s6217_s18  ;;  %p6221_p3 = scmp.lt.u32.totalorder %s6217_s18, %s7420_s4 }
  0x2a   :  { %p6223_p4 = pnand %p6221_p3, %p6218_p2 }
  0x2c   :  { %6226 = shalt.err (!%p6223_p4)
}
  0x2d   :  { %s6227_s0 = scalar_lea.vmem %s51_s11, 512  ;;  %p6232_p6 = scmp.lt.s32.totalorder %s51_s11, %s51_s11 }
  0x2e   :  { %p6228_p5 = scmp.ne.s32.totalorder %s51_s11, %s6227_s0  ;;  %p6233_p7 = scmp.lt.s32.totalorder %s6227_s0, %s6227_s0 }
  0x30   :  { %p6234_p8 = por %p6233_p7, %p6232_p6 }
  0x32   :  { %p6235_p9 = pnand %p6234_p8, %p6228_p5 }
  0x34   :  { %6238 = shalt.err (!%p6235_p9)
}
  0x35   :  { %56 = dma.hbm_to_vmem [thread:$0]  %s7420_s4, 512, %s51_s11, [#allocation6], %s6292_s15, %s6292_s15, %s6293_s16  }
  0x36   :  { %s6239_s27 = scalar_lea.hbm %s7423_s7, 512 }
  0x37   :  { %p6240_p10 = scmp.ne.s32.totalorder %s7423_s7, %s6239_s27  ;;  %p6243_p11 = scmp.lt.u32.totalorder %s6239_s27, %s7423_s7 }
  0x39   :  { %p6245_p12 = pnand %p6243_p11, %p6240_p10 }
  0x3b   :  { %6248 = shalt.err (!%p6245_p12)
}
  0x3c   :  { %s6249_s12 = scalar_lea.vmem %s6390_s13, 512  ;;  %p6254_p0 = scmp.lt.s32.totalorder %s6390_s13, %s6390_s13 }
  0x3d   :  { %p6250_p13 = scmp.ne.s32.totalorder %s6390_s13, %s6249_s12  ;;  %p6255_p1 = scmp.lt.s32.totalorder %s6249_s12, %s6249_s12 }
  0x3f   :  { %p6256_p2 = por %p6255_p1, %p6254_p0 }
  0x41   :  { %p6257_p3 = pnand %p6256_p2, %p6250_p13 }
  0x43   :  { %6260 = shalt.err (!%p6257_p3)
}
  0x44   :  { %72 = dma.hbm_to_vmem [thread:$0]  %s7423_s7, 512, %s6390_s13, [#allocation9], %s6295_s3, %s6295_s3, %s6296_s28  }
  0x45   :  { %6283 = dma.done.wait [#allocation3], 256  }
  0x46   :  { %6284 = vsyncadd [#allocation3], 4294967040 }
  0x47   :  { %6285 = dma.done.wait [#allocation6], 1536  }
  0x48   :  { %6286 = vsyncadd [#allocation6], 4294965760 }
  0x49   :  { %6287 = dma.done.wait [#allocation9], 512  }
  0x4a   :  { %6288 = vsyncadd [#allocation9], 4294966784  ;;  %v6299_v0 = vmov 0.0   ;;  %vm6300_vm0 = vmmov 0   ;;  %v5987_v1 = vld [vmem:[%s7418_s2] sm:$0xff]   ;;  %v5988_v2 = vld [vmem:[%s7418_s2 + $0x8] sm:$0xff]   ;;  %v94_v37 = vlaneseq }
  0x4b   :  { %5391 = vmatprep.subr.bf16.mxu0 %v6299_v0  ;;  %5395 = vmatprep.mubr.msk.bf16.mxu0 %vm6300_vm0, %v6299_v0  ;;  %v6439_v3 = vld [vmem:[#allocation2] sm:$0xff]  ;;  %v6441_v4 = vld [vmem:[#allocation2 + $0x8] sm:$0xff]  ;;  %vm122_vm1 = vcmask 261120   ;;  %v5054_v6 = vld [vmem:[#allocation8] ss:$0 sm:$0xff]  ;;  %s6301_s17 = smov 120  }
  0x4c   :  { %5399 = vmatprep.subr.bf16.mxu1 %v6299_v0  ;;  %5401 = vmatprep.mubr.msk.bf16.mxu1 %vm6300_vm0, %v6299_v0  ;;  %v104_v5 = vpack.c.bf16 %v6441_v4, %v6439_v3  ;;  %s6302_s18 = smov 96   ;;  %s6303_s19 = smov 80   ;;  %vm171_vm2 = vcmask 64512   ;;  %v95_v38 = vshrl.u32 %v94_v37, 7  ;;  %v97_v39 = vand.u32 127, %v94_v37 }
  0x4d   :  { %5392 = vmatpush3.bf16.msra.mxu0 %v5987_v1  ;;  %s6304_s21 = smov 88   ;;  %s6305_s22 = smov 72   ;;  %v6308_v40 = vmov -1e+30   ;;  %vm235_vm4 = vcmask 1043456   ;;  %vm622_vm5 = vcmask 130048  }
  0x4e   :  { %5393 = vmatprep.subr.bf16.mxu0 %v6299_v0  ;;  %s6306_s23 = smov 112   ;;  %s6307_s0 = smov 104   ;;  %vm98_vm3 = vcmp.le.s32.totalorder %v97_v39, %v95_v38  ;;  %vm624_vm6 = vcmask 195584   ;;  %vm2431_vm7 = vcmask 523264  }
  0x4f   :  { %v6524_v41 = vsel %vm98_vm3, 0.0, %v6308_v40  ;;  %s6309_s20 = smov 56   ;;  %s6310_s24 = smov 48  }
  0x50   :  { %s6311_s25 = smov 40   ;;  %s6312_s26 = smov 16  }
  0x51   :  { %5394 = vmatpush3.bf16.msra.mxu0 %v5988_v2  ;;  %s6313_s27 = smov 24  }
  0x52   :  { %5405 = vmatprep.subr.bf16.mxu0 %v6299_v0 }
  0x54   :  { %5396 = vmatmul.mubr.msk.bf16.vlgmr.msra.gmra.mrb[0].mxu0 %vm122_vm1, %v104_v5 }
  0x55   :  { %5407 = vmatprep.mubr.msk.bf16.mxu0 %vm6300_vm0, %v6299_v0 }
 0x127   :  { %v160_v7 = vpop.f32.mrb[0].mxu0 }
 0x128   :  { %v161_v8 = vadd.f32 %v5054_v6, %v160_v7  ;;  %v5397_v9 = vpop.f32.mrb[1].mxu0 }
 0x129   :  { %v163_v10 = vpop.f32.mrb[2].mxu0 }
 0x12a   :  { %v6450_v11 = vpack.c.bf16 %v161_v8, %v161_v8  ;;  %v5398_v12 = vpop.f32.mrb[3].mxu0  ;;  %v164_v13 = vadd.f32 %v5054_v6, %v163_v10 }
 0x12c   :  { %279 = vrot.lane.b32.xlu1 %v6450_v11, %s6301_s17  ;;  %169 = vrot.lane.b32.xlu0 %v6450_v11, %s6302_s18  ;;  %v6464_v14 = vpack.c.bf16 %v164_v13, %v164_v13 }
 0x130   :  { %391 = vrot.lane.b32.xlu1 %v6450_v11, %s6303_s19  ;;  %281 = vrot.lane.b32.xlu0 %v6450_v11, %s6304_s21 }
 0x134   :  { %501 = vrot.lane.b32.xlu1 %v6450_v11, %s6305_s22  ;;  %389 = vrot.lane.b32.xlu0 %v6450_v11, %s6306_s23 }
 0x138   :  { %499 = vrot.lane.b32.xlu0 %v6450_v11, %s6307_s0  ;;  %628 = vrot.lane.b32.xlu1 %v6464_v14, %s6302_s18 }
 0x13c   :  { %738 = vrot.lane.b32.xlu0 %v6464_v14, %s6304_s21  ;;  %736 = vrot.lane.b32.xlu1 %v6464_v14, %s6301_s17 }
 0x140   :  { %848 = vrot.lane.b32.xlu0 %v6464_v14, %s6303_s19  ;;  %846 = vrot.lane.b32.xlu1 %v6464_v14, %s6306_s23 }
 0x144   :  { %958 = vrot.lane.b32.xlu0 %v6464_v14, %s6305_s22  ;;  %956 = vrot.lane.b32.xlu1 %v6464_v14, %s6307_s0 }
 0x19e   :  { %v170_v15 = vpop.permute.xlu0 %169  ;;  %v280_v18 = vpop.permute.xlu1 %279 }
 0x19f   :  { %v176_v16 = vsel %vm171_vm2, %v170_v15, 0 }
 0x1a0   :  { %5400 = vmatpush3.bf16.xpose.msra.mxu1 %v176_v16 }
 0x1a1   :  { %5411 = vmatprep.subr.bf16.mxu1 %v6299_v0 }
 0x1a2   :  { %v282_v17 = vpop.permute.xlu0 %281  ;;  %v392_v20 = vpop.permute.xlu1 %391 }
 0x1a3   :  { %v287_v19 = vsel %vm171_vm2, %v282_v17, 0  ;;  %v397_v21 = vsel %vm171_vm2, %v392_v20, 0 }
 0x1a6   :  { %v502_v22 = vpop.permute.xlu1 %501  ;;  %v390_v23 = vpop.permute.xlu0 %389 }
 0x1a7   :  { %5402 = vmatmul.mubr.msk.bf16.vlgmr.msra.gmra.mrb[0].mxu1 %vm171_vm2, %v6450_v11  ;;  %v507_v24 = vsel %vm171_vm2, %v502_v22, 0 }
 0x1a8   :  { %5412 = vmatpush3.bf16.xpose.msra.mxu1 %v287_v19  ;;  %5413 = vmatprep.mubr.msk.bf16.mxu1 %vm6300_vm0, %v6299_v0 }
 0x1a9   :  { %5423 = vmatprep.subr.bf16.mxu1 %v6299_v0 }
 0x1aa   :  { %v629_v25 = vpop.permute.xlu1 %628  ;;  %v500_v26 = vpop.permute.xlu0 %499 }
 0x1ab   :  { %v634_v27 = vsel %vm171_vm2, %v629_v25, 0 }
 0x1ae   :  { %v739_v28 = vpop.permute.xlu0 %738  ;;  %v737_v31 = vpop.permute.xlu1 %736 }
 0x1af   :  { %5414 = vmatmul.mubr.msk.bf16.vlgmr.msra.gmra.mrb[4].mxu1 %vm171_vm2, %v280_v18  ;;  %v744_v29 = vsel %vm171_vm2, %v739_v28, 0 }
 0x1b0   :  { %5424 = vmatpush3.bf16.xpose.msra.mxu1 %v397_v21  ;;  %5425 = vmatprep.mubr.msk.bf16.mxu1 %vm6300_vm0, %v6299_v0 }
 0x1b1   :  { %5435 = vmatprep.subr.bf16.mxu1 %v6299_v0 }
 0x1b2   :  { %v849_v30 = vpop.permute.xlu0 %848  ;;  %v847_v34 = vpop.permute.xlu1 %846 }
 0x1b3   :  { %v854_v32 = vsel %vm171_vm2, %v849_v30, 0 }
 0x1b6   :  { %v959_v33 = vpop.permute.xlu0 %958  ;;  %v957_v36 = vpop.permute.xlu1 %956 }
 0x1b7   :  { %5426 = vmatmul.mubr.msk.bf16.vlgmr.msra.gmra.mrb[8].mxu1 %vm171_vm2, %v390_v23  ;;  %v964_v35 = vsel %vm171_vm2, %v959_v33, 0 }
 0x1b8   :  { %5436 = vmatpush3.bf16.xpose.msra.mxu1 %v507_v24  ;;  %5437 = vmatprep.mubr.msk.bf16.mxu1 %vm6300_vm0, %v6299_v0 }
 0x1b9   :  { %5447 = vmatprep.subr.bf16.mxu1 %v6299_v0 }
 0x1bf   :  { %5438 = vmatmul.mubr.msk.bf16.vlgmr.msra.gmra.mrb[12].mxu1 %vm171_vm2, %v500_v26 }
 0x1c0   :  { %5448 = vmatpush3.bf16.xpose.msra.mxu1 %v634_v27  ;;  %5449 = vmatprep.mubr.msk.bf16.mxu1 %vm6300_vm0, %v6299_v0 }
 0x1c1   :  { %5459 = vmatprep.subr.bf16.mxu1 %v6299_v0 }
 0x1c7   :  { %5450 = vmatmul.mubr.msk.bf16.vlgmr.msra.gmra.mrb[16].mxu1 %vm171_vm2, %v6464_v14 }
 0x1c8   :  { %5460 = vmatpush3.bf16.xpose.msra.mxu1 %v744_v29  ;;  %5461 = vmatprep.mubr.msk.bf16.mxu1 %vm6300_vm0, %v6299_v0 }
 0x1c9   :  { %5471 = vmatprep.subr.bf16.mxu1 %v6299_v0 }
 0x1cf   :  { %5462 = vmatmul.mubr.msk.bf16.vlgmr.msra.gmra.mrb[20].mxu1 %vm171_vm2, %v737_v31 }
 0x1d0   :  { %5472 = vmatpush3.bf16.xpose.msra.mxu1 %v854_v32  ;;  %5473 = vmatprep.mubr.msk.bf16.mxu1 %vm6300_vm0, %v6299_v0 }
 0x1d1   :  { %5483 = vmatprep.subr.bf16.mxu1 %v6299_v0 }
 0x1d7   :  { %5474 = vmatmul.mubr.msk.bf16.vlgmr.msra.gmra.mrb[24].mxu1 %vm171_vm2, %v847_v34 }
 0x1d8   :  { %5484 = vmatpush3.bf16.xpose.msra.mxu1 %v964_v35  ;;  %5485 = vmatprep.mubr.msk.bf16.mxu1 %vm6300_vm0, %v6299_v0 }
 0x1d9   :  { %5495 = vmatprep.subr.bf16.mxu1 %v6299_v0 }
 0x1df   :  { %5486 = vmatmul.mubr.msk.bf16.vlgmr.msra.gmra.mrb[28].mxu1 %vm171_vm2, %v957_v36 }
 0x1e0   :  { %5499 = vmatprep.mubr.msk.bf16.mxu1 %vm6300_vm0, %v6299_v0 }
 0x27a   :  { %v212_v42 = vpop.f32.mrb[0].mxu1 }
 0x27b   :  { %v213_v43 = vadd.f32 %v212_v42, %v6524_v41  ;;  %v5403_v44 = vpop.f32.mrb[1].mxu1 }
 0x27c   :  { %v215_v45 = vpop.f32.mrb[2].mxu1 }
 0x27d   :  { %v5404_v46 = vpop.f32.mrb[3].mxu1  ;;  %v218_v47 = vsel %vm171_vm2, %v213_v43, -inf }
 0x27e   :  { %219 = vmax.xlane.f32.xlu0 %v218_v47 }
 0x282   :  { %v323_v48 = vpop.f32.mrb[4].mxu1 }
 0x283   :  { %v324_v49 = vadd.f32 %v323_v48, %v6524_v41  ;;  %v5415_v50 = vpop.f32.mrb[5].mxu1 }
 0x284   :  { %v326_v51 = vpop.f32.mrb[6].mxu1 }
 0x285   :  { %v5416_v52 = vpop.f32.mrb[7].mxu1  ;;  %v329_v53 = vsel %vm171_vm2, %v324_v49, -inf }
 0x286   :  { %330 = vmax.xlane.f32.xlu1 %v329_v53 }
 0x28a   :  { %v433_v54 = vpop.f32.mrb[8].mxu1 }
 0x28b   :  { %v434_v55 = vadd.f32 %v433_v54, %v6524_v41  ;;  %v5427_v56 = vpop.f32.mrb[9].mxu1 }
 0x28c   :  { %v436_v57 = vpop.f32.mrb[10].mxu1 }
 0x28d   :  { %v5428_v58 = vpop.f32.mrb[11].mxu1  ;;  %v439_v59 = vsel %vm171_vm2, %v434_v55, -inf }
 0x28e   :  { %440 = vmax.xlane.f32.xlu0 %v439_v59 }
 0x292   :  { %v543_v60 = vpop.f32.mrb[12].mxu1 }
 0x293   :  { %v6533_v61 = vadd.f32 %v543_v60, %v6524_v41  ;;  %v5439_v62 = vpop.f32.mrb[13].mxu1 }
 0x294   :  { %v546_v63 = vpop.f32.mrb[14].mxu1 }
 0x295   :  { %v5440_v1 = vpop.f32.mrb[15].mxu1  ;;  %v549_v2 = vsel %vm171_vm2, %v6533_v61, -inf }
 0x296   :  { %550 = vmax.xlane.f32.xlu0 %v549_v2 }
 0x29a   :  { %v670_v5 = vpop.f32.mrb[16].mxu1 }
 0x29b   :  { %v6538_v6 = vadd.f32 %v670_v5, %v6524_v41  ;;  %v5451_v7 = vpop.f32.mrb[17].mxu1 }
 0x29c   :  { %v673_v8 = vpop.f32.mrb[18].mxu1 }
 0x29d   :  { %v5452_v9 = vpop.f32.mrb[19].mxu1  ;;  %v676_v10 = vsel %vm171_vm2, %v6538_v6, -inf }
 0x29e   :  { %677 = vmax.xlane.f32.xlu1 %v676_v10 }
 0x2a2   :  { %v780_v12 = vpop.f32.mrb[20].mxu1 }
 0x2a3   :  { %v6543_v13 = vadd.f32 %v780_v12, %v6524_v41  ;;  %v5463_v15 = vpop.f32.mrb[21].mxu1 }
 0x2a4   :  { %v783_v16 = vpop.f32.mrb[22].mxu1 }
 0x2a5   :  { %v5464_v17 = vpop.f32.mrb[23].mxu1  ;;  %v786_v18 = vsel %vm171_vm2, %v6543_v13, -inf }
 0x2a6   :  { %787 = vmax.xlane.f32.xlu0 %v786_v18 }
 0x2aa   :  { %v890_v19 = vpop.f32.mrb[24].mxu1 }
 0x2ab   :  { %v891_v20 = vadd.f32 %v890_v19, %v6524_v41  ;;  %v5475_v21 = vpop.f32.mrb[25].mxu1 }
 0x2ac   :  { %v893_v22 = vpop.f32.mrb[26].mxu1 }
 0x2ad   :  { %v5476_v23 = vpop.f32.mrb[27].mxu1  ;;  %v896_v24 = vsel %vm171_vm2, %v891_v20, -inf }
 0x2ae   :  { %897 = vmax.xlane.f32.xlu1 %v896_v24 }
 0x2b2   :  { %v1000_v25 = vpop.f32.mrb[28].mxu1 }
 0x2b3   :  { %v5487_v26 = vpop.f32.mrb[29].mxu1  ;;  %v6554_v29 = vadd.f32 %v1000_v25, %v6524_v41 }
 0x2b4   :  { %v1003_v27 = vpop.f32.mrb[30].mxu1 }
 0x2b5   :  { %v5488_v28 = vpop.f32.mrb[31].mxu1  ;;  %v1006_v30 = vsel %vm171_vm2, %v6554_v29, -inf }
 0x2bc   :  { %341 = vrot.lane.b32.xlu0 %v6450_v11, %s6309_s20 }
 0x2bf   :  { %230 = vrot.lane.b32.xlu1 %v6450_v11, %s6292_s15 }
 0x2db   :  { %1007 = vmax.xlane.f32.xlu0 %v1006_v30 }
 0x30b   :  { %v220_v31 = vpop.xlane.xlu0 %219 }
 0x30c   :  { %v221_v32 = vsub.f32 %v213_v43, %v220_v31 }
 0x30e   :  { %v222_v33 = vmul.f32 1.442695, %v221_v32 }
 0x310   :  { %6017 = vpow2.f32 %v222_v33 }
 0x313   :  { %v331_v34 = vpop.xlane.xlu1 %330 }
 0x314   :  { %v332_v35 = vsub.f32 %v324_v49, %v331_v34 }
 0x316   :  { %v333_v36 = vmul.f32 1.442695, %v332_v35 }
 0x318   :  { %6019 = vpow2.f32 %v333_v36 }
 0x31a   :  { %v6558_v37 = vpop.eup %6017 }
 0x31b   :  { %v441_v38 = vpop.xlane.xlu0 %440  ;;  %v224_v39 = vsel %vm171_vm2, %v6558_v37, 0.0 }
 0x31c   :  { %v442_v40 = vsub.f32 %v434_v55, %v441_v38  ;;  %225 = vadd.xlane.f32.xlu1 %v224_v39 }
 0x31e   :  { %v443_v42 = vmul.f32 1.442695, %v442_v40 }
 0x320   :  { %6021 = vpow2.f32 %v443_v42 }
 0x322   :  { %v6562_v44 = vpop.eup %6019 }
 0x323   :  { %v335_v43 = vsel %vm171_vm2, %v6562_v44, 0.0  ;;  %v551_v50 = vpop.xlane.xlu0 %550 }
 0x324   :  { %336 = vadd.xlane.f32.xlu0 %v335_v43  ;;  %v552_v52 = vsub.f32 %v6533_v61, %v551_v50 }
 0x326   :  { %v553_v53 = vmul.f32 1.442695, %v552_v52 }
 0x328   :  { %6023 = vpow2.f32 %v553_v53 }
 0x32a   :  { %v6566_v45 = vpop.eup %6021 }
 0x32b   :  { %v445_v46 = vsel %vm171_vm2, %v6566_v45, 0.0  ;;  %v678_v47 = vpop.xlane.xlu1 %677 }
 0x32c   :  { %446 = vadd.xlane.f32.xlu1 %v445_v46  ;;  %v679_v54 = vsub.f32 %v6538_v6, %v678_v47 }
 0x32e   :  { %v680_v57 = vmul.f32 1.442695, %v679_v54 }
 0x330   :  { %6025 = vpow2.f32 %v680_v57 }
 0x332   :  { %v6024_v60 = vpop.eup %6023 }
 0x333   :  { %v788_v55 = vpop.xlane.xlu0 %787  ;;  %v555_v62 = vsel %vm171_vm2, %v6024_v60, 0.0 }
 0x334   :  { %v789_v56 = vsub.f32 %v6543_v13, %v788_v55 }
 0x337   :  { %v342_v7 = vpop.permute.xlu0 %341 }
 0x33a   :  { %451 = vrot.lane.b32.xlu0 %v6450_v11, %s6310_s24  ;;  %v6580_v63 = vpop.eup %6025 }
 0x33b   :  { %v898_v48 = vpop.xlane.xlu1 %897  ;;  %v682_v1 = vsel %vm171_vm2, %v6580_v63, 0.0 }
 0x33c   :  { %v899_v58 = vsub.f32 %v891_v20, %v898_v48  ;;  %v347_v20 = vsel %vm235_vm4, %v342_v7, 0 }
 0x33d   :  { %561 = vrot.lane.b32.xlu1 %v6450_v11, %s6311_s25  ;;  %v790_v11 = vmul.f32 1.442695, %v789_v56 }
 0x33e   :  { %v900_v59 = vmul.f32 1.442695, %v899_v58 }
 0x33f   :  { %v231_v49 = vpop.permute.xlu1 %230  ;;  %6027 = vpow2.f32 %v790_v11 }
 0x340   :  { %v237_v51 = vsel %vm235_vm4, %v231_v49, 0  ;;  %6029 = vpow2.f32 %v900_v59 }
 0x341   :  { %5406 = vmatpush3.bf16.msra.mxu0 %v237_v51 }
 0x342   :  { %5417 = vmatprep.subr.bf16.mxu0 %v6299_v0 }
 0x349   :  { %v6582_v61 = vpop.eup %6027 }
 0x34a   :  { %v6586_v2 = vpop.eup %6029  ;;  %v792_v5 = vsel %vm171_vm2, %v6582_v61, 0.0 }
 0x34b   :  { %v902_v6 = vsel %vm171_vm2, %v6586_v2, 0.0 }
 0x359   :  { %556 = vadd.xlane.f32.xlu0 %v555_v62 }
 0x35d   :  { %683 = vadd.xlane.f32.xlu0 %v682_v1 }
 0x361   :  { %793 = vadd.xlane.f32.xlu1 %v792_v5  ;;  %903 = vadd.xlane.f32.xlu0 %v902_v6 }
 0x368   :  { %v1008_v8 = vpop.xlane.xlu0 %1007 }
 0x369   :  { %v1009_v9 = vsub.f32 %v6554_v29, %v1008_v8 }
 0x36b   :  { %v1010_v10 = vmul.f32 1.442695, %v1009_v9 }
 0x36d   :  { %6031 = vpow2.f32 %v1010_v10 }
 0x372   :  { %798 = vrot.lane.b32.xlu1 %v6464_v14, %s6309_s20 }
 0x376   :  { %908 = vrot.lane.b32.xlu1 %v6464_v14, %s6310_s24 }
 0x377   :  { %v6597_v12 = vpop.eup %6031 }
 0x378   :  { %v1012_v13 = vsel %vm171_vm2, %v6597_v12, 0.0 }
 0x379   :  { %1013 = vadd.xlane.f32.xlu0 %v1012_v13 }
 0x37a   :  { %1018 = vrot.lane.b32.xlu1 %v6464_v14, %s6311_s25 }
 0x38f   :  { %688 = vrot.lane.b32.xlu0 %v6464_v14, %s6292_s15 }
 0x3a9   :  { %v226_v15 = vpop.xlane.xlu1 %225 }
 0x3aa   :  { %6033 = vrcp.f32 %v226_v15 }
 0x3b1   :  { %v337_v16 = vpop.xlane.xlu0 %336 }
 0x3b2   :  { %6035 = vrcp.f32 %v337_v16 }
 0x3b4   :  { %v6034_v17 = vpop.eup %6033 }
 0x3b5   :  { %v228_v18 = vmul.f32 %v6034_v17, %v6558_v37  ;;  %v452_v23 = vpop.permute.xlu0 %451 }
 0x3b6   :  { %v457_v25 = vsel %vm235_vm4, %v452_v23, 0 }
 0x3b7   :  { %v229_v19 = vpack.c.bf16 %v228_v18, %v228_v18 }
 0x3b9   :  { %5408 = vmatmul.mubr.msk.bf16.vlgmr.msra.gmra.mrb[4].mxu0 %vm171_vm2, %v229_v19  ;;  %v447_v21 = vpop.xlane.xlu1 %446 }
 0x3ba   :  { %5418 = vmatpush3.bf16.msra.mxu0 %v347_v20  ;;  %6037 = vrcp.f32 %v447_v21  ;;  %5419 = vmatprep.mubr.msk.bf16.mxu0 %vm6300_vm0, %v6299_v0  ;;  %v5989_v21 = vld [vmem:[#allocation5] sm:$0xff]  }
 0x3bb   :  { %5429 = vmatprep.subr.bf16.mxu0 %v6299_v0  ;;  %5496 = vmatpush3.bf16.msra.mxu1 %v5989_v21 }
 0x3bc   :  { %v6036_v14 = vpop.eup %6035  ;;  %5497 = vmatprep.subr.bf16.mxu1 %v6299_v0 }
 0x3bd   :  { %v339_v22 = vmul.f32 %v6036_v14, %v6562_v44  ;;  %v562_v28 = vpop.permute.xlu1 %561 }
 0x3be   :  { %v567_v30 = vsel %vm235_vm4, %v562_v28, 0 }
 0x3bf   :  { %v340_v24 = vpack.c.bf16 %v339_v22, %v339_v22 }
 0x3c1   :  { %5420 = vmatmul.mubr.msk.bf16.vlgmr.msra.gmra.mrb[8].mxu0 %vm171_vm2, %v340_v24 }
 0x3c2   :  { %5430 = vmatpush3.bf16.msra.mxu0 %v457_v25  ;;  %5431 = vmatprep.mubr.msk.bf16.mxu0 %vm6300_vm0, %v6299_v0  ;;  %v5990_v25 = vld [vmem:[#allocation5 + $0x8] sm:$0xff]  }
 0x3c3   :  { %5441 = vmatprep.subr.bf16.mxu0 %v6299_v0  ;;  %5498 = vmatpush3.bf16.msra.mxu1 %v5990_v25  ;;  %v90_v25 = vld [vmem:[%s7417_s1 + $0x10] sm:$0xff] }
 0x3c4   :  { %v6038_v26 = vpop.eup %6037 }
 0x3c5   :  { %v449_v27 = vmul.f32 %v6038_v26, %v6566_v45 }
 0x3c7   :  { %v450_v29 = vpack.c.bf16 %v449_v27, %v449_v27 }
 0x3c9   :  { %5432 = vmatmul.mubr.msk.bf16.vlgmr.msra.gmra.mrb[12].mxu0 %vm171_vm2, %v450_v29 }
 0x3ca   :  { %5442 = vmatpush3.bf16.msra.mxu0 %v567_v30  ;;  %5443 = vmatprep.mubr.msk.bf16.mxu0 %vm6300_vm0, %v6299_v0 }
 0x3cb   :  { %5453 = vmatprep.subr.bf16.mxu0 %v6299_v0 }
 0x3e6   :  { %v557_v31 = vpop.xlane.xlu0 %556 }
 0x3e7   :  { %6039 = vrcp.f32 %v557_v31 }
 0x3ea   :  { %v684_v35 = vpop.xlane.xlu0 %683 }
 0x3eb   :  { %6041 = vrcp.f32 %v684_v35 }
 0x3ee   :  { %v794_v36 = vpop.xlane.xlu1 %793  ;;  %v904_v37 = vpop.xlane.xlu0 %903 }
 0x3ef   :  { %6043 = vrcp.f32 %v794_v36 }
 0x3f0   :  { %6045 = vrcp.f32 %v904_v37 }
 0x3f1   :  { %v6040_v32 = vpop.eup %6039 }
 0x3f2   :  { %v559_v33 = vmul.f32 %v6040_v32, %v6024_v60  ;;  %v799_v43 = vpop.permute.xlu1 %798 }
 0x3f3   :  { %v804_v47 = vsel %vm235_vm4, %v799_v43, 0 }
 0x3f4   :  { %v560_v34 = vpack.c.bf16 %v559_v33, %v559_v33 }
 0x3f5   :  { %v6042_v38 = vpop.eup %6041 }
 0x3f6   :  { %5444 = vmatmul.mubr.msk.bf16.vlgmr.msra.gmra.mrb[16].mxu0 %vm171_vm2, %v560_v34  ;;  %v686_v40 = vmul.f32 %v6042_v38, %v6580_v63  ;;  %v909_v49 = vpop.permute.xlu1 %908 }
 0x3f7   :  { %5455 = vmatprep.mubr.msk.bf16.mxu0 %vm6300_vm0, %v6299_v0  ;;  %v914_v52 = vsel %vm235_vm4, %v909_v49, 0 }
 0x3f8   :  { %v687_v45 = vpack.c.bf16 %v686_v40, %v686_v40 }
 0x3f9   :  { %v6044_v46 = vpop.eup %6043 }
 0x3fa   :  { %v796_v48 = vmul.f32 %v6044_v46, %v6582_v61  ;;  %v6046_v51 = vpop.eup %6045  ;;  %v1019_v54 = vpop.permute.xlu1 %1018 }
 0x3fb   :  { %v906_v53 = vmul.f32 %v6046_v51, %v6586_v2  ;;  %v1024_v57 = vsel %vm235_vm4, %v1019_v54, 0 }
 0x3fc   :  { %v797_v50 = vpack.c.bf16 %v796_v48, %v796_v48 }
 0x3fd   :  { %v907_v55 = vpack.c.bf16 %v906_v53, %v906_v53  ;;  %v5074_v53 = vld [vmem:[#allocation8 + $0x3] ss:$0 sm:$0xff] }
 0x406   :  { %v1014_v39 = vpop.xlane.xlu0 %1013 }
 0x407   :  { %6047 = vrcp.f32 %v1014_v39 }
 0x40a   :  { %v689_v42 = vpop.permute.xlu0 %688 }
 0x40b   :  { %v694_v44 = vsel %vm235_vm4, %v689_v42, 0 }
 0x40c   :  { %5454 = vmatpush3.bf16.msra.mxu0 %v694_v44 }
 0x40d   :  { %5465 = vmatprep.subr.bf16.mxu0 %v6299_v0 }
 0x40f   :  { %5456 = vmatmul.mubr.msk.bf16.vlgmr.msra.gmra.mrb[20].mxu0 %vm171_vm2, %v687_v45 }
 0x410   :  { %5466 = vmatpush3.bf16.msra.mxu0 %v804_v47  ;;  %5467 = vmatprep.mubr.msk.bf16.mxu0 %vm6300_vm0, %v6299_v0 }
 0x411   :  { %5477 = vmatprep.subr.bf16.mxu0 %v6299_v0  ;;  %v6048_v56 = vpop.eup %6047 }
 0x412   :  { %v1016_v58 = vmul.f32 %v6048_v56, %v6597_v12 }
 0x414   :  { %v1017_v11 = vpack.c.bf16 %v1016_v58, %v1016_v58 }
 0x417   :  { %5468 = vmatmul.mubr.msk.bf16.vlgmr.msra.gmra.mrb[24].mxu0 %vm171_vm2, %v797_v50 }
 0x418   :  { %5478 = vmatpush3.bf16.msra.mxu0 %v914_v52  ;;  %5479 = vmatprep.mubr.msk.bf16.mxu0 %vm6300_vm0, %v6299_v0 }
 0x419   :  { %5489 = vmatprep.subr.bf16.mxu0 %v6299_v0 }
 0x41f   :  { %5480 = vmatmul.mubr.msk.bf16.vlgmr.msra.gmra.mrb[28].mxu0 %vm171_vm2, %v907_v55 }
 0x420   :  { %5490 = vmatpush3.bf16.msra.mxu0 %v1024_v57  ;;  %5491 = vmatprep.mubr.msk.bf16.mxu0 %vm6300_vm0, %v6299_v0 }
 0x421   :  { %5503 = vmatprep.subr.bf16.mxu0 %v6299_v0 }
 0x427   :  { %5492 = vmatmul.mubr.msk.bf16.vlgmr.msra.gmra.mrb[32].mxu0 %vm171_vm2, %v1017_v11 }
 0x428   :  { %5507 = vmatprep.mubr.msk.bf16.mxu0 %vm6300_vm0, %v6299_v0 }
 0x48c   :  { %v273_v59 = vpop.f32.mrb[4].mxu0 }
 0x48d   :  { %v5409_v60 = vpop.f32.mrb[5].mxu0 }
 0x48e   :  { %v276_v62 = vpop.f32.mrb[6].mxu0 }
 0x48f   :  { %v5410_v63 = vpop.f32.mrb[7].mxu0 }
 0x494   :  { %v383_v61 = vpop.f32.mrb[8].mxu0 }
 0x495   :  { %v5421_v1 = vpop.f32.mrb[9].mxu0 }
 0x496   :  { %v386_v2 = vpop.f32.mrb[10].mxu0  ;;  %v5992_v1 = vld [vmem:[%s7418_s2 + $0x18] sm:$0xff]  }
 0x497   :  { %v5422_v5 = vpop.f32.mrb[11].mxu0 }
 0x49c   :  { %v493_v6 = vpop.f32.mrb[12].mxu0 }
 0x49d   :  { %v5433_v7 = vpop.f32.mrb[13].mxu0 }
 0x49e   :  { %v496_v8 = vpop.f32.mrb[14].mxu0 }
 0x49f   :  { %v5434_v9 = vpop.f32.mrb[15].mxu0 }
 0x4c9   :  { %v603_v10 = vpop.f32.mrb[16].mxu0 }
 0x4ca   :  { %v5445_v12 = vpop.f32.mrb[17].mxu0 }
 0x4cb   :  { %v606_v13 = vpop.f32.mrb[18].mxu0 }
 0x4cc   :  { %v5446_v15 = vpop.f32.mrb[19].mxu0  ;;  %v88_v13 = vld [vmem:[%s7417_s1] sm:$0xff] }
 0x4cd   :  { %v89_v15 = vld [vmem:[%s7417_s1 + $0x8] sm:$0xff] }
 0x4e2   :  { %v730_v16 = vpop.f32.mrb[20].mxu0 }
 0x4e3   :  { %v5457_v17 = vpop.f32.mrb[21].mxu0 }
 0x4e4   :  { %v733_v18 = vpop.f32.mrb[22].mxu0  ;;  %v6687_v17 = vld [vmem:[#allocation8 + $0x1] ss:$0 sm:$0xff] }
 0x4e5   :  { %v5458_v19 = vpop.f32.mrb[23].mxu0 }
 0x4ea   :  { %v840_v20 = vpop.f32.mrb[24].mxu0 }
 0x4eb   :  { %v5927_v14 = vpack.i.bf16 %v840_v20, %v383_v61  ;;  %v5469_v22 = vpop.f32.mrb[25].mxu0  ;;  %v5991_v61 = vld [vmem:[%s7418_s2 + $0x10] sm:$0xff]  }
 0x4ec   :  { %v843_v23 = vpop.f32.mrb[26].mxu0  ;;  %5504 = vmatpush3.bf16.msra.mxu0 %v5991_v61 }
 0x4ed   :  { %5928 = vrot.lane.b32.xlu1 %v5927_v14, %s6296_s28  ;;  %v5470_v24 = vpop.f32.mrb[27].mxu0  ;;  %5505 = vmatprep.subr.bf16.mxu0 %v6299_v0 }
 0x4f0   :  { %5506 = vmatpush3.bf16.msra.mxu0 %v5992_v1 }
 0x4f1   :  { %5519 = vmatprep.subr.bf16.mxu0 %v6299_v0 }
 0x4f2   :  { %v950_v26 = vpop.f32.mrb[28].mxu0 }
 0x4f3   :  { %v5932_v27 = vpack.i.bf16 %v950_v26, %v493_v6  ;;  %v5481_v28 = vpop.f32.mrb[29].mxu0  ;;  %v91_v26 = vld [vmem:[%s7417_s1 + $0x18] sm:$0xff] }
 0x4f4   :  { %v953_v29 = vpop.f32.mrb[30].mxu0 }
 0x4f5   :  { %5933 = vrot.lane.b32.xlu1 %v5932_v27, %s6312_s26  ;;  %v5482_v30 = vpop.f32.mrb[31].mxu0  ;;  %v6697_v27 = vpack.c.bf16 %v91_v26, %v90_v25  ;;  %v5078_v29 = vld [vmem:[#allocation8 + $0x6] ss:$0 sm:$0xff] }
 0x4fa   :  { %v1060_v31 = vpop.f32.mrb[32].mxu0 }
 0x4fb   :  { %v5937_v32 = vpack.i.bf16 %v1060_v31, %v603_v10  ;;  %v5493_v33 = vpop.f32.mrb[33].mxu0 }
 0x4fc   :  { %v1063_v34 = vpop.f32.mrb[34].mxu0 }
 0x4fd   :  { %5938 = vrot.lane.b32.xlu0 %v5937_v32, %s6313_s27  ;;  %v5494_v35 = vpop.f32.mrb[35].mxu0  ;;  %v5079_v34 = vld [vmem:[#allocation8 + $0x7] ss:$0 sm:$0xff] }
 0x55f   :  { %v5929_v36 = vpop.permute.xlu1 %5928 }
 0x560   :  { %v5931_v38 = vunpack.i.h.bf16 %v5929_v36  ;;  %v5930_v39 = vunpack.i.l.bf16 %v5929_v36 }
 0x562   :  { %v1078_v43 = vsel %vm171_vm2, %v730_v16, %v5931_v38  ;;  %v621_v45 = vsel %vm171_vm2, %v273_v59, %v5930_v39  ;;  %v6683_v16 = vpack.c.bf16 %v89_v15, %v88_v13 }
 0x567   :  { %v5934_v37 = vpop.permute.xlu1 %5933 }
 0x568   :  { %v5936_v40 = vunpack.i.h.bf16 %v5934_v37  ;;  %v5935_v42 = vunpack.i.l.bf16 %v5934_v37 }
 0x56a   :  { %v1079_v48 = vsel %vm622_vm5, %v1078_v43, %v5936_v40  ;;  %v623_v49 = vsel %vm622_vm5, %v621_v45, %v5935_v42 }
 0x56f   :  { %v5939_v44 = vpop.permute.xlu0 %5938 }
 0x570   :  { %v5941_v46 = vunpack.i.h.bf16 %v5939_v44  ;;  %v5940_v47 = vunpack.i.l.bf16 %v5939_v44 }
 0x572   :  { %v1080_v50 = vsel %vm624_vm6, %v1079_v48, %v5941_v46  ;;  %v625_v51 = vsel %vm624_vm6, %v623_v49, %v5940_v47 }
 0x573   :  { %v1081_v52 = vpack.c.bf16 %v1080_v50, %v625_v51 }
 0x575   :  { %5500 = vmatmul.mubr.msk.bf16.vlgmr.msra.gmra.mrb[32].mxu1 %vm122_vm1, %v1081_v52 }
 0x576   :  { %5515 = vmatprep.mubr.msk.bf16.mxu1 %vm122_vm1, %v6683_v16 }
 0x648   :  { %v1140_v54 = vpop.f32.mrb[32].mxu1 }
 0x649   :  { %v1141_v55 = vadd.f32 %v5074_v53, %v1140_v54  ;;  %v5501_v56 = vpop.f32.mrb[33].mxu1 }
 0x64a   :  { %v1143_v57 = vpop.f32.mrb[34].mxu1 }
 0x64b   :  { %v1144_v58 = vadd.f32 %v5074_v53, %v1143_v57  ;;  %v5502_v11 = vpop.f32.mrb[35].mxu1  ;;  %v1147_v59 = vadd.f32 %v1141_v55, %v6439_v3 }
 0x64d   :  { %v1151_v60 = vsel %vm122_vm1, %v1147_v59, 0.0  ;;  %v1148_v62 = vadd.f32 %v1144_v58, %v6441_v4 }
 0x64e   :  { %1152 = vadd.xlane.f32.xlu1 %v1151_v60 }
 0x64f   :  { %v1154_v63 = vsel %vm122_vm1, %v1148_v62, 0.0 }
 0x650   :  { %1155 = vadd.xlane.f32.xlu0 %v1154_v63 }
 0x6db   :  { %v1153_v3 = vpop.xlane.xlu1 %1152 }
 0x6dc   :  { %v1158_v4 = vmul.f32 0.03125, %v1153_v3 }
 0x6dd   :  { %v1156_v2 = vpop.xlane.xlu0 %1155 }
 0x6de   :  { %v1160_v5 = vsub.f32 %v1147_v59, %v1158_v4  ;;  %v1159_v6 = vmul.f32 0.03125, %v1156_v2 }
 0x6e0   :  { %v1161_v7 = vsub.f32 %v1148_v62, %v1159_v6  ;;  %v1162_v8 = vmul.f32 %v1160_v5, %v1160_v5 }
 0x6e2   :  { %v1164_v9 = vsel %vm122_vm1, %v1162_v8, 0.0  ;;  %v1163_v10 = vmul.f32 %v1161_v7, %v1161_v7 }
 0x6e3   :  { %1165 = vadd.xlane.f32.xlu0 %v1164_v9 }
 0x6e4   :  { %v1167_v12 = vsel %vm122_vm1, %v1163_v10, 0.0 }
 0x6e5   :  { %1168 = vadd.xlane.f32.xlu1 %v1167_v12 }
 0x6f6   :  { %1259 = vrot.lane.b32.xlu1 %v5992_v1, %s6302_s18 }
 0x6f9   :  { %1257 = vrot.lane.b32.xlu0 %v5991_v61, %s6302_s18 }
 0x6fa   :  { %1264 = vrot.lane.b32.xlu1 %v6687_v17, %s6302_s18 }
 0x770   :  { %v1166_v18 = vpop.xlane.xlu0 %1165 }
 0x771   :  { %v1170_v19 = vmul.f32 0.03125, %v1166_v18 }
 0x772   :  { %v1169_v20 = vpop.xlane.xlu1 %1168 }
 0x773   :  { %v1172_v21 = vadd.f32 1e-05, %v1170_v19  ;;  %v1171_v14 = vmul.f32 0.03125, %v1169_v20 }
 0x774   :  { %v1258_v22 = vpop.permute.xlu0 %1257 }
 0x775   :  { %6049 = vrsqrt.f32 %v1172_v21  ;;  %v1173_v23 = vadd.f32 1e-05, %v1171_v14  ;;  %5511 = vmatprep.subr.bf16.mxu1 %v1258_v22 }
 0x776   :  { %5512 = vmatpush3.bf16.msra.mxu1 %v1258_v22  ;;  %v1260_v24 = vpop.permute.xlu1 %1259 }
 0x777   :  { %6051 = vrsqrt.f32 %v1173_v23  ;;  %5513 = vmatprep.subr.bf16.mxu1 %v1260_v24 }
 0x77a   :  { %5514 = vmatpush3.bf16.msra.mxu1 %v1260_v24  ;;  %v1265_v39 = vpop.permute.xlu1 %1264 }
 0x77b   :  { %5525 = vmatprep.subr.bf16.mxu1 %v6299_v0 }
 0x77d   :  { %5516 = vmatmul.mubr.msk.bf16.vlgmr.msra.gmra.mrb[36].mxu1 %vm122_vm1, %v6697_v27 }
 0x77e   :  { %5527 = vmatprep.mubr.msk.bf16.mxu1 %vm6300_vm0, %v6299_v0 }
 0x77f   :  { %v6050_v28 = vpop.eup %6049 }
 0x780   :  { %v1176_v30 = vmul.f32 %v6050_v28, %v1160_v5 }
 0x781   :  { %v6052_v31 = vpop.eup %6051 }
 0x782   :  { %v1182_v32 = vmul.f32 %v5078_v29, %v1176_v30  ;;  %v1177_v33 = vmul.f32 %v6052_v31, %v1161_v7 }
 0x784   :  { %v1183_v35 = vmul.f32 %v5078_v29, %v1177_v33  ;;  %v6704_v36 = vadd.f32 %v5079_v34, %v1182_v32 }
 0x786   :  { %v6706_v37 = vadd.f32 %v5079_v34, %v1183_v35 }
 0x788   :  { %v1195_v38 = vpack.c.bf16 %v6706_v37, %v6704_v36 }
 0x78a   :  { %5508 = vmatmul.mubr.msk.bf16.vlgmr.msra.gmra.mrb[36].mxu0 %vm122_vm1, %v1195_v38 }
 0x78b   :  { %5521 = vmatprep.mubr.msk.bf16.mxu0 %vm6300_vm0, %v6299_v0 }
 0x850   :  { %v5517_v40 = vpop.f32.mrb[36].mxu1 }
 0x851   :  { %v1307_v42 = vpop.f32.mrb[37].mxu1  ;;  %v1316_v44 = vadd.f32 %v5517_v40, %v1265_v39 }
 0x852   :  { %v5518_v43 = vpop.f32.mrb[38].mxu1  ;;  %v1308_v45 = vadd.f32 %v1307_v42, %v1265_v39 }
 0x853   :  { %v1319_v46 = vadd.f32 %v5518_v43, %v1265_v39  ;;  %v1310_v47 = vpop.f32.mrb[39].mxu1 }
 0x854   :  { %v1311_v48 = vadd.f32 %v1310_v47, %v1265_v39 }
 0x855   :  { %v6713_v49 = vpack.c.bf16 %v1319_v46, %v1316_v44 }
 0x856   :  { %v6715_v50 = vpack.c.bf16 %v1311_v48, %v1308_v45 }
 0x857   :  { %v1775_v5 = vsel %vm171_vm2, %v6713_v49, 0 }
 0x858   :  { %1432 = vrot.lane.b32.xlu0 %v6715_v50, %s6301_s17  ;;  %v1328_v51 = vsel %vm171_vm2, %v6715_v50, 0 }
 0x859   :  { %5520 = vmatpush3.bf16.xpose.msra.mxu0 %v1328_v51 }
 0x85a   :  { %5531 = vmatprep.subr.bf16.mxu0 %v6299_v0 }
 0x85c   :  { %1540 = vrot.lane.b32.xlu0 %v6715_v50, %s6306_s23 }
 0x85d   :  { %v1250_v52 = vpop.f32.mrb[36].mxu0 }
 0x85e   :  { %v1251_v53 = vadd.f32 %v6687_v17, %v1250_v52  ;;  %v5509_v54 = vpop.f32.mrb[37].mxu0 }
 0x85f   :  { %v1253_v55 = vpop.f32.mrb[38].mxu0 }
 0x860   :  { %v1322_v56 = vpack.c.bf16 %v1251_v53, %v1251_v53  ;;  %1648 = vrot.lane.b32.xlu0 %v6715_v50, %s6307_s0  ;;  %v5510_v57 = vpop.f32.mrb[39].mxu0  ;;  %v1254_v58 = vadd.f32 %v6687_v17, %v1253_v55 }
 0x862   :  { %1430 = vrot.lane.b32.xlu1 %v1322_v56, %s6301_s17  ;;  %5522 = vmatmul.mubr.msk.bf16.vlgmr.msra.gmra.mrb[40].mxu0 %vm171_vm2, %v1322_v56  ;;  %v1769_v11 = vpack.c.bf16 %v1254_v58, %v1254_v58 }
 0x863   :  { %5533 = vmatprep.mubr.msk.bf16.mxu0 %vm6300_vm0, %v6299_v0 }
 0x864   :  { %1879 = vrot.lane.b32.xlu0 %v6713_v49, %s6301_s17 }
 0x866   :  { %1538 = vrot.lane.b32.xlu1 %v1322_v56, %s6306_s23 }
 0x868   :  { %1987 = vrot.lane.b32.xlu0 %v6713_v49, %s6306_s23 }
 0x86a   :  { %1646 = vrot.lane.b32.xlu1 %v1322_v56, %s6307_s0 }
 0x86c   :  { %2095 = vrot.lane.b32.xlu0 %v6713_v49, %s6307_s0 }
 0x86e   :  { %1877 = vrot.lane.b32.xlu1 %v1769_v11, %s6301_s17 }
 0x872   :  { %1985 = vrot.lane.b32.xlu1 %v1769_v11, %s6306_s23 }
 0x876   :  { %2093 = vrot.lane.b32.xlu1 %v1769_v11, %s6307_s0 }
 0x8ca   :  { %v1433_v59 = vpop.permute.xlu0 %1432 }
 0x8cb   :  { %v1438_v60 = vsel %vm171_vm2, %v1433_v59, 0 }
 0x8cc   :  { %5532 = vmatpush3.bf16.xpose.msra.mxu0 %v1438_v60 }
 0x8cd   :  { %5543 = vmatprep.subr.bf16.mxu0 %v6299_v0 }
 0x8ce   :  { %v1541_v62 = vpop.permute.xlu0 %1540 }
 0x8cf   :  { %v1546_v61 = vsel %vm171_vm2, %v1541_v62, 0 }
 0x8d2   :  { %v1649_v1 = vpop.permute.xlu0 %1648 }
 0x8d3   :  { %v1654_v4 = vsel %vm171_vm2, %v1649_v1, 0 }
 0x8d4   :  { %v1431_v63 = vpop.permute.xlu1 %1430 }
 0x8d5   :  { %5534 = vmatmul.mubr.msk.bf16.vlgmr.msra.gmra.mrb[44].mxu0 %vm171_vm2, %v1431_v63 }
 0x8d6   :  { %5544 = vmatpush3.bf16.xpose.msra.mxu0 %v1546_v61  ;;  %5545 = vmatprep.mubr.msk.bf16.mxu0 %vm6300_vm0, %v6299_v0  ;;  %v1880_v6 = vpop.permute.xlu0 %1879 }
 0x8d7   :  { %5555 = vmatprep.subr.bf16.mxu0 %v6299_v0  ;;  %v1885_v7 = vsel %vm171_vm2, %v1880_v6, 0 }
 0x8d8   :  { %v1539_v3 = vpop.permute.xlu1 %1538 }
 0x8da   :  { %v1988_v8 = vpop.permute.xlu0 %1987 }
 0x8db   :  { %v1993_v10 = vsel %vm171_vm2, %v1988_v8, 0 }
 0x8dc   :  { %v1647_v2 = vpop.permute.xlu1 %1646 }
 0x8dd   :  { %5546 = vmatmul.mubr.msk.bf16.vlgmr.msra.gmra.mrb[48].mxu0 %vm171_vm2, %v1539_v3 }
 0x8de   :  { %5556 = vmatpush3.bf16.xpose.msra.mxu0 %v1654_v4  ;;  %5557 = vmatprep.mubr.msk.bf16.mxu0 %vm6300_vm0, %v6299_v0  ;;  %v2096_v12 = vpop.permute.xlu0 %2095 }
 0x8df   :  { %5567 = vmatprep.subr.bf16.mxu0 %v6299_v0  ;;  %v2101_v15 = vsel %vm171_vm2, %v2096_v12, 0 }
 0x8e0   :  { %v1878_v9 = vpop.permute.xlu1 %1877 }
 0x8e4   :  { %v1986_v13 = vpop.permute.xlu1 %1985 }
 0x8e5   :  { %5558 = vmatmul.mubr.msk.bf16.vlgmr.msra.gmra.mrb[52].mxu0 %vm171_vm2, %v1647_v2 }
 0x8e6   :  { %5568 = vmatpush3.bf16.xpose.msra.mxu0 %v1775_v5  ;;  %5569 = vmatprep.mubr.msk.bf16.mxu0 %vm6300_vm0, %v6299_v0 }
 0x8e7   :  { %5579 = vmatprep.subr.bf16.mxu0 %v6299_v0 }
 0x8e8   :  { %v2094_v17 = vpop.permute.xlu1 %2093 }
 0x8ed   :  { %5570 = vmatmul.mubr.msk.bf16.vlgmr.msra.gmra.mrb[56].mxu0 %vm171_vm2, %v1769_v11 }
 0x8ee   :  { %5580 = vmatpush3.bf16.xpose.msra.mxu0 %v1885_v7  ;;  %5581 = vmatprep.mubr.msk.bf16.mxu0 %vm6300_vm0, %v6299_v0 }
 0x8ef   :  { %5591 = vmatprep.subr.bf16.mxu0 %v6299_v0 }
 0x8f5   :  { %5582 = vmatmul.mubr.msk.bf16.vlgmr.msra.gmra.mrb[60].mxu0 %vm171_vm2, %v1878_v9 }
 0x8f6   :  { %5592 = vmatpush3.bf16.xpose.msra.mxu0 %v1993_v10  ;;  %5593 = vmatprep.mubr.msk.bf16.mxu0 %vm6300_vm0, %v6299_v0 }
 0x8f7   :  { %5603 = vmatprep.subr.bf16.mxu0 %v6299_v0 }
 0x8fd   :  { %5594 = vmatmul.mubr.msk.bf16.vlgmr.msra.gmra.mrb[64].mxu0 %vm171_vm2, %v1986_v13 }
 0x8fe   :  { %5604 = vmatpush3.bf16.xpose.msra.mxu0 %v2101_v15  ;;  %5605 = vmatprep.mubr.msk.bf16.mxu0 %vm6300_vm0, %v6299_v0 }
 0x8ff   :  { %5615 = vmatprep.subr.bf16.mxu0 %v6299_v0 }
 0x905   :  { %5606 = vmatmul.mubr.msk.bf16.vlgmr.msra.gmra.mrb[68].mxu0 %vm171_vm2, %v2094_v17 }
 0x906   :  { %5619 = vmatprep.mubr.msk.bf16.mxu0 %vm6300_vm0, %v6299_v0 }
 0x935   :  { %v1364_v18 = vpop.f32.mrb[40].mxu0 }
 0x936   :  { %v5523_v19 = vpop.f32.mrb[41].mxu0  ;;  %v1370_v20 = vsel %vm622_vm5, %v1364_v18, -inf }
 0x937   :  { %1371 = vmax.xlane.f32.xlu0 %v1370_v20  ;;  %v1367_v21 = vpop.f32.mrb[42].mxu0 }
 0x938   :  { %v5524_v14 = vpop.f32.mrb[43].mxu0 }
 0x9a8   :  { %v1474_v22 = vpop.f32.mrb[44].mxu0 }
 0x9a9   :  { %v5535_v23 = vpop.f32.mrb[45].mxu0  ;;  %v1480_v24 = vsel %vm622_vm5, %v1474_v22, -inf }
 0x9aa   :  { %1481 = vmax.xlane.f32.xlu1 %v1480_v24  ;;  %v1477_v25 = vpop.f32.mrb[46].mxu0 }
 0x9ab   :  { %v5536_v26 = vpop.f32.mrb[47].mxu0 }
 0x9b0   :  { %v1582_v28 = vpop.f32.mrb[48].mxu0 }
 0x9b1   :  { %v5547_v29 = vpop.f32.mrb[49].mxu0  ;;  %v1588_v30 = vsel %vm622_vm5, %v1582_v28, -inf }
 0x9b2   :  { %1589 = vmax.xlane.f32.xlu0 %v1588_v30  ;;  %v1585_v31 = vpop.f32.mrb[50].mxu0 }
 0x9b3   :  { %v5548_v32 = vpop.f32.mrb[51].mxu0 }
 0x9b8   :  { %v1690_v33 = vpop.f32.mrb[52].mxu0 }
 0x9b9   :  { %v5559_v34 = vpop.f32.mrb[53].mxu0  ;;  %v1696_v35 = vsel %vm622_vm5, %v1690_v33, -inf }
 0x9ba   :  { %1697 = vmax.xlane.f32.xlu0 %v1696_v35  ;;  %v1693_v38 = vpop.f32.mrb[54].mxu0 }
 0x9bb   :  { %v5560_v39 = vpop.f32.mrb[55].mxu0 }
 0x9c0   :  { %v1811_v40 = vpop.f32.mrb[56].mxu0 }
 0x9c1   :  { %v5571_v42 = vpop.f32.mrb[57].mxu0  ;;  %v1817_v44 = vsel %vm622_vm5, %v1811_v40, -inf }
 0x9c2   :  { %1818 = vmax.xlane.f32.xlu1 %v1817_v44  ;;  %v1814_v43 = vpop.f32.mrb[58].mxu0 }
 0x9c3   :  { %v5572_v45 = vpop.f32.mrb[59].mxu0 }
 0x9c4   :  { %v1372_v62 = vpop.xlane.xlu0 %1371 }
 0x9c5   :  { %v1373_v63 = vsub.f32 %v1364_v18, %v1372_v62 }
 0x9c7   :  { %v1374_v61 = vmul.f32 1.442695, %v1373_v63 }
 0x9c8   :  { %v1921_v46 = vpop.f32.mrb[60].mxu0 }
 0x9c9   :  { %v5583_v47 = vpop.f32.mrb[61].mxu0  ;;  %v1927_v48 = vsel %vm622_vm5, %v1921_v46, -inf  ;;  %6053 = vpow2.f32 %v1374_v61 }
 0x9ca   :  { %1928 = vmax.xlane.f32.xlu0 %v1927_v48  ;;  %v1924_v51 = vpop.f32.mrb[62].mxu0 }
 0x9cb   :  { %v5584_v52 = vpop.f32.mrb[63].mxu0 }
 0x9d0   :  { %v2029_v53 = vpop.f32.mrb[64].mxu0 }
 0x9d1   :  { %v5595_v54 = vpop.f32.mrb[65].mxu0  ;;  %v2035_v55 = vsel %vm622_vm5, %v2029_v53, -inf }
 0x9d2   :  { %2036 = vmax.xlane.f32.xlu1 %v2035_v55  ;;  %v2032_v56 = vpop.f32.mrb[66].mxu0 }
 0x9d3   :  { %v5596_v57 = vpop.f32.mrb[67].mxu0  ;;  %v6794_v3 = vpop.eup %6053 }
 0x9d4   :  { %v1376_v4 = vsel %vm622_vm5, %v6794_v3, 0.0 }
 0x9d8   :  { %v6786_v58 = vpop.f32.mrb[68].mxu0 }
 0x9d9   :  { %v5607_v11 = vpop.f32.mrb[69].mxu0  ;;  %v2143_v1 = vsel %vm622_vm5, %v6786_v58, -inf }
 0x9da   :  { %v2140_v59 = vpop.f32.mrb[70].mxu0 }
 0x9db   :  { %v5608_v60 = vpop.f32.mrb[71].mxu0 }
 0x9e0   :  { %1492 = vrot.lane.b32.xlu0 %v6715_v50, %s6304_s21 }
 0x9e3   :  { %1383 = vrot.lane.b32.xlu1 %v6715_v50, %s6302_s18 }
 0x9ff   :  { %2144 = vmax.xlane.f32.xlu0 %v2143_v1 }
 0xa07   :  { %1377 = vadd.xlane.f32.xlu1 %v1376_v4 }
 0xa37   :  { %v1482_v2 = vpop.xlane.xlu1 %1481 }
 0xa38   :  { %v1483_v5 = vsub.f32 %v1474_v22, %v1482_v2 }
 0xa3a   :  { %v1484_v6 = vmul.f32 1.442695, %v1483_v5 }
 0xa3c   :  { %6055 = vpow2.f32 %v1484_v6 }
 0xa3f   :  { %v1590_v7 = vpop.xlane.xlu0 %1589 }
 0xa40   :  { %v1591_v8 = vsub.f32 %v1582_v28, %v1590_v7 }
 0xa42   :  { %v1592_v9 = vmul.f32 1.442695, %v1591_v8 }
 0xa44   :  { %6057 = vpow2.f32 %v1592_v9 }
 0xa46   :  { %v6798_v10 = vpop.eup %6055 }
 0xa47   :  { %v1486_v12 = vsel %vm622_vm5, %v6798_v10, 0.0  ;;  %v1698_v20 = vpop.xlane.xlu0 %1697 }
 0xa48   :  { %1487 = vadd.xlane.f32.xlu0 %v1486_v12  ;;  %v1699_v21 = vsub.f32 %v1690_v33, %v1698_v20 }
 0xa4a   :  { %v1700_v14 = vmul.f32 1.442695, %v1699_v21 }
 0xa4c   :  { %6059 = vpow2.f32 %v1700_v14 }
 0xa4e   :  { %v6802_v13 = vpop.eup %6057 }
 0xa4f   :  { %v1594_v15 = vsel %vm622_vm5, %v6802_v13, 0.0  ;;  %v1819_v17 = vpop.xlane.xlu1 %1818 }
 0xa50   :  { %1595 = vadd.xlane.f32.xlu1 %v1594_v15  ;;  %v1820_v22 = vsub.f32 %v1811_v40, %v1819_v17 }
 0xa52   :  { %v1821_v25 = vmul.f32 1.442695, %v1820_v22 }
 0xa54   :  { %6061 = vpow2.f32 %v1821_v25 }
 0xa56   :  { %v6060_v30 = vpop.eup %6059 }
 0xa57   :  { %v1929_v23 = vpop.xlane.xlu0 %1928 }
 0xa58   :  { %v1930_v24 = vsub.f32 %v1921_v46, %v1929_v23 }
 0xa5a   :  { %v1931_v28 = vmul.f32 1.442695, %v1930_v24 }
 0xa5b   :  { %v1493_v39 = vpop.permute.xlu0 %1492 }
 0xa5c   :  { %6063 = vpow2.f32 %v1931_v28 }
 0xa5e   :  { %1600 = vrot.lane.b32.xlu0 %v6715_v50, %s6303_s19  ;;  %v6812_v31 = vpop.eup %6061 }
 0xa5f   :  { %v2037_v18 = vpop.xlane.xlu1 %2036  ;;  %v1823_v33 = vsel %vm622_vm5, %v6812_v31, 0.0 }
 0xa60   :  { %v2038_v26 = vsub.f32 %v2029_v53, %v2037_v18 }
 0xa61   :  { %1708 = vrot.lane.b32.xlu1 %v6715_v50, %s6305_s22  ;;  %v1702_v50 = vsel %vm622_vm5, %v6060_v30, 0.0 }
 0xa62   :  { %v2039_v29 = vmul.f32 1.442695, %v2038_v26 }
 0xa63   :  { %v1384_v19 = vpop.permute.xlu1 %1383 }
 0xa64   :  { %5526 = vmatpush3.bf16.msra.mxu1 %v1384_v19  ;;  %6065 = vpow2.f32 %v2039_v29 }
 0xa65   :  { %5537 = vmatprep.subr.bf16.mxu1 %v6299_v0 }
 0xa66   :  { %v6814_v32 = vpop.eup %6063 }
 0xa67   :  { %v1933_v35 = vsel %vm622_vm5, %v6814_v32, 0.0 }
 0xa6e   :  { %v6818_v34 = vpop.eup %6065 }
 0xa6f   :  { %v2041_v38 = vsel %vm622_vm5, %v6818_v34, 0.0 }
 0xa7d   :  { %1703 = vadd.xlane.f32.xlu0 %v1702_v50 }
 0xa81   :  { %1824 = vadd.xlane.f32.xlu0 %v1823_v33 }
 0xa85   :  { %1934 = vadd.xlane.f32.xlu1 %v1933_v35  ;;  %2042 = vadd.xlane.f32.xlu0 %v2041_v38 }
 0xa8c   :  { %v2145_v40 = vpop.xlane.xlu0 %2144 }
 0xa8d   :  { %v2146_v42 = vsub.f32 %v6786_v58, %v2145_v40 }
 0xa8f   :  { %v2147_v44 = vmul.f32 1.442695, %v2146_v42 }
 0xa91   :  { %6067 = vpow2.f32 %v2147_v44 }
 0xa94   :  { %v1378_v43 = vpop.xlane.xlu1 %1377 }
 0xa95   :  { %6069 = vrcp.f32 %v1378_v43 }
 0xa96   :  { %1939 = vrot.lane.b32.xlu1 %v6713_v49, %s6304_s21 }
 0xa9a   :  { %2047 = vrot.lane.b32.xlu1 %v6713_v49, %s6303_s19 }
 0xa9b   :  { %v6829_v45 = vpop.eup %6067 }
 0xa9c   :  { %v2149_v46 = vsel %vm622_vm5, %v6829_v45, 0.0 }
 0xa9d   :  { %2150 = vadd.xlane.f32.xlu0 %v2149_v46 }
 0xa9e   :  { %2155 = vrot.lane.b32.xlu1 %v6713_v49, %s6305_s22 }
 0xa9f   :  { %v6070_v47 = vpop.eup %6069 }
 0xaa0   :  { %v1380_v48 = vmul.f32 %v6070_v47, %v6794_v3  ;;  %v5993_v47 = vld [vmem:[#allocation5 + $0x10] sm:$0xff]  }
 0xaa1   :  { %5616 = vmatpush3.bf16.msra.mxu0 %v5993_v47 }
 0xaa2   :  { %v1381_v51 = vpack.c.bf16 %v1380_v48, %v1380_v48  ;;  %5617 = vmatprep.subr.bf16.mxu0 %v6299_v0 }
 0xaa4   :  { %5528 = vmatmul.mubr.msk.bf16.vlgmr.msra.gmra.mrb[40].mxu1 %vm622_vm5, %v1381_v51 }
 0xaa5   :  { %5538 = vmatpush3.bf16.msra.mxu1 %v1493_v39  ;;  %5539 = vmatprep.mubr.msk.bf16.mxu1 %vm6300_vm0, %v6299_v0 }
 0xaa6   :  { %5549 = vmatprep.subr.bf16.mxu1 %v6299_v0 }
 0xab3   :  { %1830 = vrot.lane.b32.xlu0 %v6713_v49, %s6302_s18 }
 0xad5   :  { %v1488_v52 = vpop.xlane.xlu0 %1487 }
 0xad6   :  { %6071 = vrcp.f32 %v1488_v52 }
 0xad9   :  { %v1601_v57 = vpop.permute.xlu0 %1600 }
 0xadd   :  { %v1596_v53 = vpop.xlane.xlu1 %1595 }
 0xade   :  { %6073 = vrcp.f32 %v1596_v53 }
 0xae0   :  { %v6072_v54 = vpop.eup %6071 }
 0xae1   :  { %v1490_v55 = vmul.f32 %v6072_v54, %v6798_v10  ;;  %v1709_v59 = vpop.permute.xlu1 %1708  ;;  %v5994_v54 = vld [vmem:[#allocation5 + $0x18] sm:$0xff]  }
 0xae2   :  { %5618 = vmatpush3.bf16.msra.mxu0 %v5994_v54 }
 0xae3   :  { %v1491_v56 = vpack.c.bf16 %v1490_v55, %v1490_v55  ;;  %5631 = vmatprep.subr.bf16.mxu0 %v6299_v0 }
 0xae5   :  { %5540 = vmatmul.mubr.msk.bf16.vlgmr.msra.gmra.mrb[44].mxu1 %vm622_vm5, %v1491_v56 }
 0xae6   :  { %5550 = vmatpush3.bf16.msra.mxu1 %v1601_v57  ;;  %5551 = vmatprep.mubr.msk.bf16.mxu1 %vm6300_vm0, %v6299_v0 }
 0xae7   :  { %5561 = vmatprep.subr.bf16.mxu1 %v6299_v0 }
 0xae8   :  { %v6074_v58 = vpop.eup %6073 }
 0xae9   :  { %v1598_v49 = vmul.f32 %v6074_v58, %v6802_v13 }
 0xaeb   :  { %v1599_v11 = vpack.c.bf16 %v1598_v49, %v1598_v49 }
 0xaed   :  { %5552 = vmatmul.mubr.msk.bf16.vlgmr.msra.gmra.mrb[48].mxu1 %vm622_vm5, %v1599_v11 }
 0xaee   :  { %5562 = vmatpush3.bf16.msra.mxu1 %v1709_v59  ;;  %5563 = vmatprep.mubr.msk.bf16.mxu1 %vm6300_vm0, %v6299_v0 }
 0xaef   :  { %5573 = vmatprep.subr.bf16.mxu1 %v6299_v0 }
 0xb0a   :  { %v1704_v60 = vpop.xlane.xlu0 %1703 }
 0xb0b   :  { %6075 = vrcp.f32 %v1704_v60 }
 0xb0e   :  { %v1825_v1 = vpop.xlane.xlu0 %1824 }
 0xb0f   :  { %6077 = vrcp.f32 %v1825_v1 }
 0xb12   :  { %v1935_v3 = vpop.xlane.xlu1 %1934  ;;  %v2043_v4 = vpop.xlane.xlu0 %2042 }
 0xb13   :  { %6079 = vrcp.f32 %v1935_v3 }
 0xb14   :  { %6081 = vrcp.f32 %v2043_v4 }
 0xb15   :  { %v6076_v62 = vpop.eup %6075 }
 0xb16   :  { %v1706_v63 = vmul.f32 %v6076_v62, %v6060_v30  ;;  %v1940_v10 = vpop.permute.xlu1 %1939 }
 0xb18   :  { %v1707_v61 = vpack.c.bf16 %v1706_v63, %v1706_v63 }
 0xb19   :  { %v6078_v2 = vpop.eup %6077 }
 0xb1a   :  { %5564 = vmatmul.mubr.msk.bf16.vlgmr.msra.gmra.mrb[52].mxu1 %vm622_vm5, %v1707_v61  ;;  %v1827_v6 = vmul.f32 %v6078_v2, %v6812_v31  ;;  %v2048_v17 = vpop.permute.xlu1 %2047 }
 0xb1b   :  { %5575 = vmatprep.mubr.msk.bf16.mxu1 %vm6300_vm0, %v6299_v0 }
 0xb1c   :  { %v1828_v8 = vpack.c.bf16 %v1827_v6, %v1827_v6 }
 0xb1d   :  { %v6080_v9 = vpop.eup %6079 }
 0xb1e   :  { %v1937_v12 = vmul.f32 %v6080_v9, %v6814_v32  ;;  %v6082_v15 = vpop.eup %6081  ;;  %v2156_v21 = vpop.permute.xlu1 %2155 }
 0xb1f   :  { %v2045_v18 = vmul.f32 %v6082_v15, %v6818_v34 }
 0xb20   :  { %v1938_v13 = vpack.c.bf16 %v1937_v12, %v1937_v12 }
 0xb21   :  { %v2046_v19 = vpack.c.bf16 %v2045_v18, %v2045_v18 }
 0xb2a   :  { %v2151_v5 = vpop.xlane.xlu0 %2150 }
 0xb2b   :  { %6083 = vrcp.f32 %v2151_v5 }
 0xb2e   :  { %v1831_v7 = vpop.permute.xlu0 %1830 }
 0xb2f   :  { %5574 = vmatpush3.bf16.msra.mxu1 %v1831_v7 }
 0xb30   :  { %5585 = vmatprep.subr.bf16.mxu1 %v6299_v0 }
 0xb32   :  { %5576 = vmatmul.mubr.msk.bf16.vlgmr.msra.gmra.mrb[56].mxu1 %vm622_vm5, %v1828_v8 }
 0xb33   :  { %5586 = vmatpush3.bf16.msra.mxu1 %v1940_v10  ;;  %5587 = vmatprep.mubr.msk.bf16.mxu1 %vm6300_vm0, %v6299_v0 }
 0xb34   :  { %5597 = vmatprep.subr.bf16.mxu1 %v6299_v0 }
 0xb35   :  { %v6084_v20 = vpop.eup %6083 }
 0xb36   :  { %v2153_v14 = vmul.f32 %v6084_v20, %v6829_v45 }
 0xb38   :  { %v2154_v22 = vpack.c.bf16 %v2153_v14, %v2153_v14 }
 0xb3a   :  { %5588 = vmatmul.mubr.msk.bf16.vlgmr.msra.gmra.mrb[60].mxu1 %vm622_vm5, %v1938_v13 }
 0xb3b   :  { %5598 = vmatpush3.bf16.msra.mxu1 %v2048_v17  ;;  %5599 = vmatprep.mubr.msk.bf16.mxu1 %vm6300_vm0, %v6299_v0 }
 0xb3c   :  { %5609 = vmatprep.subr.bf16.mxu1 %v6299_v0 }
 0xb42   :  { %5600 = vmatmul.mubr.msk.bf16.vlgmr.msra.gmra.mrb[64].mxu1 %vm622_vm5, %v2046_v19  ;;  %v5106_v19 = vld [vmem:[#allocation8 + $0x4] ss:$0 sm:$0xff] }
 0xb43   :  { %5610 = vmatpush3.bf16.msra.mxu1 %v2156_v21  ;;  %5611 = vmatprep.mubr.msk.bf16.mxu1 %vm6300_vm0, %v6299_v0 }
 0xb44   :  { %5623 = vmatprep.subr.bf16.mxu1 %v6299_v0 }
 0xb4a   :  { %5612 = vmatmul.mubr.msk.bf16.vlgmr.msra.gmra.mrb[68].mxu1 %vm622_vm5, %v2154_v22 }
 0xb4b   :  { %5627 = vmatprep.mubr.msk.bf16.mxu1 %vm6300_vm0, %v6299_v0 }
 0xb77   :  { %v1423_v23 = vpop.f32.mrb[40].mxu1 }
 0xb78   :  { %v5529_v24 = vpop.f32.mrb[41].mxu1 }
 0xb79   :  { %v1426_v25 = vpop.f32.mrb[42].mxu1 }
 0xb7a   :  { %v5530_v26 = vpop.f32.mrb[43].mxu1 }
 0xbb8   :  { %v1532_v28 = vpop.f32.mrb[44].mxu1 }
 0xbb9   :  { %v5541_v29 = vpop.f32.mrb[45].mxu1 }
 0xbba   :  { %v1535_v30 = vpop.f32.mrb[46].mxu1 }
 0xbbb   :  { %v5542_v50 = vpop.f32.mrb[47].mxu1 }
 0xbc0   :  { %v1640_v31 = vpop.f32.mrb[48].mxu1 }
 0xbc1   :  { %v5553_v32 = vpop.f32.mrb[49].mxu1 }
 0xbc2   :  { %v1643_v33 = vpop.f32.mrb[50].mxu1 }
 0xbc3   :  { %v5554_v34 = vpop.f32.mrb[51].mxu1 }
 0xbed   :  { %v1748_v35 = vpop.f32.mrb[52].mxu1 }
 0xbee   :  { %v5565_v38 = vpop.f32.mrb[53].mxu1 }
 0xbef   :  { %v1751_v39 = vpop.f32.mrb[54].mxu1 }
 0xbf0   :  { %v5566_v40 = vpop.f32.mrb[55].mxu1 }
 0xbf1   :  { %v5995_v40 = vld [vmem:[#allocation7] sm:$0xff]  }
 0xbf2   :  { %5624 = vmatpush3.bf16.msra.mxu1 %v5995_v40 }
 0xbf3   :  { %5625 = vmatprep.subr.bf16.mxu1 %v6299_v0 }
 0xc05   :  { %v1870_v42 = vpop.f32.mrb[56].mxu1 }
 0xc06   :  { %v5577_v44 = vpop.f32.mrb[57].mxu1 }
 0xc07   :  { %v1873_v43 = vpop.f32.mrb[58].mxu1  ;;  %v5998_v44 = vld [vmem:[%s7421_s5 + $0x8] sm:$0xff]  }
 0xc08   :  { %v5578_v45 = vpop.f32.mrb[59].mxu1 }
 0xc0d   :  { %v1979_v46 = vpop.f32.mrb[60].mxu1 }
 0xc0e   :  { %v5942_v48 = vpack.i.bf16 %v1979_v46, %v1532_v28  ;;  %v5589_v51 = vpop.f32.mrb[61].mxu1 }
 0xc0f   :  { %v1982_v52 = vpop.f32.mrb[62].mxu1 }
 0xc10   :  { %5943 = vrot.lane.b32.xlu1 %v5942_v48, %s6296_s28  ;;  %v5590_v53 = vpop.f32.mrb[63].mxu1 }
 0xc11   :  { %v5110_v53 = vld [vmem:[#allocation8 + $0x8] ss:$0 sm:$0xff] }
 0xc15   :  { %v2087_v55 = vpop.f32.mrb[64].mxu1 }
 0xc16   :  { %v5947_v56 = vpack.i.bf16 %v2087_v55, %v1640_v31  ;;  %v5601_v57 = vpop.f32.mrb[65].mxu1 }
 0xc17   :  { %v2090_v58 = vpop.f32.mrb[66].mxu1 }
 0xc18   :  { %5948 = vrot.lane.b32.xlu1 %v5947_v56, %s6312_s26  ;;  %v5602_v49 = vpop.f32.mrb[67].mxu1  ;;  %v5111_v58 = vld [vmem:[#allocation8 + $0x9] ss:$0 sm:$0xff] }
 0xc1d   :  { %v2195_v11 = vpop.f32.mrb[68].mxu1 }
 0xc1e   :  { %v5952_v59 = vpack.i.bf16 %v2195_v11, %v1748_v35  ;;  %v5613_v60 = vpop.f32.mrb[69].mxu1 }
 0xc1f   :  { %v2198_v62 = vpop.f32.mrb[70].mxu1 }
 0xc20   :  { %5953 = vrot.lane.b32.xlu0 %v5952_v59, %s6313_s27  ;;  %v5614_v63 = vpop.f32.mrb[71].mxu1  ;;  %v5999_v62 = vld [vmem:[%s7421_s5 + $0x10] sm:$0xff]  }
 0xc21   :  { %v6000_v63 = vld [vmem:[%s7421_s5 + $0x18] sm:$0xff]  }
 0xc82   :  { %v5944_v61 = vpop.permute.xlu1 %5943 }
 0xc83   :  { %v5946_v3 = vunpack.i.h.bf16 %v5944_v61  ;;  %v5945_v4 = vunpack.i.l.bf16 %v5944_v61  ;;  %v5112_v61 = vld [vmem:[#allocation8 + $0x2] ss:$0 sm:$0xff] }
 0xc85   :  { %v2213_v7 = vsel %vm171_vm2, %v1870_v42, %v5946_v3  ;;  %v1766_v8 = vsel %vm171_vm2, %v1423_v23, %v5945_v4  ;;  %v5997_v42 = vld [vmem:[%s7421_s5] sm:$0xff]  }
 0xc8a   :  { %v5949_v1 = vpop.permute.xlu1 %5948 }
 0xc8b   :  { %v5951_v2 = vunpack.i.h.bf16 %v5949_v1  ;;  %v5950_v5 = vunpack.i.l.bf16 %v5949_v1 }
 0xc8d   :  { %v2214_v12 = vsel %vm622_vm5, %v2213_v7, %v5951_v2  ;;  %v1767_v13 = vsel %vm622_vm5, %v1766_v8, %v5950_v5 }
 0xc92   :  { %v5954_v6 = vpop.permute.xlu0 %5953 }
 0xc93   :  { %v5956_v9 = vunpack.i.h.bf16 %v5954_v6  ;;  %v5955_v10 = vunpack.i.l.bf16 %v5954_v6 }
 0xc95   :  { %v2215_v15 = vsel %vm624_vm6, %v2214_v12, %v5956_v9  ;;  %v1768_v17 = vsel %vm624_vm6, %v1767_v13, %v5955_v10  ;;  %v5116_v10 = vld [vmem:[#allocation8 + $0x5] ss:$0 sm:$0xff] }
 0xc96   :  { %v2216_v18 = vpack.c.bf16 %v2215_v15, %v1768_v17 }
 0xc98   :  { %5620 = vmatmul.mubr.msk.bf16.vlgmr.msra.gmra.mrb[72].mxu0 %vm122_vm1, %v2216_v18 }
 0xc99   :  { %5639 = vmatprep.mubr.msk.bf16.mxu0 %vm6300_vm0, %v6299_v0  ;;  %5632 = vmatpush3.bf16.msra.mxu0 %v5997_v42 }
 0xc9a   :  { %5633 = vmatprep.subr.bf16.mxu0 %v6299_v0 }
 0xc9d   :  { %5634 = vmatpush3.bf16.msra.mxu0 %v5998_v44  ;;  %v5122_v44 = vld [vmem:[#allocation8 + $0xa] ss:$0 sm:$0xff] }
 0xc9e   :  { %5635 = vmatprep.subr.bf16.mxu0 %v6299_v0 }
 0xca1   :  { %5636 = vmatpush3.bf16.msra.mxu0 %v5999_v62 }
 0xca2   :  { %5637 = vmatprep.subr.bf16.mxu0 %v6299_v0 }
 0xca5   :  { %5638 = vmatpush3.bf16.msra.mxu0 %v6000_v63 }
 0xca6   :  { %5657 = vmatprep.subr.bf16.mxu0 %v6299_v0 }
 0xd6b   :  { %v2276_v20 = vpop.f32.mrb[72].mxu0 }
 0xd6c   :  { %v2277_v21 = vadd.f32 %v5106_v19, %v2276_v20  ;;  %v5621_v14 = vpop.f32.mrb[73].mxu0 }
 0xd6d   :  { %v2279_v22 = vpop.f32.mrb[74].mxu0 }
 0xd6e   :  { %v2280_v23 = vadd.f32 %v5106_v19, %v2279_v22  ;;  %v5622_v24 = vpop.f32.mrb[75].mxu0  ;;  %v2283_v25 = vadd.f32 %v2277_v21, %v6704_v36 }
 0xd70   :  { %v2287_v26 = vsel %vm122_vm1, %v2283_v25, 0.0  ;;  %v2284_v28 = vadd.f32 %v2280_v23, %v6706_v37  ;;  %v5996_v37 = vld [vmem:[#allocation7 + $0x8] sm:$0xff]  }
 0xd71   :  { %2288 = vadd.xlane.f32.xlu1 %v2287_v26  ;;  %5626 = vmatpush3.bf16.msra.mxu1 %v5996_v37 }
 0xd72   :  { %v2290_v29 = vsel %vm122_vm1, %v2284_v28, 0.0  ;;  %5643 = vmatprep.subr.bf16.mxu1 %v6299_v0 }
 0xd73   :  { %2291 = vadd.xlane.f32.xlu0 %v2290_v29 }
 0xdfe   :  { %v2289_v30 = vpop.xlane.xlu1 %2288 }
 0xdff   :  { %v2293_v50 = vmul.f32 0.03125, %v2289_v30 }
 0xe00   :  { %v2292_v31 = vpop.xlane.xlu0 %2291 }
 0xe01   :  { %v2295_v32 = vsub.f32 %v2283_v25, %v2293_v50  ;;  %v2294_v33 = vmul.f32 0.03125, %v2292_v31 }
 0xe03   :  { %v2296_v34 = vsub.f32 %v2284_v28, %v2294_v33  ;;  %v2297_v35 = vmul.f32 %v2295_v32, %v2295_v32  ;;  %v6001_v33 = vld [vmem:[%s7418_s2 + $0x20] sm:$0xff]  }
 0xe05   :  { %v2299_v38 = vsel %vm122_vm1, %v2297_v35, 0.0  ;;  %v2298_v39 = vmul.f32 %v2296_v34, %v2296_v34 }
 0xe06   :  { %2300 = vadd.xlane.f32.xlu0 %v2299_v38 }
 0xe07   :  { %v2302_v36 = vsel %vm122_vm1, %v2298_v39, 0.0 }
 0xe08   :  { %2303 = vadd.xlane.f32.xlu1 %v2302_v36 }
 0xe93   :  { %v2301_v43 = vpop.xlane.xlu0 %2300 }
 0xe94   :  { %v2305_v45 = vmul.f32 0.03125, %v2301_v43 }
 0xe95   :  { %v2304_v46 = vpop.xlane.xlu1 %2303 }
 0xe96   :  { %v2307_v47 = vadd.f32 1e-05, %v2305_v45  ;;  %v2306_v48 = vmul.f32 0.03125, %v2304_v46 }
 0xe98   :  { %6085 = vrsqrt.f32 %v2307_v47  ;;  %v2308_v51 = vadd.f32 1e-05, %v2306_v48  ;;  %v5123_v48 = vld [vmem:[#allocation8 + $0xb] ss:$0 sm:$0xff] }
 0xe9a   :  { %6087 = vrsqrt.f32 %v2308_v51 }
 0xea2   :  { %v6086_v52 = vpop.eup %6085 }
 0xea3   :  { %v2311_v54 = vmul.f32 %v6086_v52, %v2295_v32 }
 0xea4   :  { %v6088_v55 = vpop.eup %6087 }
 0xea5   :  { %v2317_v56 = vmul.f32 %v5110_v53, %v2311_v54  ;;  %v2312_v57 = vmul.f32 %v6088_v55, %v2296_v34  ;;  %v6002_v34 = vld [vmem:[%s7418_s2 + $0x28] sm:$0xff]   ;;  %v5128_v55 = vld [vmem:[#allocation8 + $0xc] ss:$0 sm:$0xff] }
 0xea7   :  { %v2318_v49 = vmul.f32 %v5110_v53, %v2312_v57  ;;  %v2323_v11 = vadd.f32 %v5111_v58, %v2317_v56 }
 0xea9   :  { %v2324_v59 = vadd.f32 %v5111_v58, %v2318_v49 }
 0xeab   :  { %v2325_v60 = vpack.c.bf16 %v2324_v59, %v2323_v11 }
 0xead   :  { %5628 = vmatmul.mubr.msk.bf16.vlgmr.msra.gmra.mrb[72].mxu1 %vm122_vm1, %v2325_v60 }
 0xeae   :  { %5647 = vmatprep.mubr.msk.bf16.mxu1 %vm6300_vm0, %v6299_v0  ;;  %5644 = vmatpush3.bf16.msra.mxu1 %v6001_v33 }
 0xeaf   :  { %5645 = vmatprep.subr.bf16.mxu1 %v6299_v0 }
 0xeb2   :  { %5646 = vmatpush3.bf16.msra.mxu1 %v6002_v34 }
 0xeb3   :  { %5651 = vmatprep.subr.bf16.mxu1 %v6299_v0 }
 0xf80   :  { %v2384_v1 = vpop.f32.mrb[72].mxu1 }
 0xf81   :  { %v2385_v3 = vadd.f32 %v5112_v61, %v2384_v1  ;;  %v5629_v4 = vpop.f32.mrb[73].mxu1 }
 0xf82   :  { %v2387_v2 = vpop.f32.mrb[74].mxu1 }
 0xf83   :  { %v2388_v5 = vadd.f32 %v5112_v61, %v2387_v2  ;;  %v5630_v6 = vpop.f32.mrb[75].mxu1  ;;  %v2391_v7 = vmax.f32 %v2385_v3, 0.0 }
 0xf85   :  { %v2392_v8 = vmax.f32 %v2388_v5, 0.0 }
 0xf87   :  { %v2393_v9 = vpack.c.bf16 %v2392_v8, %v2391_v7 }
 0xf89   :  { %5640 = vmatmul.mubr.msk.bf16.vlgmr.msra.gmra.mrb[76].mxu0 %vm2431_vm7, %v2393_v9 }
 0xf8a   :  { %5659 = vmatprep.mubr.msk.bf16.mxu0 %vm6300_vm0, %v6299_v0 }
0x105c   :  { %v2469_v12 = vpop.f32.mrb[76].mxu0 }
0x105d   :  { %v2470_v13 = vadd.f32 %v5116_v10, %v2469_v12  ;;  %v5641_v15 = vpop.f32.mrb[77].mxu0 }
0x105e   :  { %v2472_v17 = vpop.f32.mrb[78].mxu0 }
0x105f   :  { %v2473_v18 = vadd.f32 %v5116_v10, %v2472_v17  ;;  %v5642_v19 = vpop.f32.mrb[79].mxu0  ;;  %v2476_v20 = vadd.f32 %v2470_v13, %v2323_v11 }
0x1061   :  { %v2480_v21 = vsel %vm122_vm1, %v2476_v20, 0.0  ;;  %v2477_v14 = vadd.f32 %v2473_v18, %v2324_v59 }
0x1062   :  { %2481 = vadd.xlane.f32.xlu0 %v2480_v21 }
0x1063   :  { %v2483_v22 = vsel %vm122_vm1, %v2477_v14, 0.0 }
0x1064   :  { %2484 = vadd.xlane.f32.xlu1 %v2483_v22 }
0x10ef   :  { %v2482_v23 = vpop.xlane.xlu0 %2481 }
0x10f0   :  { %v2486_v24 = vmul.f32 0.03125, %v2482_v23 }
0x10f1   :  { %v2485_v25 = vpop.xlane.xlu1 %2484 }
0x10f2   :  { %v2488_v26 = vsub.f32 %v2476_v20, %v2486_v24  ;;  %v2487_v28 = vmul.f32 0.03125, %v2485_v25 }
0x10f4   :  { %v2489_v29 = vsub.f32 %v2477_v14, %v2487_v28  ;;  %v2490_v30 = vmul.f32 %v2488_v26, %v2488_v26 }
0x10f6   :  { %v2492_v50 = vsel %vm122_vm1, %v2490_v30, 0.0  ;;  %v2491_v31 = vmul.f32 %v2489_v29, %v2489_v29 }
0x10f7   :  { %2493 = vadd.xlane.f32.xlu0 %v2492_v50 }
0x10f8   :  { %v2495_v32 = vsel %vm122_vm1, %v2491_v31, 0.0 }
0x10f9   :  { %2496 = vadd.xlane.f32.xlu1 %v2495_v32 }
0x1184   :  { %v2494_v35 = vpop.xlane.xlu0 %2493 }
0x1185   :  { %v2498_v38 = vmul.f32 0.03125, %v2494_v35 }
0x1186   :  { %v2497_v39 = vpop.xlane.xlu1 %2496 }
0x1187   :  { %v2500_v36 = vadd.f32 1e-05, %v2498_v38  ;;  %v2499_v40 = vmul.f32 0.03125, %v2497_v39 }
0x1189   :  { %6089 = vrsqrt.f32 %v2500_v36  ;;  %v2501_v37 = vadd.f32 1e-05, %v2499_v40 }
0x118b   :  { %6091 = vrsqrt.f32 %v2501_v37 }
0x1193   :  { %v6090_v42 = vpop.eup %6089 }
0x1194   :  { %v2504_v43 = vmul.f32 %v6090_v42, %v2488_v26 }
0x1195   :  { %v6092_v45 = vpop.eup %6091 }
0x1196   :  { %v2510_v46 = vmul.f32 %v5122_v44, %v2504_v43  ;;  %v2505_v47 = vmul.f32 %v6092_v45, %v2489_v29 }
0x1198   :  { %v2511_v51 = vmul.f32 %v5122_v44, %v2505_v47  ;;  %v6931_v52 = vadd.f32 %v5123_v48, %v2510_v46 }
0x119a   :  { %v6933_v53 = vadd.f32 %v5123_v48, %v2511_v51 }
0x119c   :  { %v2523_v54 = vpack.c.bf16 %v6933_v53, %v6931_v52 }
0x119e   :  { %5648 = vmatmul.mubr.msk.bf16.vlgmr.msra.gmra.mrb[76].mxu1 %vm122_vm1, %v2523_v54 }
0x119f   :  { %5653 = vmatprep.mubr.msk.bf16.mxu1 %vm6300_vm0, %v6299_v0 }
0x1271   :  { %v2578_v56 = vpop.f32.mrb[76].mxu1 }
0x1272   :  { %v2579_v57 = vadd.f32 %v5128_v55, %v2578_v56  ;;  %v5649_v58 = vpop.f32.mrb[77].mxu1 }
0x1273   :  { %v2581_v49 = vpop.f32.mrb[78].mxu1 }
0x1274   :  { %v6940_v11 = vpack.c.bf16 %v2579_v57, %v2579_v57  ;;  %v5650_v59 = vpop.f32.mrb[79].mxu1  ;;  %v2582_v60 = vadd.f32 %v5128_v55, %v2581_v49 }
0x1276   :  { %2697 = vrot.lane.b32.xlu1 %v6940_v11, %s6304_s21  ;;  %2587 = vrot.lane.b32.xlu0 %v6940_v11, %s6302_s18  ;;  %v6954_v62 = vpack.c.bf16 %v2582_v60, %v2582_v60 }
0x127a   :  { %2695 = vrot.lane.b32.xlu1 %v6940_v11, %s6301_s17  ;;  %2807 = vrot.lane.b32.xlu0 %v6940_v11, %s6303_s19 }
0x127e   :  { %2805 = vrot.lane.b32.xlu1 %v6940_v11, %s6306_s23  ;;  %2917 = vrot.lane.b32.xlu0 %v6940_v11, %s6305_s22 }
0x1282   :  { %2915 = vrot.lane.b32.xlu1 %v6940_v11, %s6307_s0  ;;  %3042 = vrot.lane.b32.xlu0 %v6954_v62, %s6302_s18 }
0x1286   :  { %3152 = vrot.lane.b32.xlu1 %v6954_v62, %s6304_s21  ;;  %3150 = vrot.lane.b32.xlu0 %v6954_v62, %s6301_s17 }
0x128a   :  { %3262 = vrot.lane.b32.xlu1 %v6954_v62, %s6303_s19  ;;  %3260 = vrot.lane.b32.xlu0 %v6954_v62, %s6306_s23 }
0x128e   :  { %3372 = vrot.lane.b32.xlu1 %v6954_v62, %s6305_s22  ;;  %3370 = vrot.lane.b32.xlu0 %v6954_v62, %s6307_s0 }
0x12e8   :  { %v2588_v63 = vpop.permute.xlu0 %2587  ;;  %v2698_v1 = vpop.permute.xlu1 %2697 }
0x12e9   :  { %v2593_v61 = vsel %vm171_vm2, %v2588_v63, 0  ;;  %v2703_v3 = vsel %vm171_vm2, %v2698_v1, 0 }
0x12ea   :  { %5652 = vmatpush3.bf16.xpose.msra.mxu1 %v2593_v61 }
0x12eb   :  { %5663 = vmatprep.subr.bf16.mxu1 %v6299_v0 }
0x12ec   :  { %v2808_v4 = vpop.permute.xlu0 %2807  ;;  %v2696_v2 = vpop.permute.xlu1 %2695 }
0x12ed   :  { %v2813_v5 = vsel %vm171_vm2, %v2808_v4, 0 }
0x12f0   :  { %v2918_v6 = vpop.permute.xlu0 %2917  ;;  %v2806_v7 = vpop.permute.xlu1 %2805 }
0x12f1   :  { %5654 = vmatmul.mubr.msk.bf16.vlgmr.msra.gmra.mrb[80].mxu1 %vm171_vm2, %v6940_v11  ;;  %v2923_v8 = vsel %vm171_vm2, %v2918_v6, 0 }
0x12f2   :  { %5664 = vmatpush3.bf16.xpose.msra.mxu1 %v2703_v3  ;;  %5665 = vmatprep.mubr.msk.bf16.mxu1 %vm6300_vm0, %v6299_v0 }
0x12f3   :  { %5675 = vmatprep.subr.bf16.mxu1 %v6299_v0 }
0x12f4   :  { %v3043_v9 = vpop.permute.xlu0 %3042  ;;  %v2916_v10 = vpop.permute.xlu1 %2915 }
0x12f5   :  { %v3048_v12 = vsel %vm171_vm2, %v3043_v9, 0 }
0x12f8   :  { %v3153_v13 = vpop.permute.xlu1 %3152  ;;  %v3151_v18 = vpop.permute.xlu0 %3150 }
0x12f9   :  { %5666 = vmatmul.mubr.msk.bf16.vlgmr.msra.gmra.mrb[84].mxu1 %vm171_vm2, %v2696_v2  ;;  %v3158_v15 = vsel %vm171_vm2, %v3153_v13, 0 }
0x12fa   :  { %5676 = vmatpush3.bf16.xpose.msra.mxu1 %v2813_v5  ;;  %5677 = vmatprep.mubr.msk.bf16.mxu1 %vm6300_vm0, %v6299_v0 }
0x12fb   :  { %5687 = vmatprep.subr.bf16.mxu1 %v6299_v0 }
0x12fc   :  { %v3263_v17 = vpop.permute.xlu1 %3262  ;;  %v3261_v21 = vpop.permute.xlu0 %3260 }
0x12fd   :  { %v3268_v19 = vsel %vm171_vm2, %v3263_v17, 0 }
0x1300   :  { %v3373_v20 = vpop.permute.xlu1 %3372  ;;  %v3371_v22 = vpop.permute.xlu0 %3370 }
0x1301   :  { %5678 = vmatmul.mubr.msk.bf16.vlgmr.msra.gmra.mrb[88].mxu1 %vm171_vm2, %v2806_v7  ;;  %v3378_v14 = vsel %vm171_vm2, %v3373_v20, 0 }
0x1302   :  { %5688 = vmatpush3.bf16.xpose.msra.mxu1 %v2923_v8  ;;  %5689 = vmatprep.mubr.msk.bf16.mxu1 %vm6300_vm0, %v6299_v0 }
0x1303   :  { %5699 = vmatprep.subr.bf16.mxu1 %v6299_v0 }
0x1309   :  { %5690 = vmatmul.mubr.msk.bf16.vlgmr.msra.gmra.mrb[92].mxu1 %vm171_vm2, %v2916_v10 }
0x130a   :  { %5700 = vmatpush3.bf16.xpose.msra.mxu1 %v3048_v12  ;;  %5701 = vmatprep.mubr.msk.bf16.mxu1 %vm6300_vm0, %v6299_v0 }
0x130b   :  { %5711 = vmatprep.subr.bf16.mxu1 %v6299_v0 }
0x1311   :  { %5702 = vmatmul.mubr.msk.bf16.vlgmr.msra.gmra.mrb[96].mxu1 %vm171_vm2, %v6954_v62 }
0x1312   :  { %5712 = vmatpush3.bf16.xpose.msra.mxu1 %v3158_v15  ;;  %5713 = vmatprep.mubr.msk.bf16.mxu1 %vm6300_vm0, %v6299_v0 }
0x1313   :  { %5723 = vmatprep.subr.bf16.mxu1 %v6299_v0 }
0x1319   :  { %5714 = vmatmul.mubr.msk.bf16.vlgmr.msra.gmra.mrb[100].mxu1 %vm171_vm2, %v3151_v18 }
0x131a   :  { %5724 = vmatpush3.bf16.xpose.msra.mxu1 %v3268_v19  ;;  %5725 = vmatprep.mubr.msk.bf16.mxu1 %vm6300_vm0, %v6299_v0 }
0x131b   :  { %5735 = vmatprep.subr.bf16.mxu1 %v6299_v0 }
0x1321   :  { %5726 = vmatmul.mubr.msk.bf16.vlgmr.msra.gmra.mrb[104].mxu1 %vm171_vm2, %v3261_v21 }
0x1322   :  { %5736 = vmatpush3.bf16.xpose.msra.mxu1 %v3378_v14  ;;  %5737 = vmatprep.mubr.msk.bf16.mxu1 %vm6300_vm0, %v6299_v0 }
0x1323   :  { %5747 = vmatprep.subr.bf16.mxu1 %v6299_v0 }
0x1329   :  { %5738 = vmatmul.mubr.msk.bf16.vlgmr.msra.gmra.mrb[108].mxu1 %vm171_vm2, %v3371_v22 }
0x132a   :  { %5751 = vmatprep.mubr.msk.bf16.mxu1 %vm6300_vm0, %v6299_v0 }
0x13c4   :  { %v2629_v23 = vpop.f32.mrb[80].mxu1 }
0x13c5   :  { %v2630_v24 = vadd.f32 %v2629_v23, %v6524_v41  ;;  %v5655_v25 = vpop.f32.mrb[81].mxu1 }
0x13c6   :  { %v2632_v26 = vpop.f32.mrb[82].mxu1 }
0x13c7   :  { %v5656_v28 = vpop.f32.mrb[83].mxu1  ;;  %v2635_v29 = vsel %vm171_vm2, %v2630_v24, -inf }
0x13c8   :  { %2636 = vmax.xlane.f32.xlu1 %v2635_v29 }
0x13cc   :  { %v2739_v30 = vpop.f32.mrb[84].mxu1 }
0x13cd   :  { %v2740_v50 = vadd.f32 %v2739_v30, %v6524_v41  ;;  %v5667_v31 = vpop.f32.mrb[85].mxu1 }
0x13ce   :  { %v2742_v32 = vpop.f32.mrb[86].mxu1 }
0x13cf   :  { %v5668_v33 = vpop.f32.mrb[87].mxu1  ;;  %v2745_v34 = vsel %vm171_vm2, %v2740_v50, -inf }
0x13d0   :  { %2746 = vmax.xlane.f32.xlu0 %v2745_v34 }
0x13d4   :  { %v2849_v35 = vpop.f32.mrb[88].mxu1 }
0x13d5   :  { %v2850_v38 = vadd.f32 %v2849_v35, %v6524_v41  ;;  %v5679_v39 = vpop.f32.mrb[89].mxu1 }
0x13d6   :  { %v2852_v36 = vpop.f32.mrb[90].mxu1 }
0x13d7   :  { %v5680_v40 = vpop.f32.mrb[91].mxu1  ;;  %v2855_v37 = vsel %vm171_vm2, %v2850_v38, -inf }
0x13d8   :  { %2856 = vmax.xlane.f32.xlu0 %v2855_v37 }
0x13dc   :  { %v2959_v42 = vpop.f32.mrb[92].mxu1 }
0x13dd   :  { %v2960_v44 = vadd.f32 %v2959_v42, %v6524_v41  ;;  %v5691_v43 = vpop.f32.mrb[93].mxu1 }
0x13de   :  { %v2962_v45 = vpop.f32.mrb[94].mxu1 }
0x13df   :  { %v5692_v46 = vpop.f32.mrb[95].mxu1  ;;  %v2965_v47 = vsel %vm171_vm2, %v2960_v44, -inf }
0x13e0   :  { %2966 = vmax.xlane.f32.xlu1 %v2965_v47 }
0x13e4   :  { %v3084_v48 = vpop.f32.mrb[96].mxu1 }
0x13e5   :  { %v3085_v51 = vadd.f32 %v3084_v48, %v6524_v41  ;;  %v5703_v54 = vpop.f32.mrb[97].mxu1 }
0x13e6   :  { %v3087_v55 = vpop.f32.mrb[98].mxu1 }
0x13e7   :  { %v5704_v56 = vpop.f32.mrb[99].mxu1  ;;  %v3090_v57 = vsel %vm171_vm2, %v3085_v51, -inf }
0x13e8   :  { %3091 = vmax.xlane.f32.xlu0 %v3090_v57 }
0x13ec   :  { %v3194_v58 = vpop.f32.mrb[100].mxu1 }
0x13ed   :  { %v7025_v49 = vadd.f32 %v3194_v58, %v6524_v41  ;;  %v5715_v59 = vpop.f32.mrb[101].mxu1 }
0x13ee   :  { %v3197_v60 = vpop.f32.mrb[102].mxu1 }
0x13ef   :  { %v5716_v63 = vpop.f32.mrb[103].mxu1  ;;  %v3200_v61 = vsel %vm171_vm2, %v7025_v49, -inf }
0x13f0   :  { %3201 = vmax.xlane.f32.xlu1 %v3200_v61 }
0x13f4   :  { %v3304_v1 = vpop.f32.mrb[104].mxu1 }
0x13f5   :  { %v3305_v3 = vadd.f32 %v3304_v1, %v6524_v41  ;;  %v5727_v4 = vpop.f32.mrb[105].mxu1 }
0x13f6   :  { %v3307_v2 = vpop.f32.mrb[106].mxu1 }
0x13f7   :  { %v5728_v5 = vpop.f32.mrb[107].mxu1  ;;  %v3310_v6 = vsel %vm171_vm2, %v3305_v3, -inf }
0x13f8   :  { %3311 = vmax.xlane.f32.xlu0 %v3310_v6 }
0x13fc   :  { %v3414_v7 = vpop.f32.mrb[108].mxu1 }
0x13fd   :  { %v5739_v8 = vpop.f32.mrb[109].mxu1  ;;  %v3415_v12 = vadd.f32 %v3414_v7, %v6524_v41 }
0x13fe   :  { %v3417_v9 = vpop.f32.mrb[110].mxu1 }
0x13ff   :  { %v5740_v10 = vpop.f32.mrb[111].mxu1  ;;  %v3420_v13 = vsel %vm171_vm2, %v3415_v12, -inf }
0x1401   :  { %2757 = vrot.lane.b32.xlu1 %v6940_v11, %s6309_s20 }
0x140e   :  { %2647 = vrot.lane.b32.xlu0 %v6940_v11, %s6292_s15 }
0x1425   :  { %3421 = vmax.xlane.f32.xlu1 %v3420_v13 }
0x1436   :  { %2867 = vrot.lane.b32.xlu1 %v6940_v11, %s6310_s24 }
0x1455   :  { %v2637_v15 = vpop.xlane.xlu1 %2636 }
0x1456   :  { %v2638_v17 = vsub.f32 %v2630_v24, %v2637_v15 }
0x1458   :  { %v2639_v18 = vmul.f32 1.442695, %v2638_v17 }
0x145a   :  { %6093 = vpow2.f32 %v2639_v18 }
0x145d   :  { %v2747_v19 = vpop.xlane.xlu0 %2746 }
0x145e   :  { %v2748_v20 = vsub.f32 %v2740_v50, %v2747_v19 }
0x1460   :  { %v2749_v21 = vmul.f32 1.442695, %v2748_v20 }
0x1462   :  { %6095 = vpow2.f32 %v2749_v21 }
0x1464   :  { %v7039_v14 = vpop.eup %6093 }
0x1465   :  { %v2857_v22 = vpop.xlane.xlu0 %2856  ;;  %v2641_v41 = vsel %vm171_vm2, %v7039_v14, 0.0 }
0x1466   :  { %v2858_v23 = vsub.f32 %v2850_v38, %v2857_v22  ;;  %2642 = vadd.xlane.f32.xlu0 %v2641_v41 }
0x1468   :  { %v2859_v25 = vmul.f32 1.442695, %v2858_v23 }
0x146a   :  { %6097 = vpow2.f32 %v2859_v25 }
0x146c   :  { %v7043_v26 = vpop.eup %6095 }
0x146d   :  { %v2967_v28 = vpop.xlane.xlu1 %2966  ;;  %v2751_v24 = vsel %vm171_vm2, %v7043_v26, 0.0 }
0x146e   :  { %v2968_v29 = vsub.f32 %v2960_v44, %v2967_v28  ;;  %2752 = vadd.xlane.f32.xlu1 %v2751_v24 }
0x1470   :  { %v2969_v30 = vmul.f32 1.442695, %v2968_v29 }
0x1472   :  { %6099 = vpow2.f32 %v2969_v30 }
0x1474   :  { %v7047_v50 = vpop.eup %6097 }
0x1475   :  { %v3092_v31 = vpop.xlane.xlu0 %3091  ;;  %v2861_v32 = vsel %vm171_vm2, %v7047_v50, 0.0 }
0x1476   :  { %v3093_v33 = vsub.f32 %v3085_v51, %v3092_v31  ;;  %2862 = vadd.xlane.f32.xlu0 %v2861_v32 }
0x1478   :  { %v3094_v34 = vmul.f32 1.442695, %v3093_v33 }
0x147a   :  { %6101 = vpow2.f32 %v3094_v34 }
0x147c   :  { %v7051_v35 = vpop.eup %6099 }
0x147d   :  { %v2971_v38 = vsel %vm171_vm2, %v7051_v35, 0.0  ;;  %v3202_v45 = vpop.xlane.xlu1 %3201 }
0x147e   :  { %2972 = vadd.xlane.f32.xlu1 %v2971_v38  ;;  %v3203_v47 = vsub.f32 %v7025_v49, %v3202_v45 }
0x1480   :  { %v3204_v51 = vmul.f32 1.442695, %v3203_v47 }
0x1484   :  { %v7055_v39 = vpop.eup %6101 }
0x1485   :  { %v3312_v36 = vpop.xlane.xlu0 %3311  ;;  %v3096_v40 = vsel %vm171_vm2, %v7055_v39, 0.0 }
0x1486   :  { %v3313_v37 = vsub.f32 %v3305_v3, %v3312_v36  ;;  %3097 = vadd.xlane.f32.xlu1 %v3096_v40 }
0x1488   :  { %v3314_v42 = vmul.f32 1.442695, %v3313_v37 }
0x1489   :  { %v2648_v44 = vpop.permute.xlu0 %2647 }
0x148a   :  { %6103 = vpow2.f32 %v3314_v42  ;;  %v2653_v43 = vsel %vm235_vm4, %v2648_v44, 0 }
0x148b   :  { %5658 = vmatpush3.bf16.msra.mxu0 %v2653_v43  ;;  %6105 = vpow2.f32 %v3204_v51 }
0x148c   :  { %2977 = vrot.lane.b32.xlu0 %v6940_v11, %s6311_s25  ;;  %5669 = vmatprep.subr.bf16.mxu0 %v6299_v0  ;;  %v2758_v11 = vpop.permute.xlu1 %2757 }
0x148d   :  { %v2763_v2 = vsel %vm235_vm4, %v2758_v11, 0 }
0x1494   :  { %v7063_v46 = vpop.eup %6103 }
0x1495   :  { %v3316_v48 = vsel %vm171_vm2, %v7063_v46, 0.0  ;;  %v7068_v54 = vpop.eup %6105 }
0x1496   :  { %3317 = vadd.xlane.f32.xlu1 %v3316_v48  ;;  %v3206_v55 = vsel %vm171_vm2, %v7068_v54, 0.0 }
0x14ab   :  { %3207 = vadd.xlane.f32.xlu0 %v3206_v55 }
0x14b2   :  { %v3422_v56 = vpop.xlane.xlu1 %3421 }
0x14b3   :  { %v3423_v57 = vsub.f32 %v3415_v12, %v3422_v56 }
0x14b5   :  { %v3424_v58 = vmul.f32 1.442695, %v3423_v57 }
0x14b6   :  { %v2868_v63 = vpop.permute.xlu1 %2867 }
0x14b7   :  { %6107 = vpow2.f32 %v3424_v58  ;;  %v2873_v8 = vsel %vm235_vm4, %v2868_v63, 0 }
0x14c1   :  { %v7072_v59 = vpop.eup %6107  ;;  %3212 = vrot.lane.b32.xlu0 %v6954_v62, %s6309_s20 }
0x14c2   :  { %v3426_v49 = vsel %vm171_vm2, %v7072_v59, 0.0 }
0x14c3   :  { %3427 = vadd.xlane.f32.xlu1 %v3426_v49 }
0x14c5   :  { %3322 = vrot.lane.b32.xlu0 %v6954_v62, %s6310_s24 }
0x14c9   :  { %3432 = vrot.lane.b32.xlu0 %v6954_v62, %s6311_s25 }
0x14d4   :  { %3102 = vrot.lane.b32.xlu1 %v6954_v62, %s6292_s15 }
0x14f3   :  { %v2643_v60 = vpop.xlane.xlu0 %2642 }
0x14f4   :  { %6109 = vrcp.f32 %v2643_v60 }
0x14fb   :  { %v2753_v61 = vpop.xlane.xlu1 %2752 }
0x14fc   :  { %6111 = vrcp.f32 %v2753_v61 }
0x14fe   :  { %v6110_v1 = vpop.eup %6109 }
0x14ff   :  { %v2645_v3 = vmul.f32 %v6110_v1, %v7039_v14 }
0x1501   :  { %v2646_v4 = vpack.c.bf16 %v2645_v3, %v2645_v3 }
0x1503   :  { %5660 = vmatmul.mubr.msk.bf16.vlgmr.msra.gmra.mrb[80].mxu0 %vm171_vm2, %v2646_v4  ;;  %v2863_v5 = vpop.xlane.xlu0 %2862 }
0x1504   :  { %5670 = vmatpush3.bf16.msra.mxu0 %v2763_v2  ;;  %6113 = vrcp.f32 %v2863_v5  ;;  %5671 = vmatprep.mubr.msk.bf16.mxu0 %vm6300_vm0, %v6299_v0  ;;  %v6003_v5 = vld [vmem:[#allocation5 + $0x20] sm:$0xff]  }
0x1505   :  { %5681 = vmatprep.subr.bf16.mxu0 %v6299_v0  ;;  %5748 = vmatpush3.bf16.msra.mxu1 %v6003_v5 }
0x1506   :  { %v6112_v62 = vpop.eup %6111  ;;  %5749 = vmatprep.subr.bf16.mxu1 %v6299_v0 }
0x1507   :  { %v2755_v6 = vmul.f32 %v6112_v62, %v7043_v26  ;;  %v2978_v13 = vpop.permute.xlu0 %2977 }
0x1508   :  { %v2983_v17 = vsel %vm235_vm4, %v2978_v13, 0 }
0x1509   :  { %v2756_v7 = vpack.c.bf16 %v2755_v6, %v2755_v6 }
0x150b   :  { %5672 = vmatmul.mubr.msk.bf16.vlgmr.msra.gmra.mrb[84].mxu0 %vm171_vm2, %v2756_v7  ;;  %v2973_v9 = vpop.xlane.xlu1 %2972 }
0x150c   :  { %5682 = vmatpush3.bf16.msra.mxu0 %v2873_v8  ;;  %6115 = vrcp.f32 %v2973_v9  ;;  %5683 = vmatprep.mubr.msk.bf16.mxu0 %vm6300_vm0, %v6299_v0  ;;  %v6004_v9 = vld [vmem:[#allocation5 + $0x28] sm:$0xff]  }
0x150d   :  { %5693 = vmatprep.subr.bf16.mxu0 %v6299_v0  ;;  %5750 = vmatpush3.bf16.msra.mxu1 %v6004_v9 }
0x150e   :  { %v6114_v10 = vpop.eup %6113 }
0x150f   :  { %v2865_v12 = vmul.f32 %v6114_v10, %v7047_v50 }
0x1511   :  { %v2866_v15 = vpack.c.bf16 %v2865_v12, %v2865_v12 }
0x1513   :  { %5684 = vmatmul.mubr.msk.bf16.vlgmr.msra.gmra.mrb[88].mxu0 %vm171_vm2, %v2866_v15  ;;  %v3098_v21 = vpop.xlane.xlu1 %3097 }
0x1514   :  { %5694 = vmatpush3.bf16.msra.mxu0 %v2983_v17  ;;  %5695 = vmatprep.mubr.msk.bf16.mxu0 %vm6300_vm0, %v6299_v0  ;;  %6117 = vrcp.f32 %v3098_v21 }
0x1515   :  { %5705 = vmatprep.subr.bf16.mxu0 %v6299_v0 }
0x1516   :  { %v6116_v18 = vpop.eup %6115 }
0x1517   :  { %v2975_v19 = vmul.f32 %v6116_v18, %v7051_v35 }
0x1519   :  { %v2976_v20 = vpack.c.bf16 %v2975_v19, %v2975_v19 }
0x151b   :  { %5696 = vmatmul.mubr.msk.bf16.vlgmr.msra.gmra.mrb[92].mxu0 %vm171_vm2, %v2976_v20 }
0x151c   :  { %5707 = vmatprep.mubr.msk.bf16.mxu0 %vm6300_vm0, %v6299_v0 }
0x151e   :  { %v6118_v41 = vpop.eup %6117 }
0x151f   :  { %v3100_v25 = vmul.f32 %v6118_v41, %v7055_v39 }
0x1521   :  { %v3101_v29 = vpack.c.bf16 %v3100_v25, %v3100_v25 }
0x1523   :  { %v3318_v22 = vpop.xlane.xlu1 %3317 }
0x1538   :  { %v3208_v14 = vpop.xlane.xlu0 %3207 }
0x1539   :  { %6119 = vrcp.f32 %v3208_v14 }
0x153a   :  { %6121 = vrcp.f32 %v3318_v22 }
0x153c   :  { %v3213_v24 = vpop.permute.xlu0 %3212 }
0x153d   :  { %v3218_v50 = vsel %vm235_vm4, %v3213_v24, 0 }
0x1540   :  { %v3323_v32 = vpop.permute.xlu0 %3322 }
0x1541   :  { %v3328_v35 = vsel %vm235_vm4, %v3323_v32, 0 }
0x1543   :  { %v6120_v30 = vpop.eup %6119 }
0x1544   :  { %v3210_v31 = vmul.f32 %v6120_v30, %v7068_v54  ;;  %v6122_v34 = vpop.eup %6121  ;;  %v3433_v39 = vpop.permute.xlu0 %3432 }
0x1545   :  { %v3320_v38 = vmul.f32 %v6122_v34, %v7063_v46  ;;  %v3438_v37 = vsel %vm235_vm4, %v3433_v39, 0  ;;  %v5148_v39 = vld [vmem:[#allocation8 + $0xf] ss:$0 sm:$0xff] }
0x1546   :  { %v3211_v33 = vpack.c.bf16 %v3210_v31, %v3210_v31 }
0x1547   :  { %v3321_v36 = vpack.c.bf16 %v3320_v38, %v3320_v38 }
0x1550   :  { %v3428_v23 = vpop.xlane.xlu1 %3427 }
0x1551   :  { %6123 = vrcp.f32 %v3428_v23 }
0x1554   :  { %v3103_v26 = vpop.permute.xlu1 %3102 }
0x1555   :  { %v3108_v28 = vsel %vm235_vm4, %v3103_v26, 0 }
0x1556   :  { %5706 = vmatpush3.bf16.msra.mxu0 %v3108_v28 }
0x1557   :  { %5717 = vmatprep.subr.bf16.mxu0 %v6299_v0 }
0x1559   :  { %5708 = vmatmul.mubr.msk.bf16.vlgmr.msra.gmra.mrb[96].mxu0 %vm171_vm2, %v3101_v29 }
0x155a   :  { %5718 = vmatpush3.bf16.msra.mxu0 %v3218_v50  ;;  %5719 = vmatprep.mubr.msk.bf16.mxu0 %vm6300_vm0, %v6299_v0 }
0x155b   :  { %5729 = vmatprep.subr.bf16.mxu0 %v6299_v0  ;;  %v6124_v40 = vpop.eup %6123 }
0x155c   :  { %v3430_v42 = vmul.f32 %v6124_v40, %v7072_v59 }
0x155e   :  { %v3431_v44 = vpack.c.bf16 %v3430_v42, %v3430_v42 }
0x1561   :  { %5720 = vmatmul.mubr.msk.bf16.vlgmr.msra.gmra.mrb[100].mxu0 %vm171_vm2, %v3211_v33 }
0x1562   :  { %5730 = vmatpush3.bf16.msra.mxu0 %v3328_v35  ;;  %5731 = vmatprep.mubr.msk.bf16.mxu0 %vm6300_vm0, %v6299_v0 }
0x1563   :  { %5741 = vmatprep.subr.bf16.mxu0 %v6299_v0 }
0x1569   :  { %5732 = vmatmul.mubr.msk.bf16.vlgmr.msra.gmra.mrb[104].mxu0 %vm171_vm2, %v3321_v36 }
0x156a   :  { %5742 = vmatpush3.bf16.msra.mxu0 %v3438_v37  ;;  %5743 = vmatprep.mubr.msk.bf16.mxu0 %vm6300_vm0, %v6299_v0 }
0x156b   :  { %5755 = vmatprep.subr.bf16.mxu0 %v6299_v0 }
0x1571   :  { %5744 = vmatmul.mubr.msk.bf16.vlgmr.msra.gmra.mrb[108].mxu0 %vm171_vm2, %v3431_v44 }
0x1572   :  { %5759 = vmatprep.mubr.msk.bf16.mxu0 %vm6300_vm0, %v6299_v0 }
0x15d6   :  { %v2689_v43 = vpop.f32.mrb[80].mxu0 }
0x15d7   :  { %v5661_v45 = vpop.f32.mrb[81].mxu0 }
0x15d8   :  { %v2692_v46 = vpop.f32.mrb[82].mxu0 }
0x15d9   :  { %v5662_v47 = vpop.f32.mrb[83].mxu0 }
0x15de   :  { %v2799_v48 = vpop.f32.mrb[84].mxu0 }
0x15df   :  { %v5673_v51 = vpop.f32.mrb[85].mxu0 }
0x15e0   :  { %v2802_v54 = vpop.f32.mrb[86].mxu0 }
0x15e1   :  { %v5674_v55 = vpop.f32.mrb[87].mxu0 }
0x15e6   :  { %v2909_v11 = vpop.f32.mrb[88].mxu0 }
0x15e7   :  { %v5685_v56 = vpop.f32.mrb[89].mxu0 }
0x15e8   :  { %v2912_v57 = vpop.f32.mrb[90].mxu0 }
0x15e9   :  { %v5686_v58 = vpop.f32.mrb[91].mxu0 }
0x15ee   :  { %v3019_v59 = vpop.f32.mrb[92].mxu0 }
0x15ef   :  { %v5697_v49 = vpop.f32.mrb[93].mxu0 }
0x15f0   :  { %v3022_v60 = vpop.f32.mrb[94].mxu0 }
0x15f1   :  { %v5698_v63 = vpop.f32.mrb[95].mxu0 }
0x15f2   :  { %v5158_v63 = vld [vmem:[#allocation8 + $0xd] ss:$0 sm:$0xff] }
0x162c   :  { %v3144_v61 = vpop.f32.mrb[96].mxu0 }
0x162d   :  { %v5709_v1 = vpop.f32.mrb[97].mxu0 }
0x162e   :  { %v3147_v3 = vpop.f32.mrb[98].mxu0 }
0x162f   :  { %v5710_v4 = vpop.f32.mrb[99].mxu0 }
0x1634   :  { %v3254_v2 = vpop.f32.mrb[100].mxu0 }
0x1635   :  { %v5957_v62 = vpack.i.bf16 %v3254_v2, %v2799_v48  ;;  %v5721_v6 = vpop.f32.mrb[101].mxu0 }
0x1636   :  { %v3257_v7 = vpop.f32.mrb[102].mxu0 }
0x1637   :  { %5958 = vrot.lane.b32.xlu1 %v5957_v62, %s6296_s28  ;;  %v5722_v8 = vpop.f32.mrb[103].mxu0 }
0x1638   :  { %v5152_v8 = vld [vmem:[#allocation8 + $0x12] ss:$0 sm:$0xff] }
0x163c   :  { %v3364_v10 = vpop.f32.mrb[104].mxu0 }
0x163d   :  { %v5962_v12 = vpack.i.bf16 %v3364_v10, %v2909_v11  ;;  %v5733_v13 = vpop.f32.mrb[105].mxu0 }
0x163e   :  { %v3367_v15 = vpop.f32.mrb[106].mxu0  ;;  %v5153_v13 = vld [vmem:[#allocation8 + $0x13] ss:$0 sm:$0xff] }
0x163f   :  { %5963 = vrot.lane.b32.xlu0 %v5962_v12, %s6312_s26  ;;  %v5734_v17 = vpop.f32.mrb[107].mxu0 }
0x1644   :  { %v3474_v18 = vpop.f32.mrb[108].mxu0 }
0x1645   :  { %v5967_v19 = vpack.i.bf16 %v3474_v18, %v3019_v59  ;;  %v5745_v20 = vpop.f32.mrb[109].mxu0 }
0x1646   :  { %v3477_v21 = vpop.f32.mrb[110].mxu0 }
0x1647   :  { %5968 = vrot.lane.b32.xlu1 %v5967_v19, %s6313_s27  ;;  %v5746_v14 = vpop.f32.mrb[111].mxu0 }
0x16a9   :  { %v5959_v22 = vpop.permute.xlu1 %5958 }
0x16aa   :  { %v5961_v23 = vunpack.i.h.bf16 %v5959_v22  ;;  %v5960_v25 = vunpack.i.l.bf16 %v5959_v22 }
0x16ac   :  { %v3492_v29 = vsel %vm171_vm2, %v3144_v61, %v5961_v23  ;;  %v3037_v30 = vsel %vm171_vm2, %v2689_v43, %v5960_v25 }
0x16b1   :  { %v5964_v41 = vpop.permute.xlu0 %5963 }
0x16b2   :  { %v5966_v26 = vunpack.i.h.bf16 %v5964_v41  ;;  %v5965_v28 = vunpack.i.l.bf16 %v5964_v41 }
0x16b4   :  { %v3493_v32 = vsel %vm622_vm5, %v3492_v29, %v5966_v26  ;;  %v3038_v33 = vsel %vm622_vm5, %v3037_v30, %v5965_v28 }
0x16b9   :  { %v5969_v24 = vpop.permute.xlu1 %5968 }
0x16ba   :  { %v5971_v50 = vunpack.i.h.bf16 %v5969_v24  ;;  %v5970_v31 = vunpack.i.l.bf16 %v5969_v24 }
0x16bc   :  { %v3494_v34 = vsel %vm624_vm6, %v3493_v32, %v5971_v50  ;;  %v3039_v35 = vsel %vm624_vm6, %v3038_v33, %v5970_v31 }
0x16bd   :  { %v3495_v38 = vpack.c.bf16 %v3494_v34, %v3039_v35 }
0x16bf   :  { %5752 = vmatmul.mubr.msk.bf16.vlgmr.msra.gmra.mrb[112].mxu1 %vm122_vm1, %v3495_v38 }
0x16c0   :  { %5767 = vmatprep.mubr.msk.bf16.mxu1 %vm122_vm1, %v6683_v16  ;;  %v6005_v16 = vld [vmem:[%s7418_s2 + $0x30] sm:$0xff]  }
0x16c1   :  { %5756 = vmatpush3.bf16.msra.mxu0 %v6005_v16 }
0x16c2   :  { %5757 = vmatprep.subr.bf16.mxu0 %v6299_v0 }
0x1792   :  { %v3555_v36 = vpop.f32.mrb[112].mxu1 }
0x1793   :  { %v3556_v40 = vadd.f32 %v5148_v39, %v3555_v36  ;;  %v5753_v37 = vpop.f32.mrb[113].mxu1 }
0x1794   :  { %v3558_v42 = vpop.f32.mrb[114].mxu1 }
0x1795   :  { %v3562_v44 = vadd.f32 %v3556_v40, %v6931_v52  ;;  %v3559_v43 = vadd.f32 %v5148_v39, %v3558_v42  ;;  %v5754_v45 = vpop.f32.mrb[115].mxu1  ;;  %v6006_v52 = vld [vmem:[%s7418_s2 + $0x38] sm:$0xff]  }
0x1796   :  { %5758 = vmatpush3.bf16.msra.mxu0 %v6006_v52 }
0x1797   :  { %v3563_v46 = vadd.f32 %v3559_v43, %v6933_v53  ;;  %v3566_v47 = vsel %vm122_vm1, %v3562_v44, 0.0  ;;  %5771 = vmatprep.subr.bf16.mxu0 %v6299_v0 }
0x1798   :  { %3567 = vadd.xlane.f32.xlu0 %v3566_v47 }
0x1799   :  { %v3569_v48 = vsel %vm122_vm1, %v3563_v46, 0.0 }
0x179a   :  { %3570 = vadd.xlane.f32.xlu1 %v3569_v48 }
0x17ab   :  { %3671 = vrot.lane.b32.xlu1 %v6005_v16, %s6302_s18 }
0x17af   :  { %3678 = vrot.lane.b32.xlu1 %v5158_v63, %s6302_s18 }
0x1825   :  { %v3568_v53 = vpop.xlane.xlu0 %3567 }
0x1826   :  { %v3572_v51 = vmul.f32 0.03125, %v3568_v53 }
0x1827   :  { %v3571_v54 = vpop.xlane.xlu1 %3570 }
0x1828   :  { %v3574_v55 = vsub.f32 %v3562_v44, %v3572_v51  ;;  %v3573_v11 = vmul.f32 0.03125, %v3571_v54 }
0x182a   :  { %v3575_v56 = vsub.f32 %v3563_v46, %v3573_v11  ;;  %v3576_v57 = vmul.f32 %v3574_v55, %v3574_v55 }
0x182b   :  { %v3672_v60 = vpop.permute.xlu1 %3671 }
0x182c   :  { %v3578_v58 = vsel %vm122_vm1, %v3576_v57, 0.0  ;;  %v3577_v59 = vmul.f32 %v3575_v56, %v3575_v56  ;;  %5763 = vmatprep.subr.bf16.mxu1 %v3672_v60 }
0x182d   :  { %3579 = vadd.xlane.f32.xlu0 %v3578_v58  ;;  %5764 = vmatpush3.bf16.msra.mxu1 %v3672_v60 }
0x182e   :  { %v3581_v49 = vsel %vm122_vm1, %v3577_v59, 0.0 }
0x1831   :  { %3582 = vadd.xlane.f32.xlu0 %v3581_v49 }
0x1847   :  { %3673 = vrot.lane.b32.xlu0 %v6006_v52, %s6302_s18 }
0x18ba   :  { %v3580_v61 = vpop.xlane.xlu0 %3579 }
0x18bb   :  { %v3584_v1 = vmul.f32 0.03125, %v3580_v61 }
0x18bd   :  { %v3586_v3 = vadd.f32 1e-05, %v3584_v1 }
0x18be   :  { %v3583_v4 = vpop.xlane.xlu0 %3582 }
0x18bf   :  { %6125 = vrsqrt.f32 %v3586_v3  ;;  %v3585_v2 = vmul.f32 0.03125, %v3583_v4 }
0x18c1   :  { %v3587_v5 = vadd.f32 1e-05, %v3585_v2 }
0x18c2   :  { %v3674_v62 = vpop.permute.xlu0 %3673 }
0x18c3   :  { %6127 = vrsqrt.f32 %v3587_v5  ;;  %5765 = vmatprep.subr.bf16.mxu1 %v3674_v62 }
0x18c4   :  { %5766 = vmatpush3.bf16.msra.mxu1 %v3674_v62 }
0x18c5   :  { %5777 = vmatprep.subr.bf16.mxu1 %v6299_v0 }
0x18c7   :  { %5768 = vmatmul.mubr.msk.bf16.vlgmr.msra.gmra.mrb[116].mxu1 %vm122_vm1, %v6697_v27  ;;  %v3679_v27 = vpop.permute.xlu1 %3678 }
0x18c8   :  { %5779 = vmatprep.mubr.msk.bf16.mxu1 %vm6300_vm0, %v6299_v0 }
0x18c9   :  { %v6126_v6 = vpop.eup %6125 }
0x18ca   :  { %v3590_v7 = vmul.f32 %v6126_v6, %v3574_v55 }
0x18cc   :  { %v3596_v10 = vmul.f32 %v5152_v8, %v3590_v7 }
0x18cd   :  { %v6128_v9 = vpop.eup %6127 }
0x18ce   :  { %v3591_v12 = vmul.f32 %v6128_v9, %v3575_v56  ;;  %v7165_v17 = vadd.f32 %v5153_v13, %v3596_v10 }
0x18d0   :  { %v3597_v15 = vmul.f32 %v5152_v8, %v3591_v12 }
0x18d2   :  { %v7167_v18 = vadd.f32 %v5153_v13, %v3597_v15 }
0x18d4   :  { %v3609_v19 = vpack.c.bf16 %v7167_v18, %v7165_v17 }
0x18d6   :  { %5760 = vmatmul.mubr.msk.bf16.vlgmr.msra.gmra.mrb[112].mxu0 %vm122_vm1, %v3609_v19 }
0x18d7   :  { %5773 = vmatprep.mubr.msk.bf16.mxu0 %vm6300_vm0, %v6299_v0 }
0x199a   :  { %v5769_v20 = vpop.f32.mrb[116].mxu1 }
0x199b   :  { %v3715_v21 = vpop.f32.mrb[117].mxu1  ;;  %v3724_v14 = vadd.f32 %v5769_v20, %v3679_v27 }
0x199c   :  { %v5770_v22 = vpop.f32.mrb[118].mxu1  ;;  %v3716_v41 = vadd.f32 %v3715_v21, %v3679_v27 }
0x199d   :  { %v3727_v23 = vadd.f32 %v5770_v22, %v3679_v27  ;;  %v3718_v25 = vpop.f32.mrb[119].mxu1 }
0x199e   :  { %v3719_v26 = vadd.f32 %v3718_v25, %v3679_v27 }
0x199f   :  { %v7174_v28 = vpack.c.bf16 %v3727_v23, %v3724_v14 }
0x19a0   :  { %v7176_v24 = vpack.c.bf16 %v3719_v26, %v3716_v41 }
0x19a1   :  { %v4183_v47 = vsel %vm171_vm2, %v7174_v28, 0 }
0x19a2   :  { %3840 = vrot.lane.b32.xlu1 %v7176_v24, %s6301_s17  ;;  %v3736_v29 = vsel %vm171_vm2, %v7176_v24, 0 }
0x19a3   :  { %5772 = vmatpush3.bf16.xpose.msra.mxu0 %v3736_v29 }
0x19a4   :  { %5783 = vmatprep.subr.bf16.mxu0 %v6299_v0 }
0x19a6   :  { %3948 = vrot.lane.b32.xlu1 %v7176_v24, %s6306_s23 }
0x19a9   :  { %v3664_v30 = vpop.f32.mrb[112].mxu0 }
0x19aa   :  { %v3665_v50 = vadd.f32 %v5158_v63, %v3664_v30  ;;  %4056 = vrot.lane.b32.xlu1 %v7176_v24, %s6307_s0  ;;  %v5761_v31 = vpop.f32.mrb[113].mxu0 }
0x19ab   :  { %v3667_v32 = vpop.f32.mrb[114].mxu0 }
0x19ac   :  { %v3730_v33 = vpack.c.bf16 %v3665_v50, %v3665_v50  ;;  %v5762_v34 = vpop.f32.mrb[115].mxu0  ;;  %v3668_v35 = vadd.f32 %v5158_v63, %v3667_v32 }
0x19ae   :  { %4287 = vrot.lane.b32.xlu1 %v7174_v28, %s6301_s17  ;;  %3838 = vrot.lane.b32.xlu0 %v3730_v33, %s6301_s17  ;;  %v4177_v38 = vpack.c.bf16 %v3668_v35, %v3668_v35 }
0x19af   :  { %5774 = vmatmul.mubr.msk.bf16.vlgmr.msra.gmra.mrb[116].mxu0 %vm171_vm2, %v3730_v33 }
0x19b0   :  { %5785 = vmatprep.mubr.msk.bf16.mxu0 %vm6300_vm0, %v6299_v0 }
0x19b2   :  { %4395 = vrot.lane.b32.xlu1 %v7174_v28, %s6306_s23  ;;  %3946 = vrot.lane.b32.xlu0 %v3730_v33, %s6306_s23 }
0x19b6   :  { %4503 = vrot.lane.b32.xlu1 %v7174_v28, %s6307_s0  ;;  %4054 = vrot.lane.b32.xlu0 %v3730_v33, %s6307_s0 }
0x19ba   :  { %4285 = vrot.lane.b32.xlu0 %v4177_v38, %s6301_s17 }
0x19be   :  { %4393 = vrot.lane.b32.xlu0 %v4177_v38, %s6306_s23 }
0x19c2   :  { %4501 = vrot.lane.b32.xlu0 %v4177_v38, %s6307_s0 }
0x1a14   :  { %v3841_v39 = vpop.permute.xlu1 %3840 }
0x1a15   :  { %v3846_v36 = vsel %vm171_vm2, %v3841_v39, 0 }
0x1a16   :  { %5784 = vmatpush3.bf16.xpose.msra.mxu0 %v3846_v36 }
0x1a17   :  { %5795 = vmatprep.subr.bf16.mxu0 %v6299_v0 }
0x1a18   :  { %v3949_v40 = vpop.permute.xlu1 %3948 }
0x1a19   :  { %v3954_v42 = vsel %vm171_vm2, %v3949_v40, 0 }
0x1a1c   :  { %v4057_v44 = vpop.permute.xlu1 %4056 }
0x1a1d   :  { %v4062_v45 = vsel %vm171_vm2, %v4057_v44, 0 }
0x1a20   :  { %v3839_v37 = vpop.permute.xlu0 %3838  ;;  %v4288_v48 = vpop.permute.xlu1 %4287 }
0x1a21   :  { %5786 = vmatmul.mubr.msk.bf16.vlgmr.msra.gmra.mrb[120].mxu0 %vm171_vm2, %v3839_v37  ;;  %v4293_v16 = vsel %vm171_vm2, %v4288_v48, 0 }
0x1a22   :  { %5796 = vmatpush3.bf16.xpose.msra.mxu0 %v3954_v42  ;;  %5797 = vmatprep.mubr.msk.bf16.mxu0 %vm6300_vm0, %v6299_v0 }
0x1a23   :  { %5807 = vmatprep.subr.bf16.mxu0 %v6299_v0 }
0x1a24   :  { %v3947_v43 = vpop.permute.xlu0 %3946  ;;  %v4396_v52 = vpop.permute.xlu1 %4395 }
0x1a25   :  { %v4401_v51 = vsel %vm171_vm2, %v4396_v52, 0 }
0x1a28   :  { %v4055_v46 = vpop.permute.xlu0 %4054  ;;  %v4504_v54 = vpop.permute.xlu1 %4503 }
0x1a29   :  { %5798 = vmatmul.mubr.msk.bf16.vlgmr.msra.gmra.mrb[124].mxu0 %vm171_vm2, %v3947_v43  ;;  %v4509_v11 = vsel %vm171_vm2, %v4504_v54, 0 }
0x1a2a   :  { %5808 = vmatpush3.bf16.xpose.msra.mxu0 %v4062_v45  ;;  %5809 = vmatprep.mubr.msk.bf16.mxu0 %vm6300_vm0, %v6299_v0 }
0x1a2b   :  { %5819 = vmatprep.subr.bf16.mxu0 %v6299_v0 }
0x1a2c   :  { %v4286_v53 = vpop.permute.xlu0 %4285 }
0x1a30   :  { %v4394_v55 = vpop.permute.xlu0 %4393 }
0x1a31   :  { %5810 = vmatmul.mubr.msk.bf16.vlgmr.msra.gmra.mrb[128].mxu0 %vm171_vm2, %v4055_v46 }
0x1a32   :  { %5820 = vmatpush3.bf16.xpose.msra.mxu0 %v4183_v47  ;;  %5821 = vmatprep.mubr.msk.bf16.mxu0 %vm6300_vm0, %v6299_v0 }
0x1a33   :  { %5831 = vmatprep.subr.bf16.mxu0 %v6299_v0 }
0x1a34   :  { %v4502_v56 = vpop.permute.xlu0 %4501 }
0x1a39   :  { %5822 = vmatmul.mubr.msk.bf16.vlgmr.msra.gmra.mrb[132].mxu0 %vm171_vm2, %v4177_v38 }
0x1a3a   :  { %5832 = vmatpush3.bf16.xpose.msra.mxu0 %v4293_v16  ;;  %5833 = vmatprep.mubr.msk.bf16.mxu0 %vm6300_vm0, %v6299_v0 }
0x1a3b   :  { %5843 = vmatprep.subr.bf16.mxu0 %v6299_v0 }
0x1a41   :  { %5834 = vmatmul.mubr.msk.bf16.vlgmr.msra.gmra.mrb[136].mxu0 %vm171_vm2, %v4286_v53 }
0x1a42   :  { %5844 = vmatpush3.bf16.xpose.msra.mxu0 %v4401_v51  ;;  %5845 = vmatprep.mubr.msk.bf16.mxu0 %vm6300_vm0, %v6299_v0 }
0x1a43   :  { %5855 = vmatprep.subr.bf16.mxu0 %v6299_v0 }
0x1a49   :  { %5846 = vmatmul.mubr.msk.bf16.vlgmr.msra.gmra.mrb[140].mxu0 %vm171_vm2, %v4394_v55 }
0x1a4a   :  { %5856 = vmatpush3.bf16.xpose.msra.mxu0 %v4509_v11  ;;  %5857 = vmatprep.mubr.msk.bf16.mxu0 %vm6300_vm0, %v6299_v0 }
0x1a4b   :  { %5867 = vmatprep.subr.bf16.mxu0 %v6299_v0 }
0x1a51   :  { %5858 = vmatmul.mubr.msk.bf16.vlgmr.msra.gmra.mrb[144].mxu0 %vm171_vm2, %v4502_v56 }
0x1a52   :  { %5871 = vmatprep.mubr.msk.bf16.mxu0 %vm6300_vm0, %v6299_v0 }
0x1a82   :  { %v3772_v57 = vpop.f32.mrb[116].mxu0 }
0x1a83   :  { %v5775_v58 = vpop.f32.mrb[117].mxu0  ;;  %v3778_v59 = vsel %vm622_vm5, %v3772_v57, -inf }
0x1a84   :  { %3779 = vmax.xlane.f32.xlu1 %v3778_v59  ;;  %v3775_v49 = vpop.f32.mrb[118].mxu0 }
0x1a85   :  { %v5776_v60 = vpop.f32.mrb[119].mxu0 }
0x1af4   :  { %v3882_v63 = vpop.f32.mrb[120].mxu0 }
0x1af5   :  { %v5787_v61 = vpop.f32.mrb[121].mxu0  ;;  %v3888_v1 = vsel %vm622_vm5, %v3882_v63, -inf }
0x1af6   :  { %3889 = vmax.xlane.f32.xlu0 %v3888_v1  ;;  %v3885_v3 = vpop.f32.mrb[122].mxu0 }
0x1af7   :  { %v5788_v4 = vpop.f32.mrb[123].mxu0 }
0x1afc   :  { %v3990_v2 = vpop.f32.mrb[124].mxu0 }
0x1afd   :  { %v5799_v5 = vpop.f32.mrb[125].mxu0  ;;  %v3996_v62 = vsel %vm622_vm5, %v3990_v2, -inf }
0x1afe   :  { %3997 = vmax.xlane.f32.xlu0 %v3996_v62  ;;  %v3993_v6 = vpop.f32.mrb[126].mxu0 }
0x1aff   :  { %v5800_v7 = vpop.f32.mrb[127].mxu0 }
0x1b04   :  { %v4098_v8 = vpop.f32.mrb[128].mxu0 }
0x1b05   :  { %v5811_v9 = vpop.f32.mrb[129].mxu0  ;;  %v4104_v10 = vsel %vm622_vm5, %v4098_v8, -inf }
0x1b06   :  { %4105 = vmax.xlane.f32.xlu1 %v4104_v10  ;;  %v4101_v12 = vpop.f32.mrb[130].mxu0 }
0x1b07   :  { %v5812_v13 = vpop.f32.mrb[131].mxu0 }
0x1b0c   :  { %v4219_v15 = vpop.f32.mrb[132].mxu0 }
0x1b0d   :  { %v5823_v19 = vpop.f32.mrb[133].mxu0  ;;  %v4225_v27 = vsel %vm622_vm5, %v4219_v15, -inf }
0x1b0e   :  { %4226 = vmax.xlane.f32.xlu0 %v4225_v27  ;;  %v4222_v20 = vpop.f32.mrb[134].mxu0 }
0x1b0f   :  { %v5824_v21 = vpop.f32.mrb[135].mxu0 }
0x1b11   :  { %v3780_v38 = vpop.xlane.xlu1 %3779 }
0x1b12   :  { %v3781_v39 = vsub.f32 %v3772_v57, %v3780_v38 }
0x1b14   :  { %v7243_v14 = vpop.f32.mrb[136].mxu0  ;;  %v3782_v36 = vmul.f32 1.442695, %v3781_v39 }
0x1b15   :  { %v5835_v22 = vpop.f32.mrb[137].mxu0  ;;  %v4335_v41 = vsel %vm622_vm5, %v7243_v14, -inf }
0x1b16   :  { %4336 = vmax.xlane.f32.xlu1 %v4335_v41  ;;  %v4332_v23 = vpop.f32.mrb[138].mxu0  ;;  %6129 = vpow2.f32 %v3782_v36 }
0x1b17   :  { %v5836_v25 = vpop.f32.mrb[139].mxu0 }
0x1b1c   :  { %v4437_v26 = vpop.f32.mrb[140].mxu0 }
0x1b1d   :  { %v5847_v29 = vpop.f32.mrb[141].mxu0  ;;  %v4443_v30 = vsel %vm622_vm5, %v4437_v26, -inf }
0x1b1e   :  { %4444 = vmax.xlane.f32.xlu0 %v4443_v30  ;;  %v4440_v50 = vpop.f32.mrb[142].mxu0 }
0x1b1f   :  { %v5848_v31 = vpop.f32.mrb[143].mxu0 }
0x1b20   :  { %v7256_v37 = vpop.eup %6129 }
0x1b21   :  { %v3784_v42 = vsel %vm622_vm5, %v7256_v37, 0.0 }
0x1b24   :  { %v7248_v32 = vpop.f32.mrb[144].mxu0 }
0x1b25   :  { %v5859_v33 = vpop.f32.mrb[145].mxu0  ;;  %v4551_v40 = vsel %vm622_vm5, %v7248_v32, -inf }
0x1b26   :  { %v4548_v34 = vpop.f32.mrb[146].mxu0 }
0x1b27   :  { %3900 = vrot.lane.b32.xlu1 %v7176_v24, %s6304_s21  ;;  %v5860_v35 = vpop.f32.mrb[147].mxu0 }
0x1b34   :  { %3791 = vrot.lane.b32.xlu0 %v7176_v24, %s6302_s18 }
0x1b4b   :  { %4552 = vmax.xlane.f32.xlu1 %v4551_v40 }
0x1b53   :  { %3785 = vadd.xlane.f32.xlu0 %v3784_v42 }
0x1b5c   :  { %4008 = vrot.lane.b32.xlu1 %v7176_v24, %s6303_s19 }
0x1b83   :  { %v3890_v44 = vpop.xlane.xlu0 %3889 }
0x1b84   :  { %v3891_v43 = vsub.f32 %v3882_v63, %v3890_v44 }
0x1b86   :  { %v3892_v45 = vmul.f32 1.442695, %v3891_v43 }
0x1b88   :  { %6131 = vpow2.f32 %v3892_v45 }
0x1b8b   :  { %v3998_v46 = vpop.xlane.xlu0 %3997 }
0x1b8c   :  { %v3999_v47 = vsub.f32 %v3990_v2, %v3998_v46 }
0x1b8e   :  { %v4000_v48 = vmul.f32 1.442695, %v3999_v47 }
0x1b90   :  { %6133 = vpow2.f32 %v4000_v48 }
0x1b92   :  { %v7262_v16 = vpop.eup %6131 }
0x1b93   :  { %v4106_v52 = vpop.xlane.xlu1 %4105  ;;  %v3894_v53 = vsel %vm622_vm5, %v7262_v16, 0.0 }
0x1b94   :  { %v4107_v51 = vsub.f32 %v4098_v8, %v4106_v52  ;;  %3895 = vadd.xlane.f32.xlu1 %v3894_v53 }
0x1b96   :  { %v4108_v54 = vmul.f32 1.442695, %v4107_v51 }
0x1b98   :  { %6135 = vpow2.f32 %v4108_v54 }
0x1b9a   :  { %v7266_v55 = vpop.eup %6133 }
0x1b9b   :  { %v4227_v11 = vpop.xlane.xlu0 %4226  ;;  %v4002_v56 = vsel %vm622_vm5, %v7266_v55, 0.0 }
0x1b9c   :  { %v4228_v57 = vsub.f32 %v4219_v15, %v4227_v11  ;;  %4003 = vadd.xlane.f32.xlu0 %v4002_v56 }
0x1b9e   :  { %v4229_v58 = vmul.f32 1.442695, %v4228_v57 }
0x1ba0   :  { %6137 = vpow2.f32 %v4229_v58 }
0x1ba2   :  { %v7270_v59 = vpop.eup %6135 }
0x1ba3   :  { %v4110_v49 = vsel %vm622_vm5, %v7270_v59, 0.0  ;;  %v4337_v2 = vpop.xlane.xlu1 %4336 }
0x1ba4   :  { %4111 = vadd.xlane.f32.xlu1 %v4110_v49  ;;  %v4338_v62 = vsub.f32 %v7243_v14, %v4337_v2 }
0x1ba6   :  { %v4339_v7 = vmul.f32 1.442695, %v4338_v62 }
0x1ba7   :  { %v3901_v10 = vpop.permute.xlu1 %3900 }
0x1baa   :  { %v7274_v60 = vpop.eup %6137 }
0x1bab   :  { %v4445_v63 = vpop.xlane.xlu0 %4444  ;;  %v4231_v61 = vsel %vm622_vm5, %v7274_v60, 0.0 }
0x1bac   :  { %v4446_v1 = vsub.f32 %v4437_v26, %v4445_v63  ;;  %4232 = vadd.xlane.f32.xlu1 %v4231_v61 }
0x1bae   :  { %v4447_v3 = vmul.f32 1.442695, %v4446_v1 }
0x1baf   :  { %v3792_v4 = vpop.permute.xlu0 %3791 }
0x1bb0   :  { %6139 = vpow2.f32 %v4447_v3  ;;  %5778 = vmatpush3.bf16.msra.mxu1 %v3792_v4 }
0x1bb1   :  { %5789 = vmatprep.subr.bf16.mxu1 %v6299_v0  ;;  %6141 = vpow2.f32 %v4339_v7 }
0x1bb2   :  { %4116 = vrot.lane.b32.xlu0 %v7176_v24, %s6305_s22 }
0x1bba   :  { %v7281_v5 = vpop.eup %6139 }
0x1bbb   :  { %v4449_v6 = vsel %vm622_vm5, %v7281_v5, 0.0  ;;  %v7286_v8 = vpop.eup %6141 }
0x1bbc   :  { %4450 = vadd.xlane.f32.xlu1 %v4449_v6  ;;  %v4341_v9 = vsel %vm622_vm5, %v7286_v8, 0.0 }
0x1bd1   :  { %4342 = vadd.xlane.f32.xlu0 %v4341_v9 }
0x1bd8   :  { %v4553_v12 = vpop.xlane.xlu1 %4552 }
0x1bd9   :  { %v4554_v24 = vsub.f32 %v7248_v32, %v4553_v12 }
0x1bdb   :  { %v4555_v13 = vmul.f32 1.442695, %v4554_v24 }
0x1bdc   :  { %v4009_v22 = vpop.permute.xlu1 %4008 }
0x1bdd   :  { %6143 = vpow2.f32 %v4555_v13 }
0x1be0   :  { %v3786_v15 = vpop.xlane.xlu0 %3785 }
0x1be1   :  { %6145 = vrcp.f32 %v3786_v15  ;;  %v6007_v15 = vld [vmem:[#allocation5 + $0x30] sm:$0xff]  }
0x1be2   :  { %5868 = vmatpush3.bf16.msra.mxu0 %v6007_v15 }
0x1be3   :  { %5869 = vmatprep.subr.bf16.mxu0 %v6299_v0 }
0x1be7   :  { %v7291_v19 = vpop.eup %6143  ;;  %4347 = vrot.lane.b32.xlu0 %v7174_v28, %s6304_s21 }
0x1be8   :  { %v4557_v27 = vsel %vm622_vm5, %v7291_v19, 0.0 }
0x1be9   :  { %4558 = vadd.xlane.f32.xlu1 %v4557_v27 }
0x1beb   :  { %v6146_v20 = vpop.eup %6145  ;;  %4455 = vrot.lane.b32.xlu0 %v7174_v28, %s6303_s19 }
0x1bec   :  { %v3788_v21 = vmul.f32 %v6146_v20, %v7256_v37 }
0x1bee   :  { %v3789_v14 = vpack.c.bf16 %v3788_v21, %v3788_v21 }
0x1bef   :  { %4563 = vrot.lane.b32.xlu0 %v7174_v28, %s6305_s22 }
0x1bf0   :  { %5780 = vmatmul.mubr.msk.bf16.vlgmr.msra.gmra.mrb[120].mxu1 %vm622_vm5, %v3789_v14  ;;  %v6008_v14 = vld [vmem:[#allocation5 + $0x38] sm:$0xff]  }
0x1bf1   :  { %5790 = vmatpush3.bf16.msra.mxu1 %v3901_v10  ;;  %5791 = vmatprep.mubr.msk.bf16.mxu1 %vm6300_vm0, %v6299_v0 }
0x1bf2   :  { %5801 = vmatprep.subr.bf16.mxu1 %v6299_v0  ;;  %5870 = vmatpush3.bf16.msra.mxu0 %v6008_v14 }
0x1bf3   :  { %5883 = vmatprep.subr.bf16.mxu0 %v6299_v0 }
0x1bfa   :  { %4238 = vrot.lane.b32.xlu1 %v7174_v28, %s6302_s18 }
0x1c21   :  { %v3896_v41 = vpop.xlane.xlu1 %3895 }
0x1c22   :  { %6147 = vrcp.f32 %v3896_v41 }
0x1c29   :  { %v4004_v23 = vpop.xlane.xlu0 %4003 }
0x1c2a   :  { %6149 = vrcp.f32 %v4004_v23 }
0x1c2c   :  { %v6148_v25 = vpop.eup %6147 }
0x1c2d   :  { %v3898_v26 = vmul.f32 %v6148_v25, %v7262_v16  ;;  %v4117_v32 = vpop.permute.xlu0 %4116 }
0x1c2f   :  { %v3899_v29 = vpack.c.bf16 %v3898_v26, %v3898_v26 }
0x1c31   :  { %5792 = vmatmul.mubr.msk.bf16.vlgmr.msra.gmra.mrb[124].mxu1 %vm622_vm5, %v3899_v29  ;;  %v4112_v30 = vpop.xlane.xlu1 %4111 }
0x1c32   :  { %5802 = vmatpush3.bf16.msra.mxu1 %v4009_v22  ;;  %6151 = vrcp.f32 %v4112_v30  ;;  %5803 = vmatprep.mubr.msk.bf16.mxu1 %vm6300_vm0, %v6299_v0 }
0x1c33   :  { %5813 = vmatprep.subr.bf16.mxu1 %v6299_v0 }
0x1c34   :  { %v6150_v28 = vpop.eup %6149 }
0x1c35   :  { %v4006_v50 = vmul.f32 %v6150_v28, %v7266_v55 }
0x1c37   :  { %v4007_v31 = vpack.c.bf16 %v4006_v50, %v4006_v50 }
0x1c39   :  { %5804 = vmatmul.mubr.msk.bf16.vlgmr.msra.gmra.mrb[128].mxu1 %vm622_vm5, %v4007_v31  ;;  %v4233_v38 = vpop.xlane.xlu1 %4232 }
0x1c3a   :  { %5814 = vmatpush3.bf16.msra.mxu1 %v4117_v32  ;;  %5815 = vmatprep.mubr.msk.bf16.mxu1 %vm6300_vm0, %v6299_v0  ;;  %6153 = vrcp.f32 %v4233_v38 }
0x1c3b   :  { %5825 = vmatprep.subr.bf16.mxu1 %v6299_v0 }
0x1c3c   :  { %v6152_v33 = vpop.eup %6151 }
0x1c3d   :  { %v4114_v34 = vmul.f32 %v6152_v33, %v7270_v59 }
0x1c3f   :  { %v4115_v35 = vpack.c.bf16 %v4114_v34, %v4114_v34 }
0x1c41   :  { %5816 = vmatmul.mubr.msk.bf16.vlgmr.msra.gmra.mrb[132].mxu1 %vm622_vm5, %v4115_v35 }
0x1c42   :  { %5827 = vmatprep.mubr.msk.bf16.mxu1 %vm6300_vm0, %v6299_v0 }
0x1c44   :  { %v6154_v40 = vpop.eup %6153 }
0x1c45   :  { %v4235_v42 = vmul.f32 %v6154_v40, %v7274_v60 }
0x1c47   :  { %v4236_v43 = vpack.c.bf16 %v4235_v42, %v4235_v42 }
0x1c49   :  { %v4451_v36 = vpop.xlane.xlu1 %4450 }
0x1c5e   :  { %v4343_v39 = vpop.xlane.xlu0 %4342 }
0x1c5f   :  { %6155 = vrcp.f32 %v4343_v39 }
0x1c60   :  { %6157 = vrcp.f32 %v4451_v36 }
0x1c62   :  { %v4348_v46 = vpop.permute.xlu0 %4347 }
0x1c66   :  { %v4456_v52 = vpop.permute.xlu0 %4455 }
0x1c69   :  { %v6156_v45 = vpop.eup %6155 }
0x1c6a   :  { %v4345_v47 = vmul.f32 %v6156_v45, %v7286_v8  ;;  %v6158_v16 = vpop.eup %6157  ;;  %v4564_v55 = vpop.permute.xlu0 %4563 }
0x1c6b   :  { %v4453_v53 = vmul.f32 %v6158_v16, %v7281_v5  ;;  %v5180_v16 = vld [vmem:[#allocation8 + $0x10] ss:$0 sm:$0xff] }
0x1c6c   :  { %v4346_v48 = vpack.c.bf16 %v4345_v47, %v4345_v47 }
0x1c6d   :  { %v4454_v51 = vpack.c.bf16 %v4453_v53, %v4453_v53 }
0x1c76   :  { %v4559_v37 = vpop.xlane.xlu1 %4558 }
0x1c77   :  { %6159 = vrcp.f32 %v4559_v37 }
0x1c7a   :  { %v4239_v44 = vpop.permute.xlu1 %4238 }
0x1c7b   :  { %5826 = vmatpush3.bf16.msra.mxu1 %v4239_v44 }
0x1c7c   :  { %5837 = vmatprep.subr.bf16.mxu1 %v6299_v0 }
0x1c7e   :  { %5828 = vmatmul.mubr.msk.bf16.vlgmr.msra.gmra.mrb[136].mxu1 %vm622_vm5, %v4236_v43 }
0x1c7f   :  { %5838 = vmatpush3.bf16.msra.mxu1 %v4348_v46  ;;  %5839 = vmatprep.mubr.msk.bf16.mxu1 %vm6300_vm0, %v6299_v0 }
0x1c80   :  { %5849 = vmatprep.subr.bf16.mxu1 %v6299_v0 }
0x1c81   :  { %v6160_v54 = vpop.eup %6159 }
0x1c82   :  { %v4561_v11 = vmul.f32 %v6160_v54, %v7291_v19 }
0x1c84   :  { %v4562_v56 = vpack.c.bf16 %v4561_v11, %v4561_v11 }
0x1c86   :  { %5840 = vmatmul.mubr.msk.bf16.vlgmr.msra.gmra.mrb[140].mxu1 %vm622_vm5, %v4346_v48 }
0x1c87   :  { %5850 = vmatpush3.bf16.msra.mxu1 %v4456_v52  ;;  %5851 = vmatprep.mubr.msk.bf16.mxu1 %vm6300_vm0, %v6299_v0 }
0x1c88   :  { %5861 = vmatprep.subr.bf16.mxu1 %v6299_v0 }
0x1c8e   :  { %5852 = vmatmul.mubr.msk.bf16.vlgmr.msra.gmra.mrb[144].mxu1 %vm622_vm5, %v4454_v51 }
0x1c8f   :  { %5862 = vmatpush3.bf16.msra.mxu1 %v4564_v55  ;;  %5863 = vmatprep.mubr.msk.bf16.mxu1 %vm6300_vm0, %v6299_v0 }
0x1c90   :  { %5875 = vmatprep.subr.bf16.mxu1 %v6299_v0 }
0x1c96   :  { %5864 = vmatmul.mubr.msk.bf16.vlgmr.msra.gmra.mrb[148].mxu1 %vm622_vm5, %v4562_v56 }
0x1c97   :  { %5879 = vmatprep.mubr.msk.bf16.mxu1 %vm6300_vm0, %v6299_v0 }
0x1cc3   :  { %v3831_v57 = vpop.f32.mrb[120].mxu1 }
0x1cc4   :  { %v5781_v58 = vpop.f32.mrb[121].mxu1 }
0x1cc5   :  { %v3834_v59 = vpop.f32.mrb[122].mxu1 }
0x1cc6   :  { %v5782_v49 = vpop.f32.mrb[123].mxu1 }
0x1d04   :  { %v3940_v60 = vpop.f32.mrb[124].mxu1 }
0x1d05   :  { %v5793_v63 = vpop.f32.mrb[125].mxu1 }
0x1d06   :  { %v3943_v61 = vpop.f32.mrb[126].mxu1 }
0x1d07   :  { %v5794_v1 = vpop.f32.mrb[127].mxu1 }
0x1d0c   :  { %v4048_v3 = vpop.f32.mrb[128].mxu1 }
0x1d0d   :  { %v5805_v4 = vpop.f32.mrb[129].mxu1 }
0x1d0e   :  { %v4051_v2 = vpop.f32.mrb[130].mxu1 }
0x1d0f   :  { %v5806_v5 = vpop.f32.mrb[131].mxu1 }
0x1d14   :  { %v4156_v62 = vpop.f32.mrb[132].mxu1 }
0x1d15   :  { %v5817_v6 = vpop.f32.mrb[133].mxu1 }
0x1d16   :  { %v4159_v7 = vpop.f32.mrb[134].mxu1  ;;  %v6011_v6 = vld [vmem:[%s7421_s5 + $0x20] sm:$0xff]  }
0x1d17   :  { %v5818_v8 = vpop.f32.mrb[135].mxu1  ;;  %v6012_v7 = vld [vmem:[%s7421_s5 + $0x28] sm:$0xff]  }
0x1d51   :  { %v4278_v9 = vpop.f32.mrb[136].mxu1 }
0x1d52   :  { %v5829_v10 = vpop.f32.mrb[137].mxu1 }
0x1d53   :  { %v4281_v12 = vpop.f32.mrb[138].mxu1 }
0x1d54   :  { %v5830_v24 = vpop.f32.mrb[139].mxu1 }
0x1d59   :  { %v4387_v13 = vpop.f32.mrb[140].mxu1 }
0x1d5a   :  { %v5972_v19 = vpack.i.bf16 %v4387_v13, %v3940_v60  ;;  %v5841_v27 = vpop.f32.mrb[141].mxu1 }
0x1d5b   :  { %v4390_v20 = vpop.f32.mrb[142].mxu1  ;;  %v5184_v27 = vld [vmem:[#allocation8 + $0x14] ss:$0 sm:$0xff] }
0x1d5c   :  { %5973 = vrot.lane.b32.xlu1 %v5972_v19, %s6296_s28  ;;  %v5842_v21 = vpop.f32.mrb[143].mxu1 }
0x1d61   :  { %v4495_v22 = vpop.f32.mrb[144].mxu1 }
0x1d62   :  { %v5977_v41 = vpack.i.bf16 %v4495_v22, %v4048_v3  ;;  %v5853_v23 = vpop.f32.mrb[145].mxu1  ;;  %v5185_v22 = vld [vmem:[#allocation8 + $0x15] ss:$0 sm:$0xff] }
0x1d63   :  { %v4498_v25 = vpop.f32.mrb[146].mxu1 }
0x1d64   :  { %5978 = vrot.lane.b32.xlu0 %v5977_v41, %s6312_s26  ;;  %v5854_v26 = vpop.f32.mrb[147].mxu1 }
0x1d69   :  { %v4603_v29 = vpop.f32.mrb[148].mxu1 }
0x1d6a   :  { %v5982_v30 = vpack.i.bf16 %v4603_v29, %v4156_v62  ;;  %v5865_v28 = vpop.f32.mrb[149].mxu1  ;;  %v6010_v62 = vld [vmem:[#allocation7 + $0x18] sm:$0xff]   ;;  %v6013_v29 = vld [vmem:[%s7421_s5 + $0x30] sm:$0xff]  }
0x1d6b   :  { %v4606_v50 = vpop.f32.mrb[150].mxu1  ;;  %v5186_v28 = vld [vmem:[#allocation8 + $0xe] ss:$0 sm:$0xff] }
0x1d6c   :  { %5983 = vrot.lane.b32.xlu1 %v5982_v30, %s6313_s27  ;;  %v5866_v31 = vpop.f32.mrb[151].mxu1  ;;  %v6014_v30 = vld [vmem:[%s7421_s5 + $0x38] sm:$0xff]  }
0x1dce   :  { %v5974_v32 = vpop.permute.xlu1 %5973 }
0x1dcf   :  { %v5976_v34 = vunpack.i.h.bf16 %v5974_v32  ;;  %v5975_v35 = vunpack.i.l.bf16 %v5974_v32 }
0x1dd1   :  { %v4621_v40 = vsel %vm171_vm2, %v4278_v9, %v5976_v34  ;;  %v4174_v37 = vsel %vm171_vm2, %v3831_v57, %v5975_v35 }
0x1dd6   :  { %v5979_v33 = vpop.permute.xlu0 %5978 }
0x1dd7   :  { %v5981_v38 = vunpack.i.h.bf16 %v5979_v33  ;;  %v5980_v39 = vunpack.i.l.bf16 %v5979_v33 }
0x1dd9   :  { %v4622_v43 = vsel %vm622_vm5, %v4621_v40, %v5981_v38  ;;  %v4175_v45 = vsel %vm622_vm5, %v4174_v37, %v5980_v39  ;;  %v5198_v40 = vld [vmem:[#allocation8 + $0x11] ss:$0 sm:$0xff] }
0x1dde   :  { %v5984_v36 = vpop.permute.xlu1 %5983 }
0x1ddf   :  { %v5986_v42 = vunpack.i.h.bf16 %v5984_v36  ;;  %v5985_v44 = vunpack.i.l.bf16 %v5984_v36 }
0x1de1   :  { %v4623_v46 = vsel %vm624_vm6, %v4622_v43, %v5986_v42  ;;  %v4176_v47 = vsel %vm624_vm6, %v4175_v45, %v5985_v44 }
0x1de2   :  { %v4624_v48 = vpack.c.bf16 %v4623_v46, %v4176_v47 }
0x1de4   :  { %5872 = vmatmul.mubr.msk.bf16.vlgmr.msra.gmra.mrb[148].mxu0 %vm122_vm1, %v4624_v48 }
0x1de5   :  { %5891 = vmatprep.mubr.msk.bf16.mxu0 %vm6300_vm0, %v6299_v0  ;;  %5884 = vmatpush3.bf16.msra.mxu0 %v6011_v6 }
0x1de6   :  { %5885 = vmatprep.subr.bf16.mxu0 %v6299_v0 }
0x1de9   :  { %5886 = vmatpush3.bf16.msra.mxu0 %v6012_v7 }
0x1dea   :  { %5887 = vmatprep.subr.bf16.mxu0 %v6299_v0 }
0x1ded   :  { %5888 = vmatpush3.bf16.msra.mxu0 %v6013_v29 }
0x1dee   :  { %5889 = vmatprep.subr.bf16.mxu0 %v6299_v0 }
0x1df1   :  { %5890 = vmatpush3.bf16.msra.mxu0 %v6014_v30 }
0x1eb7   :  { %v4684_v52 = vpop.f32.mrb[148].mxu0 }
0x1eb8   :  { %v4685_v53 = vadd.f32 %v5180_v16, %v4684_v52  ;;  %v5873_v51 = vpop.f32.mrb[149].mxu0 }
0x1eb9   :  { %v4687_v54 = vpop.f32.mrb[150].mxu0 }
0x1eba   :  { %v4691_v55 = vadd.f32 %v4685_v53, %v7165_v17  ;;  %v4688_v11 = vadd.f32 %v5180_v16, %v4687_v54  ;;  %v5874_v56 = vpop.f32.mrb[151].mxu0 }
0x1ebc   :  { %v4692_v57 = vadd.f32 %v4688_v11, %v7167_v18  ;;  %v4695_v58 = vsel %vm122_vm1, %v4691_v55, 0.0  ;;  %v6009_v18 = vld [vmem:[#allocation7 + $0x10] sm:$0xff]  }
0x1ebd   :  { %4696 = vadd.xlane.f32.xlu0 %v4695_v58  ;;  %5876 = vmatpush3.bf16.msra.mxu1 %v6009_v18 }
0x1ebe   :  { %v4698_v59 = vsel %vm122_vm1, %v4692_v57, 0.0  ;;  %5877 = vmatprep.subr.bf16.mxu1 %v6299_v0 }
0x1ebf   :  { %4699 = vadd.xlane.f32.xlu1 %v4698_v59 }
0x1ec1   :  { %5878 = vmatpush3.bf16.msra.mxu1 %v6010_v62  ;;  %v5205_v62 = vld [vmem:[#allocation8 + $0x17] ss:$0 sm:$0xff] }
0x1ec2   :  { %5895 = vmatprep.subr.bf16.mxu1 %v6299_v0 }
0x1f4a   :  { %v4697_v49 = vpop.xlane.xlu0 %4696 }
0x1f4b   :  { %v4701_v60 = vmul.f32 0.03125, %v4697_v49 }
0x1f4c   :  { %v4700_v63 = vpop.xlane.xlu1 %4699 }
0x1f4d   :  { %v4703_v61 = vsub.f32 %v4691_v55, %v4701_v60  ;;  %v4702_v1 = vmul.f32 0.03125, %v4700_v63 }
0x1f4f   :  { %v4704_v3 = vsub.f32 %v4692_v57, %v4702_v1  ;;  %v4705_v4 = vmul.f32 %v4703_v61, %v4703_v61 }
0x1f51   :  { %v4707_v2 = vsel %vm122_vm1, %v4705_v4, 0.0  ;;  %v4706_v17 = vmul.f32 %v4704_v3, %v4704_v3 }
0x1f52   :  { %4708 = vadd.xlane.f32.xlu0 %v4707_v2 }
0x1f53   :  { %v4710_v5 = vsel %vm122_vm1, %v4706_v17, 0.0  ;;  %v5204_v17 = vld [vmem:[#allocation8 + $0x16] ss:$0 sm:$0xff] }
0x1f56   :  { %4711 = vadd.xlane.f32.xlu0 %v4710_v5 }
0x1fdf   :  { %v4709_v8 = vpop.xlane.xlu0 %4708 }
0x1fe0   :  { %v4713_v9 = vmul.f32 0.03125, %v4709_v8 }
0x1fe2   :  { %v4715_v10 = vadd.f32 1e-05, %v4713_v9 }
0x1fe3   :  { %v4712_v12 = vpop.xlane.xlu0 %4711 }
0x1fe4   :  { %6161 = vrsqrt.f32 %v4715_v10  ;;  %v4714_v24 = vmul.f32 0.03125, %v4712_v12 }
0x1fe6   :  { %v4716_v13 = vadd.f32 1e-05, %v4714_v24 }
0x1fe8   :  { %6163 = vrsqrt.f32 %v4716_v13 }
0x1fee   :  { %v6162_v15 = vpop.eup %6161 }
0x1fef   :  { %v4719_v19 = vmul.f32 %v6162_v15, %v4703_v61 }
0x1ff1   :  { %v4725_v21 = vmul.f32 %v5184_v27, %v4719_v19 }
0x1ff2   :  { %v6164_v20 = vpop.eup %6163 }
0x1ff3   :  { %v4720_v14 = vmul.f32 %v6164_v20, %v4704_v3  ;;  %v4731_v23 = vadd.f32 %v5185_v22, %v4725_v21 }
0x1ff5   :  { %v4726_v41 = vmul.f32 %v5184_v27, %v4720_v14 }
0x1ff7   :  { %v4732_v25 = vadd.f32 %v5185_v22, %v4726_v41 }
0x1ff9   :  { %v4733_v26 = vpack.c.bf16 %v4732_v25, %v4731_v23 }
0x1ffb   :  { %5880 = vmatmul.mubr.msk.bf16.vlgmr.msra.gmra.mrb[152].mxu1 %vm122_vm1, %v4733_v26  ;;  %v6016_v26 = vld [vmem:[%s7422_s6 + $0x8] sm:$0xff]  }
0x1ffc   :  { %5899 = vmatprep.mubr.msk.bf16.mxu1 %vm6300_vm0, %v6299_v0 }
0x20ce   :  { %v4793_v50 = vpop.f32.mrb[152].mxu1 }
0x20cf   :  { %v4794_v31 = vadd.f32 %v5186_v28, %v4793_v50  ;;  %v5881_v32 = vpop.f32.mrb[153].mxu1 }
0x20d0   :  { %v4796_v33 = vpop.f32.mrb[154].mxu1 }
0x20d1   :  { %v4797_v34 = vadd.f32 %v5186_v28, %v4796_v33  ;;  %v5882_v35 = vpop.f32.mrb[155].mxu1  ;;  %v4800_v38 = vmax.f32 %v4794_v31, 0.0 }
0x20d3   :  { %v4801_v39 = vmax.f32 %v4797_v34, 0.0  ;;  %v5206_v34 = vld [vmem:[#allocation8 + $0x18] ss:$0 sm:$0xff] }
0x20d5   :  { %v4802_v36 = vpack.c.bf16 %v4801_v39, %v4800_v38 }
0x20d7   :  { %5892 = vmatmul.mubr.msk.bf16.vlgmr.msra.gmra.mrb[152].mxu0 %vm2431_vm7, %v4802_v36 }
0x21aa   :  { %v4878_v37 = vpop.f32.mrb[152].mxu0 }
0x21ab   :  { %v4879_v42 = vadd.f32 %v5198_v40, %v4878_v37  ;;  %v5893_v44 = vpop.f32.mrb[153].mxu0 }
0x21ac   :  { %v4881_v43 = vpop.f32.mrb[154].mxu0 }
0x21ad   :  { %v4885_v45 = vadd.f32 %v4879_v42, %v4731_v23  ;;  %v4882_v46 = vadd.f32 %v5198_v40, %v4881_v43  ;;  %v5894_v47 = vpop.f32.mrb[155].mxu0  ;;  %v5207_v40 = vld [vmem:[#allocation8 + $0x19] ss:$0 sm:$0xff]  ;;  %v5208_v43 = vld [vmem:[#allocation8 + $0x1a] ss:$0 sm:$0xff] }
0x21af   :  { %v4886_v48 = vadd.f32 %v4882_v46, %v4732_v25  ;;  %v4889_v16 = vsel %vm122_vm1, %v4885_v45, 0.0  ;;  %v6015_v25 = vld [vmem:[%s7422_s6] sm:$0xff]   ;;  %s6314_s6 = smov [#allocation10]  }
0x21b0   :  { %4890 = vadd.xlane.f32.xlu1 %v4889_v16  ;;  %5896 = vmatpush3.bf16.msra.mxu1 %v6015_v25  ;;  %s5040_s30 = sshll.u32 %s6314_s6, 4  ;;  %s5041_s30 = int_to_ptr.vmem [resolvable:$true] %s5040_s30 }
0x21b1   :  { %v4892_v52 = vsel %vm122_vm1, %v4886_v48, 0.0  ;;  %5897 = vmatprep.subr.bf16.mxu1 %v6299_v0  ;;  %s6261_s9 = scalar_lea.vmem %s5041_s30, 256  ;;  %p6266_p5 = scmp.lt.s32.totalorder %s5041_s30, %s5041_s30 }
0x21b2   :  { %4893 = vadd.xlane.f32.xlu0 %v4892_v52  ;;  %p6262_p4 = scmp.ne.s32.totalorder %s5041_s30, %s6261_s9  ;;  %p6267_p6 = scmp.lt.s32.totalorder %s6261_s9, %s6261_s9 }
0x21b4   :  { %5898 = vmatpush3.bf16.msra.mxu1 %v6016_v26  ;;  %p6268_p7 = por %p6267_p6, %p6266_p5 }
0x21b6   :  { %p6269_p8 = pnand %p6268_p7, %p6262_p4 }
0x223d   :  { %v4891_v53 = vpop.xlane.xlu1 %4890 }
0x223e   :  { %v4895_v51 = vmul.f32 0.03125, %v4891_v53 }
0x223f   :  { %v4894_v54 = vpop.xlane.xlu0 %4893 }
0x2240   :  { %v4897_v55 = vsub.f32 %v4885_v45, %v4895_v51  ;;  %v4896_v11 = vmul.f32 0.03125, %v4894_v54 }
0x2242   :  { %v4898_v56 = vsub.f32 %v4886_v48, %v4896_v11  ;;  %v4899_v57 = vmul.f32 %v4897_v55, %v4897_v55 }
0x2244   :  { %v4901_v58 = vsel %vm122_vm1, %v4899_v57, 0.0  ;;  %v4900_v59 = vmul.f32 %v4898_v56, %v4898_v56 }
0x2245   :  { %4902 = vadd.xlane.f32.xlu1 %v4901_v58 }
0x2246   :  { %v4904_v49 = vsel %vm122_vm1, %v4900_v59, 0.0 }
0x2247   :  { %4905 = vadd.xlane.f32.xlu0 %v4904_v49 }
0x22d2   :  { %v4903_v60 = vpop.xlane.xlu1 %4902 }
0x22d3   :  { %v4907_v63 = vmul.f32 0.03125, %v4903_v60 }
0x22d4   :  { %v4906_v61 = vpop.xlane.xlu0 %4905 }
0x22d5   :  { %v4909_v1 = vadd.f32 1e-05, %v4907_v63  ;;  %v4908_v3 = vmul.f32 0.03125, %v4906_v61 }
0x22d7   :  { %6165 = vrsqrt.f32 %v4909_v1  ;;  %v4910_v4 = vadd.f32 1e-05, %v4908_v3 }
0x22d9   :  { %6167 = vrsqrt.f32 %v4910_v4 }
0x22e1   :  { %v6166_v2 = vpop.eup %6165 }
0x22e2   :  { %v4913_v5 = vmul.f32 %v6166_v2, %v4897_v55 }
0x22e3   :  { %v6168_v18 = vpop.eup %6167 }
0x22e4   :  { %v4919_v6 = vmul.f32 %v5204_v17, %v4913_v5  ;;  %v4914_v7 = vmul.f32 %v6168_v18, %v4898_v56 }
0x22e6   :  { %v4925_v8 = vadd.f32 %v5205_v62, %v4919_v6  ;;  %v4920_v9 = vmul.f32 %v5204_v17, %v4914_v7 }
0x22e8   :  { %v4929_v10 = vsel %vm122_vm1, %v4925_v8, 0.0  ;;  %v4926_v12 = vadd.f32 %v5205_v62, %v4920_v9 }
0x22e9   :  { %4930 = vadd.xlane.f32.xlu1 %v4929_v10 }
0x22ea   :  { %v4932_v24 = vsel %vm122_vm1, %v4926_v12, 0.0 }
0x22eb   :  { %4933 = vadd.xlane.f32.xlu0 %v4932_v24 }
0x2376   :  { %v4931_v13 = vpop.xlane.xlu1 %4930 }
0x2377   :  { %v4935_v15 = vmul.f32 0.03125, %v4931_v13 }
0x2378   :  { %v4934_v19 = vpop.xlane.xlu0 %4933 }
0x2379   :  { %v4937_v27 = vsub.f32 %v4925_v8, %v4935_v15  ;;  %v4936_v20 = vmul.f32 0.03125, %v4934_v19 }
0x237b   :  { %v4938_v21 = vsub.f32 %v4926_v12, %v4936_v20  ;;  %v4939_v14 = vmul.f32 %v4937_v27, %v4937_v27 }
0x237d   :  { %v4941_v22 = vsel %vm122_vm1, %v4939_v14, 0.0  ;;  %v4940_v41 = vmul.f32 %v4938_v21, %v4938_v21 }
0x237e   :  { %4942 = vadd.xlane.f32.xlu1 %v4941_v22 }
0x237f   :  { %v4944_v23 = vsel %vm122_vm1, %v4940_v41, 0.0 }
0x2380   :  { %4945 = vadd.xlane.f32.xlu0 %v4944_v23 }
0x240b   :  { %v4943_v29 = vpop.xlane.xlu1 %4942 }
0x240c   :  { %v4947_v30 = vmul.f32 0.03125, %v4943_v29 }
0x240d   :  { %v4946_v28 = vpop.xlane.xlu0 %4945 }
0x240e   :  { %v4949_v50 = vadd.f32 1e-05, %v4947_v30  ;;  %v4948_v31 = vmul.f32 0.03125, %v4946_v28 }
0x2410   :  { %6169 = vrsqrt.f32 %v4949_v50  ;;  %v4950_v32 = vadd.f32 1e-05, %v4948_v31 }
0x2412   :  { %6171 = vrsqrt.f32 %v4950_v32 }
0x241a   :  { %v6170_v33 = vpop.eup %6169 }
0x241b   :  { %v4953_v35 = vmul.f32 %v6170_v33, %v4937_v27 }
0x241c   :  { %v6172_v38 = vpop.eup %6171 }
0x241d   :  { %v4959_v39 = vmul.f32 %v5206_v34, %v4953_v35  ;;  %v4954_v36 = vmul.f32 %v6172_v38, %v4938_v21 }
0x241f   :  { %v4960_v37 = vmul.f32 %v5206_v34, %v4954_v36  ;;  %v4965_v42 = vadd.f32 %v5207_v40, %v4959_v39 }
0x2421   :  { %v4966_v44 = vadd.f32 %v5207_v40, %v4960_v37 }
0x2423   :  { %v4967_v0 = vpack.c.bf16 %v4966_v44, %v4965_v42 }
0x2425   :  { %5900 = vmatmul.mubr.msk.bf16.vlgmr.msra.gmra.mrb[156].mxu1 %vm122_vm1, %v4967_v0 }
0x24f8   :  { %v5026_v45 = vpop.f32.mrb[156].mxu1 }
0x24f9   :  { %v5027_v46 = vadd.f32 %v5208_v43, %v5026_v45  ;;  %v5901_v47 = vpop.f32.mrb[157].mxu1 }
0x24fa   :  { %v5029_v48 = vpop.f32.mrb[158].mxu1 }
0x24fb   :  { %5033 = vst.msk [vmem:[#allocation10] sm:$0xff] %vm171_vm2, %v5027_v46  ;;  %v5030_v16 = vadd.f32 %v5208_v43, %v5029_v48  ;;  %v5902_v52 = vpop.f32.mrb[159].mxu1 }
0x24fd   :  { %5034 = vst.msk [vmem:[#allocation10 + $0x8] sm:$0xff] %vm171_vm2, %v5030_v16 }
0x24fe   :  { %6272 = shalt.err (!%p6269_p8)
}
0x24ff   :  { %s6273_s4 = scalar_lea.hbm %s7424_s8, 256 }
0x2500   :  { %p6274_p9 = scmp.ne.s32.totalorder %s7424_s8, %s6273_s4  ;;  %p6277_p10 = scmp.lt.u32.totalorder %s6273_s4, %s7424_s8 }
0x2502   :  { %p6279_p11 = pnand %p6277_p10, %p6274_p9 }
0x2504   :  { %6282 = shalt.err (!%p6279_p11)
}
0x2505   :  { %5046 = dma.vmem_to_hbm [thread:$0]  %s5041_s30, 256, %s7424_s8, [#allocation4], %s6295_s3, %s6295_s3, %s6296_s28  }
0x2506   :  { %6289 = dma.done.wait [#allocation4], 256  }
0x2507   :  { %6290 = vsyncadd [#allocation4], 4294967040 }
0x2508   :  { %5050 = vsyncpa [#allocation3], 1 }
0x2509   :  { %5051 = vsyncpa [#allocation6], 1 }
0x250a   :  { %5052 = vsyncpa [#allocation9], 1 }
0x250b   :  { %5053 = vsyncpa [#allocation4], 1 }

</bundles_post_ra>
